<compile_context>
chip_gen: v7x
topology: tpu7x:2x2x1
jax: 0.10.0
libtpu: 0.0.40
codegen_flags: <defaults>
</compile_context>

<pallas_src>
import functools
import math

import jax
import jax.numpy as jnp
from jax.experimental import pallas as pl
from jax.experimental.pallas import tpu as pltpu

# ----------------------------- model config ---------------------------------
IN_DIM = 4
OUT_DIM = 4
DIM = 128
FFN_DIM = 256
FREQ_DIM = 256
NUM_HEADS = 2
HEAD_DIM = DIM // NUM_HEADS
NUM_LAYERS = 2
PATCH_SIZE = (1, 2, 2)
EPS = 1e-6
ATTN_SCALE = 1.0 / math.sqrt(HEAD_DIM)

KP = IN_DIM * PATCH_SIZE[0] * PATCH_SIZE[1] * PATCH_SIZE[2]          # 16
KP_PAD = 128                                                         # lane-dense im2col K
HEAD_OUT = OUT_DIM * PATCH_SIZE[0] * PATCH_SIZE[1] * PATCH_SIZE[2]   # 16
HEAD_OUT_PAD = 128                                                   # lane-dense head output


# ----------------------------- in-kernel helpers ------------------------------
def _layernorm(x):
    mu = jnp.mean(x, axis=-1, keepdims=True)
    xc = x - mu
    var = jnp.mean(xc * xc, axis=-1, keepdims=True)
    return xc * jax.lax.rsqrt(var + EPS)


def _attention(q, k, v, wo, bo):
    """q:[Lq,D], k/v:[Lk,D] f32 (heads = contiguous 64-lane slices); wo bf16 [D,D]."""
    y = None
    for h in range(NUM_HEADS):
        sl = slice(h * HEAD_DIM, (h + 1) * HEAD_DIM)
        qh = q[:, sl].astype(jnp.bfloat16)
        kh = k[:, sl].astype(jnp.bfloat16)
        vh = v[:, sl].astype(jnp.bfloat16)
        s = jax.lax.dot_general(qh, kh, (((1,), (1,)), ((), ())),
                                preferred_element_type=jnp.float32) * ATTN_SCALE
        m = jnp.max(s, axis=-1, keepdims=True)
        p = jnp.exp(s - m)
        denom = jnp.sum(p, axis=-1, keepdims=True)
        oh = jnp.dot(p.astype(jnp.bfloat16), vh, preferred_element_type=jnp.float32)
        oh = oh * pl.reciprocal(denom, approx=True)
        contrib = jnp.dot(oh.astype(jnp.bfloat16), wo[sl, :],
                          preferred_element_type=jnp.float32)
        y = contrib if y is None else y + contrib
    return y + bo


# ----------------------------- fused forward kernel ---------------------------
def _wan_forward_kernel(
        patches_ref, patch_w_ref, patch_b_ref,
        sin_emb_ref, tw1_ref, tb1_ref, tw2_ref, tb2_ref,
        ctx_ref, cosf_ref, sins_ref, pswap_ref,
        mod_ref, sw_ref, sb_ref, cw_ref, cb_ref, n3_ref,
        fw1_ref, fb1_ref, fw2_ref, fb2_ref,
        hmod_ref, hw_ref, hb_ref,
        tap_ref, feat_ref, head_ref,
        x_acc, e_acc, *, feature_idx):
    layer = pl.program_id(0)

    # ---- prologue (layer 0): patch embedding + time-embedding MLP ----
    @pl.when(layer == 0)
    def _():
        xp = jnp.dot(patches_ref[...], patch_w_ref[...],
                     preferred_element_type=jnp.float32) + patch_b_ref[...]
        x_acc[...] = xp
        e0 = jnp.dot(sin_emb_ref[...].astype(jnp.bfloat16), tw1_ref[...],
                     preferred_element_type=jnp.float32) + tb1_ref[...]
        e0 = e0 * jax.nn.sigmoid(e0)                         # SiLU
        e_acc[...] = jnp.dot(e0.astype(jnp.bfloat16), tw2_ref[...],
                             preferred_element_type=jnp.float32) + tb2_ref[...]

    x = x_acc[...]                                           # [L, D] f32
    e = e_acc[...]                                           # [1, D] f32
    e6 = mod_ref[...] + e                                    # [6, D]
    cosf = cosf_ref[...]
    sins = sins_ref[...]
    psw = pswap_ref[...]
    sb = sb_ref[...]
    cb = cb_ref[...]
    n3 = n3_ref[...]

    # ---- self-attention (adaLN modulation + interleaved-pair 3D-RoPE) ----
    h1 = (_layernorm(x) * (1.0 + e6[1:2]) + e6[0:1]).astype(jnp.bfloat16)
    q = jnp.dot(h1, sw_ref[0], preferred_element_type=jnp.float32) + sb[0:1]
    k = jnp.dot(h1, sw_ref[1], preferred_element_type=jnp.float32) + sb[1:2]
    v = jnp.dot(h1, sw_ref[2], preferred_element_type=jnp.float32) + sb[2:3]
    # RoPE: out = x*cos + pair_swap(x)*(+-sin); pair swap via a permutation matmul
    q = q * cosf + jnp.dot(q, psw, preferred_element_type=jnp.float32) * sins
    k = k * cosf + jnp.dot(k, psw, preferred_element_type=jnp.float32) * sins
    y = _attention(q, k, v, sw_ref[3], sb[3:4])
    x = x + y * e6[2:3]

    # ---- cross-attention to context (affine cross_attn_norm fused) ----
    ln3 = (_layernorm(x) * n3[0:1] + n3[1:2]).astype(jnp.bfloat16)
    ctx = ctx_ref[...]
    qc = jnp.dot(ln3, cw_ref[0], preferred_element_type=jnp.float32) + cb[0:1]
    kc = jnp.dot(ctx, cw_ref[1], preferred_element_type=jnp.float32) + cb[1:2]
    vc = jnp.dot(ctx, cw_ref[2], preferred_element_type=jnp.float32) + cb[2:3]
    x = x + _attention(qc, kc, vc, cw_ref[3], cb[3:4])

    # ---- FFN (adaLN modulation + GELU fused into the same kernel) ----
    h2 = (_layernorm(x) * (1.0 + e6[4:5]) + e6[3:4]).astype(jnp.bfloat16)
    f1 = jnp.dot(h2, fw1_ref[...], preferred_element_type=jnp.float32) + fb1_ref[...]
    f1 = jax.nn.gelu(f1, approximate=True)
    f2 = jnp.dot(f1.astype(jnp.bfloat16), fw2_ref[...],
                 preferred_element_type=jnp.float32) + fb2_ref[...]
    x = x + f2 * e6[5:6]
    x_acc[...] = x

    # ---- feature tap (block_features for return_features) ----
    @pl.when(layer == feature_idx)
    def _():
        tap_ref[...] = x

    # ---- epilogue (last layer): final token features + modulated head ----
    @pl.when(layer == pl.num_programs(0) - 1)
    def _():
        feat_ref[...] = x
        e2 = hmod_ref[...] + e                               # [2, D]
        hh = (_layernorm(x) * (1.0 + e2[1:2]) + e2[0:1]).astype(jnp.bfloat16)
        head_ref[...] = jnp.dot(hh, hw_ref[...],
                                preferred_element_type=jnp.float32) + hb_ref[...]


def _run_fused_model(packed, patches, sin_emb, context2d, cosf, sins, pswap,
                     feature_idx, bl):
    kernel = functools.partial(_wan_forward_kernel, feature_idx=feature_idx)
    c2 = lambda l: (0, 0)
    c3 = lambda l: (l, 0, 0)
    c4 = lambda l: (l, 0, 0, 0)
    lc = context2d.shape[0]

    out_shapes = (
        jax.ShapeDtypeStruct((bl, DIM), jnp.float32),            # tap (feature_layer)
        jax.ShapeDtypeStruct((bl, DIM), jnp.float32),            # final block output
        jax.ShapeDtypeStruct((bl, HEAD_OUT_PAD), jnp.float32),   # padded head output
    )
    in_specs = [
        pl.BlockSpec((bl, KP_PAD), c2),                # patches (im2col, zero-padded K)
        pl.BlockSpec((KP_PAD, DIM), c2),               # patch weight
        pl.BlockSpec((1, DIM), c2),                    # patch bias
        pl.BlockSpec((1, FREQ_DIM), c2),               # sinusoidal timestep embedding
        pl.BlockSpec((FREQ_DIM, DIM), c2),             # time_w1
        pl.BlockSpec((1, DIM), c2),                    # time_b1
        pl.BlockSpec((DIM, DIM), c2),                  # time_w2
        pl.BlockSpec((1, DIM), c2),                    # time_b2
        pl.BlockSpec((lc, DIM), c2),                   # context tokens
        pl.BlockSpec((bl, DIM), c2),                   # rope cos (per-lane, tiled heads)
        pl.BlockSpec((bl, DIM), c2),                   # rope +-sin
        pl.BlockSpec((DIM, DIM), c2),                  # pair-swap permutation
        pl.BlockSpec((None, 6, DIM), c3),              # adaLN modulation   [per layer]
        pl.BlockSpec((None, 4, DIM, DIM), c4),         # self-attn wq/wk/wv/wo
        pl.BlockSpec((None, 4, DIM), c3),              # self-attn biases
        pl.BlockSpec((None, 4, DIM, DIM), c4),         # cross-attn wq/wk/wv/wo
        pl.BlockSpec((None, 4, DIM), c3),              # cross-attn biases
        pl.BlockSpec((None, 2, DIM), c3),              # norm3 gamma/beta
        pl.BlockSpec((None, DIM, FFN_DIM), c3),        # ffn w1
        pl.BlockSpec((None, 1, FFN_DIM), c3),          # ffn b1
        pl.BlockSpec((None, FFN_DIM, DIM), c3),        # ffn w2
        pl.BlockSpec((None, 1, DIM), c3),              # ffn b2
        pl.BlockSpec((2, DIM), c2),                    # head modulation
        pl.BlockSpec((DIM, HEAD_OUT_PAD), c2),         # head weight (zero-padded N)
        pl.BlockSpec((1, HEAD_OUT_PAD), c2),           # head bias   (zero-padded N)
    ]
    out_specs = (
        pl.BlockSpec((bl, DIM), c2),
        pl.BlockSpec((bl, DIM), c2),
        pl.BlockSpec((bl, HEAD_OUT_PAD), c2),
    )
    return pl.pallas_call(
        kernel,
        out_shape=out_shapes,
        grid=(NUM_LAYERS,),
        in_specs=in_specs,
        out_specs=out_specs,
        scratch_shapes=[pltpu.VMEM((bl, DIM), jnp.float32),   # running token state
                        pltpu.VMEM((1, DIM), jnp.float32)],   # time-embedding vector
        compiler_params=pltpu.CompilerParams(
            dimension_semantics=("arbitrary",)),   # layer loop is sequential (carried state)
    )(patches, packed['patch_w'], packed['patch_b'],
      sin_emb, packed['time_w1'], packed['time_b1'],
      packed['time_w2'], packed['time_b2'],
      context2d, cosf, sins, pswap,
      packed['mod'], packed['self_w'], packed['self_b'],
      packed['cross_w'], packed['cross_b'], packed['norm3'],
      packed['ffn_w1'], packed['ffn_b1'], packed['ffn_w2'], packed['ffn_b2'],
      packed['head_mod'], packed['head_w'], packed['head_b'])


# ----------------------------- glue: embeddings / RoPE -----------------------
def sinusoidal_embedding_1d(dim, position):
    half = dim // 2
    position = position.astype(jnp.float32)
    inv = jnp.power(10000.0, -jnp.arange(half, dtype=jnp.float32) / half)
    sinusoid = position[:, None] * inv[None, :]
    return jnp.concatenate([jnp.cos(sinusoid), jnp.sin(sinusoid)], axis=1)


def rope_tables(Tg, Hg, Wg, head_dim, num_heads):
    """Wan-style 3D RoPE, interleaved-pair convention, expanded to full per-lane
    [L, DIM] tables plus the pair-swap permutation matrix."""
    c = head_dim // 2
    ct = c - 2 * (c // 3)
    ch = cw = c // 3

    def angles(n, half):
        inv = jnp.power(10000.0, -jnp.arange(half, dtype=jnp.float32) / half)
        return jnp.arange(n, dtype=jnp.float32)[:, None] * inv[None, :]

    a_t = angles(Tg, ct)
    a_h = angles(Hg, ch)
    a_w = angles(Wg, cw)
    ang = jnp.concatenate([
        jnp.broadcast_to(a_t[:, None, None, :], (Tg, Hg, Wg, ct)),
        jnp.broadcast_to(a_h[None, :, None, :], (Tg, Hg, Wg, ch)),
        jnp.broadcast_to(a_w[None, None, :, :], (Tg, Hg, Wg, cw)),
    ], axis=-1).reshape(Tg * Hg * Wg, c)

    cos2 = jnp.repeat(jnp.cos(ang), 2, axis=-1)                      # [L, head_dim]
    sgn = jnp.tile(jnp.array([-1.0, 1.0], jnp.float32), c)           # [head_dim]
    sin2 = jnp.repeat(jnp.sin(ang), 2, axis=-1) * sgn[None, :]
    cosf = jnp.tile(cos2, (1, num_heads))                            # [L, DIM]
    sins = jnp.tile(sin2, (1, num_heads))

    idx = jnp.arange(DIM)
    swap = idx + 1 - 2 * (idx % 2)                                   # 2i<->2i+1
    pswap = jnp.eye(DIM, dtype=jnp.float32)[swap]                    # P[i, swap(i)] = 1
    return cosf, sins, pswap


# ----------------------------- param packing ---------------------------------
def pack_params(params):
    """Stack per-block weights along a leading layer axis and cast matmul
    operands to bf16 (f32 accumulation happens in-kernel)."""
    bf = lambda a: a.astype(jnp.bfloat16)
    f32 = lambda a: a.astype(jnp.float32)
    blocks = params['blocks']

    wp = params['patch_w'].reshape(DIM, KP).T                        # [KP, DIM]
    wp = jnp.zeros((KP_PAD, DIM), jnp.float32).at[:KP].set(wp)
    hw = jnp.zeros((DIM, HEAD_OUT_PAD), jnp.float32).at[:, :HEAD_OUT].set(params['head_w'])
    hb = jnp.zeros((1, HEAD_OUT_PAD), jnp.float32).at[0, :HEAD_OUT].set(params['head_b'])

    stack_w = lambda key: jnp.stack(
        [jnp.stack([b[key][k] for k in ('wq', 'wk', 'wv', 'wo')]) for b in blocks])
    stack_b = lambda key: jnp.stack(
        [jnp.stack([b[key][k] for k in ('bq', 'bk', 'bv', 'bo')]) for b in blocks])

    return {
        'patch_w': bf(wp),
        'patch_b': f32(params['patch_b'].reshape(1, DIM)),
        'time_w1': bf(params['time_w1']),
        'time_b1': f32(params['time_b1'].reshape(1, DIM)),
        'time_w2': bf(params['time_w2']),
        'time_b2': f32(params['time_b2'].reshape(1, DIM)),
        'mod': f32(jnp.stack([b['modulation'] for b in blocks])),
        'self_w': bf(stack_w('self_attn')),
        'self_b': f32(stack_b('self_attn')),
        'cross_w': bf(stack_w('cross_attn')),
        'cross_b': f32(stack_b('cross_attn')),
        'norm3': f32(jnp.stack([jnp.stack([b['norm3_g'], b['norm3_b']]) for b in blocks])),
        'ffn_w1': bf(jnp.stack([b['ffn_w1'] for b in blocks])),
        'ffn_b1': f32(jnp.stack([b['ffn_b1'].reshape(1, FFN_DIM) for b in blocks])),
        'ffn_w2': bf(jnp.stack([b['ffn_w2'] for b in blocks])),
        'ffn_b2': f32(jnp.stack([b['ffn_b2'].reshape(1, DIM) for b in blocks])),
        'head_mod': f32(params['head_modulation']),
        'head_w': bf(hw),
        'head_b': hb,
    }


# ----------------------------- output reshapes --------------------------------
def unpatchify(x, grid_sizes_py):
    pt, ph, pw = PATCH_SIZE
    out = []
    for b in range(x.shape[0]):
        Tg, Hg, Wg = grid_sizes_py[b]
        u = x[b, :Tg * Hg * Wg].reshape(Tg, Hg, Wg, pt, ph, pw, OUT_DIM)
        u = jnp.einsum('fhwpqrc->cfphqwr', u)
        u = u.reshape(OUT_DIM, Tg * pt, Hg * ph, Wg * pw)
        out.append(u)
    return out


def extract_temporal_features(features, grid_sizes_py):
    B, L, D = features.shape
    feats = []
    for b in range(B):
        Tg, Hg, Wg = grid_sizes_py[b]
        assert L == Tg * Hg * Wg
        feats.append(features[b].reshape(Tg, Hg, Wg, D))
    return jnp.stack(feats, axis=0)


# ----------------------------- full forward ----------------------------------
def feature_extractor_forward(params, x_list, t, context, seq_len,
                              clip_fea=None, y=None,
                              return_features=False,
                              return_temporal_features=False,
                              feature_layer=-1):
    x0 = x_list[0]
    if x0.ndim == 4:           # adapt missing batch dim, as in the torch wrapper
        x0 = x0[None]
    b, c, f, h, w = x0.shape
    pt, ph, pw = PATCH_SIZE
    Tg, Hg, Wg = f // pt, h // ph, w // pw
    L = Tg * Hg * Wg
    assert b == 1, "temporal-feature extraction (torch wrapper) requires batch == 1"
    # TODO(synk): padded-token attention masking for seq_len > L is not implemented.
    assert seq_len == L, "this synthetic kernel assumes seq_len == number of tokens"

    # Conv3d patch embedding (kernel == stride) as im2col; the matmul is in-kernel.
    patches = x0.reshape(b, c, Tg, pt, Hg, ph, Wg, pw)
    patches = patches.transpose(0, 2, 4, 6, 1, 3, 5, 7).reshape(b * L, KP)
    patches = jnp.pad(patches, ((0, 0), (0, KP_PAD - KP))).astype(jnp.bfloat16)

    sin_emb = sinusoidal_embedding_1d(FREQ_DIM, t.astype(jnp.float32))   # [B, FREQ]
    cosf, sins, pswap = rope_tables(Tg, Hg, Wg, HEAD_DIM, NUM_HEADS)
    context2d = context.reshape(-1, DIM).astype(jnp.bfloat16)

    feature_idx = feature_layer if feature_layer >= 0 else NUM_LAYERS - 1
    assert 0 <= feature_idx < NUM_LAYERS

    packed = pack_params(params)
    tap, feat, head_pad = _run_fused_model(packed, patches, sin_emb, context2d,
                                           cosf, sins, pswap, feature_idx, b * L)

    grid_sizes = jnp.array([[Tg, Hg, Wg]], dtype=jnp.int32)
    grid_sizes_py = [(Tg, Hg, Wg)]

    feat_b = feat.reshape(b, L, DIM)
    block_features = [tap.reshape(b, L, DIM)] if return_features else []

    temporal_features = extract_temporal_features(feat_b, grid_sizes_py)
    assert temporal_features.shape[0] == 1
    temporal_features = temporal_features[0]

    head_out = head_pad[:, :HEAD_OUT].reshape(b, L, HEAD_OUT)
    x_out = unpatchify(head_out, grid_sizes_py)

    if return_features:
        return (x_out, block_features, grid_sizes)
    elif return_temporal_features:
        return (x_out, block_features, grid_sizes, temporal_features)
    else:
        return x_out


# ----------------------------- deterministic init ----------------------------
def init_params(key):
    keys = iter(jax.random.split(key, 256))
    nk = lambda: next(keys)
    nrm = lambda k, shape, s=0.02: s * jax.random.normal(k, shape, jnp.float32)
    zeros = lambda *shape: jnp.zeros(shape, jnp.float32)

    def attn_params():
        return {
            'wq': nrm(nk(), (DIM, DIM)), 'bq': zeros(DIM),
            'wk': nrm(nk(), (DIM, DIM)), 'bk': zeros(DIM),
            'wv': nrm(nk(), (DIM, DIM)), 'bv': zeros(DIM),
            'wo': nrm(nk(), (DIM, DIM)), 'bo': zeros(DIM),
        }

    p = {
        'patch_w': nrm(nk(), (DIM, IN_DIM) + PATCH_SIZE),
        'patch_b': zeros(DIM),
        'time_w1': nrm(nk(), (FREQ_DIM, DIM)), 'time_b1': zeros(DIM),
        'time_w2': nrm(nk(), (DIM, DIM)), 'time_b2': zeros(DIM),
        'head_modulation': nrm(nk(), (2, DIM)),
        'head_w': nrm(nk(), (DIM, HEAD_OUT)),
        'head_b': zeros(HEAD_OUT),
        'blocks': [],
    }
    for _ in range(NUM_LAYERS):
        p['blocks'].append({
            'modulation': nrm(nk(), (6, DIM)),
            'self_attn': attn_params(),
            'cross_attn': attn_params(),
            'norm3_g': jnp.ones((DIM,), jnp.float32),
            'norm3_b': zeros(DIM),
            'ffn_w1': nrm(nk(), (DIM, FFN_DIM)), 'ffn_b1': zeros(FFN_DIM),
            'ffn_w2': nrm(nk(), (FFN_DIM, DIM)), 'ffn_b2': zeros(DIM),
        })
    return p


# ----------------------------- main -------------------------------------------
if __name__ == "__main__":
    key = jax.random.PRNGKey(0)
    kx, kc = jax.random.split(key, 2)

    # x: list of one NCDHW latent [B=1, C=4, F=2, H=8, W=8]; patch (1,2,2) -> 32 tokens
    x = [jax.random.normal(kx, (1, IN_DIM, 2, 8, 8), jnp.float32)]
    t = jnp.array([500.0], jnp.float32)
    context = jax.random.normal(kc, (1, 16, DIM), jnp.float32)
    seq_len = 2 * 4 * 4

    params = init_params(jax.random.PRNGKey(42))

    fwd = jax.jit(feature_extractor_forward,
                  static_argnames=("seq_len", "return_features",
                                   "return_temporal_features", "feature_layer"))
    out, block_feats, grid_sizes, temporal = fwd(
        params, x, t, context, seq_len=seq_len, return_temporal_features=True)

    jax.block_until_ready((out, grid_sizes, temporal))
    assert out[0].shape == (OUT_DIM, 2, 8, 8)
    assert temporal.shape == (2, 4, 4, DIM)
    assert bool(jnp.all(jnp.isfinite(out[0])))
    assert bool(jnp.all(jnp.isfinite(temporal)))
    print("KERNEL_OK")
</pallas_src>

<mosaic_0001>
module attributes {stable_mosaic.version = 11 : i64} {
  func.func @_wan_forward_kernel(%arg0: i32, %arg1: memref<32x128xbf16, #tpu.memory_space<vmem>>, %arg2: memref<128x128xbf16, #tpu.memory_space<vmem>>, %arg3: memref<1x128xf32, #tpu.memory_space<vmem>>, %arg4: memref<1x256xf32, #tpu.memory_space<vmem>>, %arg5: memref<256x128xbf16, #tpu.memory_space<vmem>>, %arg6: memref<1x128xf32, #tpu.memory_space<vmem>>, %arg7: memref<128x128xbf16, #tpu.memory_space<vmem>>, %arg8: memref<1x128xf32, #tpu.memory_space<vmem>>, %arg9: memref<16x128xbf16, #tpu.memory_space<vmem>>, %arg10: memref<32x128xf32, #tpu.memory_space<vmem>>, %arg11: memref<32x128xf32, #tpu.memory_space<vmem>>, %arg12: memref<128x128xf32, #tpu.memory_space<vmem>>, %arg13: memref<1x6x128xf32, #tpu.memory_space<vmem>>, %arg14: memref<1x4x128x128xbf16, #tpu.memory_space<vmem>>, %arg15: memref<1x4x128xf32, #tpu.memory_space<vmem>>, %arg16: memref<1x4x128x128xbf16, #tpu.memory_space<vmem>>, %arg17: memref<1x4x128xf32, #tpu.memory_space<vmem>>, %arg18: memref<1x2x128xf32, #tpu.memory_space<vmem>>, %arg19: memref<1x128x256xbf16, #tpu.memory_space<vmem>>, %arg20: memref<1x1x256xf32, #tpu.memory_space<vmem>>, %arg21: memref<1x256x128xbf16, #tpu.memory_space<vmem>>, %arg22: memref<1x1x128xf32, #tpu.memory_space<vmem>>, %arg23: memref<2x128xf32, #tpu.memory_space<vmem>>, %arg24: memref<128x128xbf16, #tpu.memory_space<vmem>>, %arg25: memref<1x128xf32, #tpu.memory_space<vmem>>, %arg26: memref<32x128xf32, #tpu.memory_space<vmem>>, %arg27: memref<32x128xf32, #tpu.memory_space<vmem>>, %arg28: memref<32x128xf32, #tpu.memory_space<vmem>>, %arg29: memref<32x128xf32, #tpu.memory_space<vmem>>, %arg30: memref<1x128xf32, #tpu.memory_space<vmem>>) attributes {dimension_semantics = [#tpu.dimension_semantics<arbitrary>], iteration_bounds = array<i64: 2>, scalar_prefetch = 0 : i64, scratch_operands = 2 : i64, tpu.core_type = #tpu.core_type<tc>, window_params = [{pipeline_mode = #tpu.pipeline_mode<synchronous>, transform_indices = @transform_0, window_bounds = array<i64: 32, 128>}, {pipeline_mode = #tpu.pipeline_mode<synchronous>, transform_indices = @transform_1, window_bounds = array<i64: 128, 128>}, {pipeline_mode = #tpu.pipeline_mode<synchronous>, transform_indices = @transform_2, window_bounds = array<i64: 1, 128>}, {pipeline_mode = #tpu.pipeline_mode<synchronous>, transform_indices = @transform_3, window_bounds = array<i64: 1, 256>}, {pipeline_mode = #tpu.pipeline_mode<synchronous>, transform_indices = @transform_4, window_bounds = array<i64: 256, 128>}, {pipeline_mode = #tpu.pipeline_mode<synchronous>, transform_indices = @transform_5, window_bounds = array<i64: 1, 128>}, {pipeline_mode = #tpu.pipeline_mode<synchronous>, transform_indices = @transform_6, window_bounds = array<i64: 128, 128>}, {pipeline_mode = #tpu.pipeline_mode<synchronous>, transform_indices = @transform_7, window_bounds = array<i64: 1, 128>}, {pipeline_mode = #tpu.pipeline_mode<synchronous>, transform_indices = @transform_8, window_bounds = array<i64: 16, 128>}, {pipeline_mode = #tpu.pipeline_mode<synchronous>, transform_indices = @transform_9, window_bounds = array<i64: 32, 128>}, {pipeline_mode = #tpu.pipeline_mode<synchronous>, transform_indices = @transform_10, window_bounds = array<i64: 32, 128>}, {pipeline_mode = #tpu.pipeline_mode<synchronous>, transform_indices = @transform_11, window_bounds = array<i64: 128, 128>}, {transform_indices = @transform_12, window_bounds = array<i64: 1, 6, 128>}, {transform_indices = @transform_13, window_bounds = array<i64: 1, 4, 128, 128>}, {transform_indices = @transform_14, window_bounds = array<i64: 1, 4, 128>}, {transform_indices = @transform_15, window_bounds = array<i64: 1, 4, 128, 128>}, {transform_indices = @transform_16, window_bounds = array<i64: 1, 4, 128>}, {transform_indices = @transform_17, window_bounds = array<i64: 1, 2, 128>}, {transform_indices = @transform_18, window_bounds = array<i64: 1, 128, 256>}, {transform_indices = @transform_19, window_bounds = array<i64: 1, 1, 256>}, {transform_indices = @transform_20, window_bounds = array<i64: 1, 256, 128>}, {transform_indices = @transform_21, window_bounds = array<i64: 1, 1, 128>}, {pipeline_mode = #tpu.pipeline_mode<synchronous>, transform_indices = @transform_22, window_bounds = array<i64: 2, 128>}, {pipeline_mode = #tpu.pipeline_mode<synchronous>, transform_indices = @transform_23, window_bounds = array<i64: 128, 128>}, {pipeline_mode = #tpu.pipeline_mode<synchronous>, transform_indices = @transform_24, window_bounds = array<i64: 1, 128>}, {pipeline_mode = #tpu.pipeline_mode<synchronous>, transform_indices = @transform_25, window_bounds = array<i64: 32, 128>}, {pipeline_mode = #tpu.pipeline_mode<synchronous>, transform_indices = @transform_26, window_bounds = array<i64: 32, 128>}, {pipeline_mode = #tpu.pipeline_mode<synchronous>, transform_indices = @transform_27, window_bounds = array<i64: 32, 128>}]} {
    %c0_i32 = arith.constant 0 : i32
    %0 = arith.cmpi eq, %arg0, %c0_i32 : i32
    %1 = arith.extui %0 : i1 to i32
    %c0_i32_0 = arith.constant 0 : i32
    %2 = arith.cmpi ne, %1, %c0_i32_0 : i32
    scf.if %2 {
      %c0_124 = arith.constant 0 : index
      %c0_125 = arith.constant 0 : index
      %288 = vector.load %arg1[%c0_124, %c0_125] : memref<32x128xbf16, #tpu.memory_space<vmem>>, vector<32x128xbf16>
      %c0_126 = arith.constant 0 : index
      %c0_127 = arith.constant 0 : index
      %289 = vector.load %arg2[%c0_126, %c0_127] : memref<128x128xbf16, #tpu.memory_space<vmem>>, vector<128x128xbf16>
      %cst_128 = arith.constant dense<0.000000e+00> : vector<32x128xf32>
      %290 = tpu.matmul %288, %289, %cst_128 {dimension_numbers = #tpu.dot_dimension_numbers<[1], [0], [0], [1], [0, 0, 1, 1], [], []>} : vector<32x128xbf16>, vector<128x128xbf16>, vector<32x128xf32> -> vector<32x128xf32>
      %c0_129 = arith.constant 0 : index
      %c0_130 = arith.constant 0 : index
      %291 = vector.load %arg3[%c0_129, %c0_130] : memref<1x128xf32, #tpu.memory_space<vmem>>, vector<1x128xf32>
      %292 = vector.broadcast %291 : vector<1x128xf32> to vector<32x128xf32>
      %293 = arith.addf %290, %292 : vector<32x128xf32>
      %c0_131 = arith.constant 0 : index
      %c0_132 = arith.constant 0 : index
      %294 = vector.load %arg29[%c0_131, %c0_132] : memref<32x128xf32, #tpu.memory_space<vmem>>, vector<32x128xf32>
      tpu.vector_store %arg29[%c0_131, %c0_132], %293 {strides = array<i32>} : memref<32x128xf32, #tpu.memory_space<vmem>>, vector<32x128xf32>,
      %c0_133 = arith.constant 0 : index
      %c0_134 = arith.constant 0 : index
      %295 = vector.load %arg4[%c0_133, %c0_134] : memref<1x256xf32, #tpu.memory_space<vmem>>, vector<1x256xf32>
      %296 = arith.truncf %295 : vector<1x256xf32> to vector<1x256xbf16>
      %c0_135 = arith.constant 0 : index
      %c0_136 = arith.constant 0 : index
      %297 = vector.load %arg5[%c0_135, %c0_136] : memref<256x128xbf16, #tpu.memory_space<vmem>>, vector<256x128xbf16>
      %cst_137 = arith.constant dense<0.000000e+00> : vector<1x128xf32>
      %298 = tpu.matmul %296, %297, %cst_137 {dimension_numbers = #tpu.dot_dimension_numbers<[1], [0], [0], [1], [0, 0, 1, 1], [], []>} : vector<1x256xbf16>, vector<256x128xbf16>, vector<1x128xf32> -> vector<1x128xf32>
      %c0_138 = arith.constant 0 : index
      %c0_139 = arith.constant 0 : index
      %299 = vector.load %arg6[%c0_138, %c0_139] : memref<1x128xf32, #tpu.memory_space<vmem>>, vector<1x128xf32>
      %300 = arith.addf %298, %299 : vector<1x128xf32>
      %301 = arith.negf %300 : vector<1x128xf32>
      %302 = math.exp %301 : vector<1x128xf32>
      %cst_140 = arith.constant 1.000000e+00 : f32
      %303 = vector.broadcast %cst_140 : f32 to vector<1x128xf32>
      %304 = arith.addf %303, %302 : vector<1x128xf32>
      %305 = arith.divf %303, %304 : vector<1x128xf32>
      %306 = arith.mulf %300, %305 : vector<1x128xf32>
      %307 = arith.truncf %306 : vector<1x128xf32> to vector<1x128xbf16>
      %c0_141 = arith.constant 0 : index
      %c0_142 = arith.constant 0 : index
      %308 = vector.load %arg7[%c0_141, %c0_142] : memref<128x128xbf16, #tpu.memory_space<vmem>>, vector<128x128xbf16>
      %cst_143 = arith.constant dense<0.000000e+00> : vector<1x128xf32>
      %309 = tpu.matmul %307, %308, %cst_143 {dimension_numbers = #tpu.dot_dimension_numbers<[1], [0], [0], [1], [0, 0, 1, 1], [], []>} : vector<1x128xbf16>, vector<128x128xbf16>, vector<1x128xf32> -> vector<1x128xf32>
      %c0_144 = arith.constant 0 : index
      %c0_145 = arith.constant 0 : index
      %310 = vector.load %arg8[%c0_144, %c0_145] : memref<1x128xf32, #tpu.memory_space<vmem>>, vector<1x128xf32>
      %311 = arith.addf %309, %310 : vector<1x128xf32>
      %c0_146 = arith.constant 0 : index
      %c0_147 = arith.constant 0 : index
      %312 = vector.load %arg30[%c0_146, %c0_147] : memref<1x128xf32, #tpu.memory_space<vmem>>, vector<1x128xf32>
      tpu.vector_store %arg30[%c0_146, %c0_147], %311 {strides = array<i32>} : memref<1x128xf32, #tpu.memory_space<vmem>>, vector<1x128xf32>,
    } else {
    }
    %c0 = arith.constant 0 : index
    %c0_1 = arith.constant 0 : index
    %3 = vector.load %arg29[%c0, %c0_1] : memref<32x128xf32, #tpu.memory_space<vmem>>, vector<32x128xf32>
    %c0_2 = arith.constant 0 : index
    %c0_3 = arith.constant 0 : index
    %4 = vector.load %arg30[%c0_2, %c0_3] : memref<1x128xf32, #tpu.memory_space<vmem>>, vector<1x128xf32>
    %c0_4 = arith.constant 0 : index
    %c0_5 = arith.constant 0 : index
    %c0_6 = arith.constant 0 : index
    %5 = vector.load %arg13[%c0_4, %c0_5, %c0_6] : memref<1x6x128xf32, #tpu.memory_space<vmem>>, vector<1x6x128xf32>
    %6 = vector.shape_cast %5 : vector<1x6x128xf32> to vector<6x128xf32>
    %7 = vector.broadcast %4 : vector<1x128xf32> to vector<6x128xf32>
    %8 = arith.addf %6, %7 : vector<6x128xf32>
    %c0_7 = arith.constant 0 : index
    %c0_8 = arith.constant 0 : index
    %9 = vector.load %arg10[%c0_7, %c0_8] : memref<32x128xf32, #tpu.memory_space<vmem>>, vector<32x128xf32>
    %c0_9 = arith.constant 0 : index
    %c0_10 = arith.constant 0 : index
    %10 = vector.load %arg11[%c0_9, %c0_10] : memref<32x128xf32, #tpu.memory_space<vmem>>, vector<32x128xf32>
    %c0_11 = arith.constant 0 : index
    %c0_12 = arith.constant 0 : index
    %11 = vector.load %arg12[%c0_11, %c0_12] : memref<128x128xf32, #tpu.memory_space<vmem>>, vector<128x128xf32>
    %c0_13 = arith.constant 0 : index
    %c0_14 = arith.constant 0 : index
    %c0_15 = arith.constant 0 : index
    %12 = vector.load %arg15[%c0_13, %c0_14, %c0_15] : memref<1x4x128xf32, #tpu.memory_space<vmem>>, vector<1x4x128xf32>
    %13 = vector.shape_cast %12 : vector<1x4x128xf32> to vector<4x128xf32>
    %c0_16 = arith.constant 0 : index
    %c0_17 = arith.constant 0 : index
    %c0_18 = arith.constant 0 : index
    %14 = vector.load %arg17[%c0_16, %c0_17, %c0_18] : memref<1x4x128xf32, #tpu.memory_space<vmem>>, vector<1x4x128xf32>
    %15 = vector.shape_cast %14 : vector<1x4x128xf32> to vector<4x128xf32>
    %c0_19 = arith.constant 0 : index
    %c0_20 = arith.constant 0 : index
    %c0_21 = arith.constant 0 : index
    %16 = vector.load %arg18[%c0_19, %c0_20, %c0_21] : memref<1x2x128xf32, #tpu.memory_space<vmem>>, vector<1x2x128xf32>
    %17 = vector.shape_cast %16 : vector<1x2x128xf32> to vector<2x128xf32>
    %cst = arith.constant dense<0.000000e+00> : vector<32xf32>
    %18 = vector.multi_reduction <add>, %3, %cst [1] : vector<32x128xf32> to vector<32xf32>
    %19 = vector.shape_cast %18 : vector<32xf32> to vector<32x1xf32>
    %cst_22 = arith.constant 1.280000e+02 : f32
    %20 = vector.broadcast %cst_22 : f32 to vector<32x1xf32>
    %21 = arith.divf %19, %20 : vector<32x1xf32>
    %22 = vector.broadcast %21 : vector<32x1xf32> to vector<32x128xf32>
    %23 = arith.subf %3, %22 : vector<32x128xf32>
    %24 = arith.mulf %23, %23 : vector<32x128xf32>
    %cst_23 = arith.constant dense<0.000000e+00> : vector<32xf32>
    %25 = vector.multi_reduction <add>, %24, %cst_23 [1] : vector<32x128xf32> to vector<32xf32>
    %26 = vector.shape_cast %25 : vector<32xf32> to vector<32x1xf32>
    %cst_24 = arith.constant 1.280000e+02 : f32
    %27 = vector.broadcast %cst_24 : f32 to vector<32x1xf32>
    %28 = arith.divf %26, %27 : vector<32x1xf32>
    %cst_25 = arith.constant 9.99999997E-7 : f32
    %29 = vector.broadcast %cst_25 : f32 to vector<32x1xf32>
    %30 = arith.addf %28, %29 : vector<32x1xf32>
    %31 = math.rsqrt %30 : vector<32x1xf32>
    %32 = vector.broadcast %31 : vector<32x1xf32> to vector<32x128xf32>
    %33 = arith.mulf %23, %32 : vector<32x128xf32>
    %34 = vector.extract_strided_slice %8 {offsets = [1, 0], sizes = [1, 128], strides = [1, 1]} : vector<6x128xf32> to vector<1x128xf32>
    %cst_26 = arith.constant 1.000000e+00 : f32
    %35 = vector.broadcast %cst_26 : f32 to vector<1x128xf32>
    %36 = arith.addf %35, %34 : vector<1x128xf32>
    %37 = vector.broadcast %36 : vector<1x128xf32> to vector<32x128xf32>
    %38 = arith.mulf %33, %37 : vector<32x128xf32>
    %39 = vector.extract_strided_slice %8 {offsets = [0, 0], sizes = [1, 128], strides = [1, 1]} : vector<6x128xf32> to vector<1x128xf32>
    %40 = vector.broadcast %39 : vector<1x128xf32> to vector<32x128xf32>
    %41 = arith.addf %38, %40 : vector<32x128xf32>
    %42 = arith.truncf %41 : vector<32x128xf32> to vector<32x128xbf16>
    %c0_27 = arith.constant 0 : index
    %c0_28 = arith.constant 0 : index
    %c0_29 = arith.constant 0 : index
    %c0_30 = arith.constant 0 : index
    %43 = vector.load %arg14[%c0_27, %c0_28, %c0_29, %c0_30] : memref<1x4x128x128xbf16, #tpu.memory_space<vmem>>, vector<1x1x128x128xbf16>
    %44 = vector.shape_cast %43 : vector<1x1x128x128xbf16> to vector<128x128xbf16>
    %cst_31 = arith.constant dense<0.000000e+00> : vector<32x128xf32>
    %45 = tpu.matmul %42, %44, %cst_31 {dimension_numbers = #tpu.dot_dimension_numbers<[1], [0], [0], [1], [0, 0, 1, 1], [], []>} : vector<32x128xbf16>, vector<128x128xbf16>, vector<32x128xf32> -> vector<32x128xf32>
    %46 = vector.extract_strided_slice %13 {offsets = [0, 0], sizes = [1, 128], strides = [1, 1]} : vector<4x128xf32> to vector<1x128xf32>
    %47 = vector.broadcast %46 : vector<1x128xf32> to vector<32x128xf32>
    %48 = arith.addf %45, %47 : vector<32x128xf32>
    %c0_32 = arith.constant 0 : index
    %c1 = arith.constant 1 : index
    %c0_33 = arith.constant 0 : index
    %c0_34 = arith.constant 0 : index
    %49 = vector.load %arg14[%c0_32, %c1, %c0_33, %c0_34] : memref<1x4x128x128xbf16, #tpu.memory_space<vmem>>, vector<1x1x128x128xbf16>
    %50 = vector.shape_cast %49 : vector<1x1x128x128xbf16> to vector<128x128xbf16>
    %cst_35 = arith.constant dense<0.000000e+00> : vector<32x128xf32>
    %51 = tpu.matmul %42, %50, %cst_35 {dimension_numbers = #tpu.dot_dimension_numbers<[1], [0], [0], [1], [0, 0, 1, 1], [], []>} : vector<32x128xbf16>, vector<128x128xbf16>, vector<32x128xf32> -> vector<32x128xf32>
    %52 = vector.extract_strided_slice %13 {offsets = [1, 0], sizes = [1, 128], strides = [1, 1]} : vector<4x128xf32> to vector<1x128xf32>
    %53 = vector.broadcast %52 : vector<1x128xf32> to vector<32x128xf32>
    %54 = arith.addf %51, %53 : vector<32x128xf32>
    %c0_36 = arith.constant 0 : index
    %c2 = arith.constant 2 : index
    %c0_37 = arith.constant 0 : index
    %c0_38 = arith.constant 0 : index
    %55 = vector.load %arg14[%c0_36, %c2, %c0_37, %c0_38] : memref<1x4x128x128xbf16, #tpu.memory_space<vmem>>, vector<1x1x128x128xbf16>
    %56 = vector.shape_cast %55 : vector<1x1x128x128xbf16> to vector<128x128xbf16>
    %cst_39 = arith.constant dense<0.000000e+00> : vector<32x128xf32>
    %57 = tpu.matmul %42, %56, %cst_39 {dimension_numbers = #tpu.dot_dimension_numbers<[1], [0], [0], [1], [0, 0, 1, 1], [], []>} : vector<32x128xbf16>, vector<128x128xbf16>, vector<32x128xf32> -> vector<32x128xf32>
    %58 = vector.extract_strided_slice %13 {offsets = [2, 0], sizes = [1, 128], strides = [1, 1]} : vector<4x128xf32> to vector<1x128xf32>
    %59 = vector.broadcast %58 : vector<1x128xf32> to vector<32x128xf32>
    %60 = arith.addf %57, %59 : vector<32x128xf32>
    %61 = arith.mulf %48, %9 : vector<32x128xf32>
    %cst_40 = arith.constant dense<0.000000e+00> : vector<32x128xf32>
    %62 = tpu.matmul %48, %11, %cst_40 {dimension_numbers = #tpu.dot_dimension_numbers<[1], [0], [0], [1], [0, 0, 1, 1], [], []>} : vector<32x128xf32>, vector<128x128xf32>, vector<32x128xf32> -> vector<32x128xf32>
    %63 = arith.mulf %62, %10 : vector<32x128xf32>
    %64 = arith.addf %61, %63 : vector<32x128xf32>
    %65 = arith.mulf %54, %9 : vector<32x128xf32>
    %cst_41 = arith.constant dense<0.000000e+00> : vector<32x128xf32>
    %66 = tpu.matmul %54, %11, %cst_41 {dimension_numbers = #tpu.dot_dimension_numbers<[1], [0], [0], [1], [0, 0, 1, 1], [], []>} : vector<32x128xf32>, vector<128x128xf32>, vector<32x128xf32> -> vector<32x128xf32>
    %67 = arith.mulf %66, %10 : vector<32x128xf32>
    %68 = arith.addf %65, %67 : vector<32x128xf32>
    %c0_42 = arith.constant 0 : index
    %c3 = arith.constant 3 : index
    %c0_43 = arith.constant 0 : index
    %c0_44 = arith.constant 0 : index
    %69 = vector.load %arg14[%c0_42, %c3, %c0_43, %c0_44] : memref<1x4x128x128xbf16, #tpu.memory_space<vmem>>, vector<1x1x128x128xbf16>
    %70 = vector.shape_cast %69 : vector<1x1x128x128xbf16> to vector<128x128xbf16>
    %71 = vector.extract_strided_slice %13 {offsets = [3, 0], sizes = [1, 128], strides = [1, 1]} : vector<4x128xf32> to vector<1x128xf32>
    %72 = vector.extract_strided_slice %64 {offsets = [0, 0], sizes = [32, 64], strides = [1, 1]} : vector<32x128xf32> to vector<32x64xf32>
    %73 = arith.truncf %72 : vector<32x64xf32> to vector<32x64xbf16>
    %74 = vector.extract_strided_slice %68 {offsets = [0, 0], sizes = [32, 64], strides = [1, 1]} : vector<32x128xf32> to vector<32x64xf32>
    %75 = arith.truncf %74 : vector<32x64xf32> to vector<32x64xbf16>
    %76 = vector.extract_strided_slice %60 {offsets = [0, 0], sizes = [32, 64], strides = [1, 1]} : vector<32x128xf32> to vector<32x64xf32>
    %77 = arith.truncf %76 : vector<32x64xf32> to vector<32x64xbf16>
    %cst_45 = arith.constant dense<0.000000e+00> : vector<32x32xf32>
    %78 = tpu.matmul %73, %75, %cst_45 {dimension_numbers = #tpu.dot_dimension_numbers<[1], [1], [0], [0], [0, 0, 1, 0], [], []>} : vector<32x64xbf16>, vector<32x64xbf16>, vector<32x32xf32> -> vector<32x32xf32>
    %cst_46 = arith.constant 1.250000e-01 : f32
    %79 = vector.broadcast %cst_46 : f32 to vector<32x32xf32>
    %80 = arith.mulf %78, %79 : vector<32x32xf32>
    %cst_47 = arith.constant dense<0xFF800000> : vector<32xf32>
    %81 = vector.multi_reduction <maximumf>, %80, %cst_47 [1] : vector<32x32xf32> to vector<32xf32>
    %82 = vector.shape_cast %81 : vector<32xf32> to vector<32x1xf32>
    %83 = vector.broadcast %82 : vector<32x1xf32> to vector<32x32xf32>
    %84 = arith.subf %80, %83 : vector<32x32xf32>
    %85 = math.exp %84 : vector<32x32xf32>
    %cst_48 = arith.constant dense<0.000000e+00> : vector<32xf32>
    %86 = vector.multi_reduction <add>, %85, %cst_48 [1] : vector<32x32xf32> to vector<32xf32>
    %87 = vector.shape_cast %86 : vector<32xf32> to vector<32x1xf32>
    %88 = arith.truncf %85 : vector<32x32xf32> to vector<32x32xbf16>
    %cst_49 = arith.constant dense<0.000000e+00> : vector<32x64xf32>
    %89 = tpu.matmul %88, %77, %cst_49 {dimension_numbers = #tpu.dot_dimension_numbers<[1], [0], [0], [1], [0, 0, 1, 1], [], []>} : vector<32x32xbf16>, vector<32x64xbf16>, vector<32x64xf32> -> vector<32x64xf32>
    %90 = tpu.reciprocal %87 {approx = true} : vector<32x1xf32> -> vector<32x1xf32>
    %91 = vector.broadcast %90 : vector<32x1xf32> to vector<32x64xf32>
    %92 = arith.mulf %89, %91 : vector<32x64xf32>
    %93 = arith.truncf %92 : vector<32x64xf32> to vector<32x64xbf16>
    %94 = vector.extract_strided_slice %70 {offsets = [0, 0], sizes = [64, 128], strides = [1, 1]} : vector<128x128xbf16> to vector<64x128xbf16>
    %cst_50 = arith.constant dense<0.000000e+00> : vector<32x128xf32>
    %95 = tpu.matmul %93, %94, %cst_50 {dimension_numbers = #tpu.dot_dimension_numbers<[1], [0], [0], [1], [0, 0, 1, 1], [], []>} : vector<32x64xbf16>, vector<64x128xbf16>, vector<32x128xf32> -> vector<32x128xf32>
    %96 = vector.extract_strided_slice %64 {offsets = [0, 64], sizes = [32, 64], strides = [1, 1]} : vector<32x128xf32> to vector<32x64xf32>
    %97 = arith.truncf %96 : vector<32x64xf32> to vector<32x64xbf16>
    %98 = vector.extract_strided_slice %68 {offsets = [0, 64], sizes = [32, 64], strides = [1, 1]} : vector<32x128xf32> to vector<32x64xf32>
    %99 = arith.truncf %98 : vector<32x64xf32> to vector<32x64xbf16>
    %100 = vector.extract_strided_slice %60 {offsets = [0, 64], sizes = [32, 64], strides = [1, 1]} : vector<32x128xf32> to vector<32x64xf32>
    %101 = arith.truncf %100 : vector<32x64xf32> to vector<32x64xbf16>
    %cst_51 = arith.constant dense<0.000000e+00> : vector<32x32xf32>
    %102 = tpu.matmul %97, %99, %cst_51 {dimension_numbers = #tpu.dot_dimension_numbers<[1], [1], [0], [0], [0, 0, 1, 0], [], []>} : vector<32x64xbf16>, vector<32x64xbf16>, vector<32x32xf32> -> vector<32x32xf32>
    %cst_52 = arith.constant 1.250000e-01 : f32
    %103 = vector.broadcast %cst_52 : f32 to vector<32x32xf32>
    %104 = arith.mulf %102, %103 : vector<32x32xf32>
    %cst_53 = arith.constant dense<0xFF800000> : vector<32xf32>
    %105 = vector.multi_reduction <maximumf>, %104, %cst_53 [1] : vector<32x32xf32> to vector<32xf32>
    %106 = vector.shape_cast %105 : vector<32xf32> to vector<32x1xf32>
    %107 = vector.broadcast %106 : vector<32x1xf32> to vector<32x32xf32>
    %108 = arith.subf %104, %107 : vector<32x32xf32>
    %109 = math.exp %108 : vector<32x32xf32>
    %cst_54 = arith.constant dense<0.000000e+00> : vector<32xf32>
    %110 = vector.multi_reduction <add>, %109, %cst_54 [1] : vector<32x32xf32> to vector<32xf32>
    %111 = vector.shape_cast %110 : vector<32xf32> to vector<32x1xf32>
    %112 = arith.truncf %109 : vector<32x32xf32> to vector<32x32xbf16>
    %cst_55 = arith.constant dense<0.000000e+00> : vector<32x64xf32>
    %113 = tpu.matmul %112, %101, %cst_55 {dimension_numbers = #tpu.dot_dimension_numbers<[1], [0], [0], [1], [0, 0, 1, 1], [], []>} : vector<32x32xbf16>, vector<32x64xbf16>, vector<32x64xf32> -> vector<32x64xf32>
    %114 = tpu.reciprocal %111 {approx = true} : vector<32x1xf32> -> vector<32x1xf32>
    %115 = vector.broadcast %114 : vector<32x1xf32> to vector<32x64xf32>
    %116 = arith.mulf %113, %115 : vector<32x64xf32>
    %117 = arith.truncf %116 : vector<32x64xf32> to vector<32x64xbf16>
    %118 = vector.extract_strided_slice %70 {offsets = [64, 0], sizes = [64, 128], strides = [1, 1]} : vector<128x128xbf16> to vector<64x128xbf16>
    %cst_56 = arith.constant dense<0.000000e+00> : vector<32x128xf32>
    %119 = tpu.matmul %117, %118, %cst_56 {dimension_numbers = #tpu.dot_dimension_numbers<[1], [0], [0], [1], [0, 0, 1, 1], [], []>} : vector<32x64xbf16>, vector<64x128xbf16>, vector<32x128xf32> -> vector<32x128xf32>
    %120 = arith.addf %95, %119 : vector<32x128xf32>
    %121 = vector.broadcast %71 : vector<1x128xf32> to vector<32x128xf32>
    %122 = arith.addf %120, %121 : vector<32x128xf32>
    %123 = vector.extract_strided_slice %8 {offsets = [2, 0], sizes = [1, 128], strides = [1, 1]} : vector<6x128xf32> to vector<1x128xf32>
    %124 = vector.broadcast %123 : vector<1x128xf32> to vector<32x128xf32>
    %125 = arith.mulf %122, %124 : vector<32x128xf32>
    %126 = arith.addf %3, %125 : vector<32x128xf32>
    %cst_57 = arith.constant dense<0.000000e+00> : vector<32xf32>
    %127 = vector.multi_reduction <add>, %126, %cst_57 [1] : vector<32x128xf32> to vector<32xf32>
    %128 = vector.shape_cast %127 : vector<32xf32> to vector<32x1xf32>
    %cst_58 = arith.constant 1.280000e+02 : f32
    %129 = vector.broadcast %cst_58 : f32 to vector<32x1xf32>
    %130 = arith.divf %128, %129 : vector<32x1xf32>
    %131 = vector.broadcast %130 : vector<32x1xf32> to vector<32x128xf32>
    %132 = arith.subf %126, %131 : vector<32x128xf32>
    %133 = arith.mulf %132, %132 : vector<32x128xf32>
    %cst_59 = arith.constant dense<0.000000e+00> : vector<32xf32>
    %134 = vector.multi_reduction <add>, %133, %cst_59 [1] : vector<32x128xf32> to vector<32xf32>
    %135 = vector.shape_cast %134 : vector<32xf32> to vector<32x1xf32>
    %cst_60 = arith.constant 1.280000e+02 : f32
    %136 = vector.broadcast %cst_60 : f32 to vector<32x1xf32>
    %137 = arith.divf %135, %136 : vector<32x1xf32>
    %cst_61 = arith.constant 9.99999997E-7 : f32
    %138 = vector.broadcast %cst_61 : f32 to vector<32x1xf32>
    %139 = arith.addf %137, %138 : vector<32x1xf32>
    %140 = math.rsqrt %139 : vector<32x1xf32>
    %141 = vector.broadcast %140 : vector<32x1xf32> to vector<32x128xf32>
    %142 = arith.mulf %132, %141 : vector<32x128xf32>
    %143 = vector.extract_strided_slice %17 {offsets = [0, 0], sizes = [1, 128], strides = [1, 1]} : vector<2x128xf32> to vector<1x128xf32>
    %144 = vector.broadcast %143 : vector<1x128xf32> to vector<32x128xf32>
    %145 = arith.mulf %142, %144 : vector<32x128xf32>
    %146 = vector.extract_strided_slice %17 {offsets = [1, 0], sizes = [1, 128], strides = [1, 1]} : vector<2x128xf32> to vector<1x128xf32>
    %147 = vector.broadcast %146 : vector<1x128xf32> to vector<32x128xf32>
    %148 = arith.addf %145, %147 : vector<32x128xf32>
    %149 = arith.truncf %148 : vector<32x128xf32> to vector<32x128xbf16>
    %c0_62 = arith.constant 0 : index
    %c0_63 = arith.constant 0 : index
    %150 = vector.load %arg9[%c0_62, %c0_63] : memref<16x128xbf16, #tpu.memory_space<vmem>>, vector<16x128xbf16>
    %c0_64 = arith.constant 0 : index
    %c0_65 = arith.constant 0 : index
    %c0_66 = arith.constant 0 : index
    %c0_67 = arith.constant 0 : index
    %151 = vector.load %arg16[%c0_64, %c0_65, %c0_66, %c0_67] : memref<1x4x128x128xbf16, #tpu.memory_space<vmem>>, vector<1x1x128x128xbf16>
    %152 = vector.shape_cast %151 : vector<1x1x128x128xbf16> to vector<128x128xbf16>
    %cst_68 = arith.constant dense<0.000000e+00> : vector<32x128xf32>
    %153 = tpu.matmul %149, %152, %cst_68 {dimension_numbers = #tpu.dot_dimension_numbers<[1], [0], [0], [1], [0, 0, 1, 1], [], []>} : vector<32x128xbf16>, vector<128x128xbf16>, vector<32x128xf32> -> vector<32x128xf32>
    %154 = vector.extract_strided_slice %15 {offsets = [0, 0], sizes = [1, 128], strides = [1, 1]} : vector<4x128xf32> to vector<1x128xf32>
    %155 = vector.broadcast %154 : vector<1x128xf32> to vector<32x128xf32>
    %156 = arith.addf %153, %155 : vector<32x128xf32>
    %c0_69 = arith.constant 0 : index
    %c1_70 = arith.constant 1 : index
    %c0_71 = arith.constant 0 : index
    %c0_72 = arith.constant 0 : index
    %157 = vector.load %arg16[%c0_69, %c1_70, %c0_71, %c0_72] : memref<1x4x128x128xbf16, #tpu.memory_space<vmem>>, vector<1x1x128x128xbf16>
    %158 = vector.shape_cast %157 : vector<1x1x128x128xbf16> to vector<128x128xbf16>
    %cst_73 = arith.constant dense<0.000000e+00> : vector<16x128xf32>
    %159 = tpu.matmul %150, %158, %cst_73 {dimension_numbers = #tpu.dot_dimension_numbers<[1], [0], [0], [1], [0, 0, 1, 1], [], []>} : vector<16x128xbf16>, vector<128x128xbf16>, vector<16x128xf32> -> vector<16x128xf32>
    %160 = vector.extract_strided_slice %15 {offsets = [1, 0], sizes = [1, 128], strides = [1, 1]} : vector<4x128xf32> to vector<1x128xf32>
    %161 = vector.broadcast %160 : vector<1x128xf32> to vector<16x128xf32>
    %162 = arith.addf %159, %161 : vector<16x128xf32>
    %c0_74 = arith.constant 0 : index
    %c2_75 = arith.constant 2 : index
    %c0_76 = arith.constant 0 : index
    %c0_77 = arith.constant 0 : index
    %163 = vector.load %arg16[%c0_74, %c2_75, %c0_76, %c0_77] : memref<1x4x128x128xbf16, #tpu.memory_space<vmem>>, vector<1x1x128x128xbf16>
    %164 = vector.shape_cast %163 : vector<1x1x128x128xbf16> to vector<128x128xbf16>
    %cst_78 = arith.constant dense<0.000000e+00> : vector<16x128xf32>
    %165 = tpu.matmul %150, %164, %cst_78 {dimension_numbers = #tpu.dot_dimension_numbers<[1], [0], [0], [1], [0, 0, 1, 1], [], []>} : vector<16x128xbf16>, vector<128x128xbf16>, vector<16x128xf32> -> vector<16x128xf32>
    %166 = vector.extract_strided_slice %15 {offsets = [2, 0], sizes = [1, 128], strides = [1, 1]} : vector<4x128xf32> to vector<1x128xf32>
    %167 = vector.broadcast %166 : vector<1x128xf32> to vector<16x128xf32>
    %168 = arith.addf %165, %167 : vector<16x128xf32>
    %c0_79 = arith.constant 0 : index
    %c3_80 = arith.constant 3 : index
    %c0_81 = arith.constant 0 : index
    %c0_82 = arith.constant 0 : index
    %169 = vector.load %arg16[%c0_79, %c3_80, %c0_81, %c0_82] : memref<1x4x128x128xbf16, #tpu.memory_space<vmem>>, vector<1x1x128x128xbf16>
    %170 = vector.shape_cast %169 : vector<1x1x128x128xbf16> to vector<128x128xbf16>
    %171 = vector.extract_strided_slice %15 {offsets = [3, 0], sizes = [1, 128], strides = [1, 1]} : vector<4x128xf32> to vector<1x128xf32>
    %172 = vector.extract_strided_slice %156 {offsets = [0, 0], sizes = [32, 64], strides = [1, 1]} : vector<32x128xf32> to vector<32x64xf32>
    %173 = arith.truncf %172 : vector<32x64xf32> to vector<32x64xbf16>
    %174 = vector.extract_strided_slice %162 {offsets = [0, 0], sizes = [16, 64], strides = [1, 1]} : vector<16x128xf32> to vector<16x64xf32>
    %175 = arith.truncf %174 : vector<16x64xf32> to vector<16x64xbf16>
    %176 = vector.extract_strided_slice %168 {offsets = [0, 0], sizes = [16, 64], strides = [1, 1]} : vector<16x128xf32> to vector<16x64xf32>
    %177 = arith.truncf %176 : vector<16x64xf32> to vector<16x64xbf16>
    %cst_83 = arith.constant dense<0.000000e+00> : vector<32x16xf32>
    %178 = tpu.matmul %173, %175, %cst_83 {dimension_numbers = #tpu.dot_dimension_numbers<[1], [1], [0], [0], [0, 0, 1, 0], [], []>} : vector<32x64xbf16>, vector<16x64xbf16>, vector<32x16xf32> -> vector<32x16xf32>
    %cst_84 = arith.constant 1.250000e-01 : f32
    %179 = vector.broadcast %cst_84 : f32 to vector<32x16xf32>
    %180 = arith.mulf %178, %179 : vector<32x16xf32>
    %cst_85 = arith.constant dense<0xFF800000> : vector<32xf32>
    %181 = vector.multi_reduction <maximumf>, %180, %cst_85 [1] : vector<32x16xf32> to vector<32xf32>
    %182 = vector.shape_cast %181 : vector<32xf32> to vector<32x1xf32>
    %183 = vector.broadcast %182 : vector<32x1xf32> to vector<32x16xf32>
    %184 = arith.subf %180, %183 : vector<32x16xf32>
    %185 = math.exp %184 : vector<32x16xf32>
    %cst_86 = arith.constant dense<0.000000e+00> : vector<32xf32>
    %186 = vector.multi_reduction <add>, %185, %cst_86 [1] : vector<32x16xf32> to vector<32xf32>
    %187 = vector.shape_cast %186 : vector<32xf32> to vector<32x1xf32>
    %188 = arith.truncf %185 : vector<32x16xf32> to vector<32x16xbf16>
    %cst_87 = arith.constant dense<0.000000e+00> : vector<32x64xf32>
    %189 = tpu.matmul %188, %177, %cst_87 {dimension_numbers = #tpu.dot_dimension_numbers<[1], [0], [0], [1], [0, 0, 1, 1], [], []>} : vector<32x16xbf16>, vector<16x64xbf16>, vector<32x64xf32> -> vector<32x64xf32>
    %190 = tpu.reciprocal %187 {approx = true} : vector<32x1xf32> -> vector<32x1xf32>
    %191 = vector.broadcast %190 : vector<32x1xf32> to vector<32x64xf32>
    %192 = arith.mulf %189, %191 : vector<32x64xf32>
    %193 = arith.truncf %192 : vector<32x64xf32> to vector<32x64xbf16>
    %194 = vector.extract_strided_slice %170 {offsets = [0, 0], sizes = [64, 128], strides = [1, 1]} : vector<128x128xbf16> to vector<64x128xbf16>
    %cst_88 = arith.constant dense<0.000000e+00> : vector<32x128xf32>
    %195 = tpu.matmul %193, %194, %cst_88 {dimension_numbers = #tpu.dot_dimension_numbers<[1], [0], [0], [1], [0, 0, 1, 1], [], []>} : vector<32x64xbf16>, vector<64x128xbf16>, vector<32x128xf32> -> vector<32x128xf32>
    %196 = vector.extract_strided_slice %156 {offsets = [0, 64], sizes = [32, 64], strides = [1, 1]} : vector<32x128xf32> to vector<32x64xf32>
    %197 = arith.truncf %196 : vector<32x64xf32> to vector<32x64xbf16>
    %198 = vector.extract_strided_slice %162 {offsets = [0, 64], sizes = [16, 64], strides = [1, 1]} : vector<16x128xf32> to vector<16x64xf32>
    %199 = arith.truncf %198 : vector<16x64xf32> to vector<16x64xbf16>
    %200 = vector.extract_strided_slice %168 {offsets = [0, 64], sizes = [16, 64], strides = [1, 1]} : vector<16x128xf32> to vector<16x64xf32>
    %201 = arith.truncf %200 : vector<16x64xf32> to vector<16x64xbf16>
    %cst_89 = arith.constant dense<0.000000e+00> : vector<32x16xf32>
    %202 = tpu.matmul %197, %199, %cst_89 {dimension_numbers = #tpu.dot_dimension_numbers<[1], [1], [0], [0], [0, 0, 1, 0], [], []>} : vector<32x64xbf16>, vector<16x64xbf16>, vector<32x16xf32> -> vector<32x16xf32>
    %cst_90 = arith.constant 1.250000e-01 : f32
    %203 = vector.broadcast %cst_90 : f32 to vector<32x16xf32>
    %204 = arith.mulf %202, %203 : vector<32x16xf32>
    %cst_91 = arith.constant dense<0xFF800000> : vector<32xf32>
    %205 = vector.multi_reduction <maximumf>, %204, %cst_91 [1] : vector<32x16xf32> to vector<32xf32>
    %206 = vector.shape_cast %205 : vector<32xf32> to vector<32x1xf32>
    %207 = vector.broadcast %206 : vector<32x1xf32> to vector<32x16xf32>
    %208 = arith.subf %204, %207 : vector<32x16xf32>
    %209 = math.exp %208 : vector<32x16xf32>
    %cst_92 = arith.constant dense<0.000000e+00> : vector<32xf32>
    %210 = vector.multi_reduction <add>, %209, %cst_92 [1] : vector<32x16xf32> to vector<32xf32>
    %211 = vector.shape_cast %210 : vector<32xf32> to vector<32x1xf32>
    %212 = arith.truncf %209 : vector<32x16xf32> to vector<32x16xbf16>
    %cst_93 = arith.constant dense<0.000000e+00> : vector<32x64xf32>
    %213 = tpu.matmul %212, %201, %cst_93 {dimension_numbers = #tpu.dot_dimension_numbers<[1], [0], [0], [1], [0, 0, 1, 1], [], []>} : vector<32x16xbf16>, vector<16x64xbf16>, vector<32x64xf32> -> vector<32x64xf32>
    %214 = tpu.reciprocal %211 {approx = true} : vector<32x1xf32> -> vector<32x1xf32>
    %215 = vector.broadcast %214 : vector<32x1xf32> to vector<32x64xf32>
    %216 = arith.mulf %213, %215 : vector<32x64xf32>
    %217 = arith.truncf %216 : vector<32x64xf32> to vector<32x64xbf16>
    %218 = vector.extract_strided_slice %170 {offsets = [64, 0], sizes = [64, 128], strides = [1, 1]} : vector<128x128xbf16> to vector<64x128xbf16>
    %cst_94 = arith.constant dense<0.000000e+00> : vector<32x128xf32>
    %219 = tpu.matmul %217, %218, %cst_94 {dimension_numbers = #tpu.dot_dimension_numbers<[1], [0], [0], [1], [0, 0, 1, 1], [], []>} : vector<32x64xbf16>, vector<64x128xbf16>, vector<32x128xf32> -> vector<32x128xf32>
    %220 = arith.addf %195, %219 : vector<32x128xf32>
    %221 = vector.broadcast %171 : vector<1x128xf32> to vector<32x128xf32>
    %222 = arith.addf %220, %221 : vector<32x128xf32>
    %223 = arith.addf %126, %222 : vector<32x128xf32>
    %cst_95 = arith.constant dense<0.000000e+00> : vector<32xf32>
    %224 = vector.multi_reduction <add>, %223, %cst_95 [1] : vector<32x128xf32> to vector<32xf32>
    %225 = vector.shape_cast %224 : vector<32xf32> to vector<32x1xf32>
    %cst_96 = arith.constant 1.280000e+02 : f32
    %226 = vector.broadcast %cst_96 : f32 to vector<32x1xf32>
    %227 = arith.divf %225, %226 : vector<32x1xf32>
    %228 = vector.broadcast %227 : vector<32x1xf32> to vector<32x128xf32>
    %229 = arith.subf %223, %228 : vector<32x128xf32>
    %230 = arith.mulf %229, %229 : vector<32x128xf32>
    %cst_97 = arith.constant dense<0.000000e+00> : vector<32xf32>
    %231 = vector.multi_reduction <add>, %230, %cst_97 [1] : vector<32x128xf32> to vector<32xf32>
    %232 = vector.shape_cast %231 : vector<32xf32> to vector<32x1xf32>
    %cst_98 = arith.constant 1.280000e+02 : f32
    %233 = vector.broadcast %cst_98 : f32 to vector<32x1xf32>
    %234 = arith.divf %232, %233 : vector<32x1xf32>
    %cst_99 = arith.constant 9.99999997E-7 : f32
    %235 = vector.broadcast %cst_99 : f32 to vector<32x1xf32>
    %236 = arith.addf %234, %235 : vector<32x1xf32>
    %237 = math.rsqrt %236 : vector<32x1xf32>
    %238 = vector.broadcast %237 : vector<32x1xf32> to vector<32x128xf32>
    %239 = arith.mulf %229, %238 : vector<32x128xf32>
    %240 = vector.extract_strided_slice %8 {offsets = [4, 0], sizes = [1, 128], strides = [1, 1]} : vector<6x128xf32> to vector<1x128xf32>
    %cst_100 = arith.constant 1.000000e+00 : f32
    %241 = vector.broadcast %cst_100 : f32 to vector<1x128xf32>
    %242 = arith.addf %241, %240 : vector<1x128xf32>
    %243 = vector.broadcast %242 : vector<1x128xf32> to vector<32x128xf32>
    %244 = arith.mulf %239, %243 : vector<32x128xf32>
    %245 = vector.extract_strided_slice %8 {offsets = [3, 0], sizes = [1, 128], strides = [1, 1]} : vector<6x128xf32> to vector<1x128xf32>
    %246 = vector.broadcast %245 : vector<1x128xf32> to vector<32x128xf32>
    %247 = arith.addf %244, %246 : vector<32x128xf32>
    %248 = arith.truncf %247 : vector<32x128xf32> to vector<32x128xbf16>
    %c0_101 = arith.constant 0 : index
    %c0_102 = arith.constant 0 : index
    %c0_103 = arith.constant 0 : index
    %249 = vector.load %arg19[%c0_101, %c0_102, %c0_103] : memref<1x128x256xbf16, #tpu.memory_space<vmem>>, vector<1x128x256xbf16>
    %250 = vector.shape_cast %249 : vector<1x128x256xbf16> to vector<128x256xbf16>
    %cst_104 = arith.constant dense<0.000000e+00> : vector<32x256xf32>
    %251 = tpu.matmul %248, %250, %cst_104 {dimension_numbers = #tpu.dot_dimension_numbers<[1], [0], [0], [1], [0, 0, 1, 1], [], []>} : vector<32x128xbf16>, vector<128x256xbf16>, vector<32x256xf32> -> vector<32x256xf32>
    %c0_105 = arith.constant 0 : index
    %c0_106 = arith.constant 0 : index
    %c0_107 = arith.constant 0 : index
    %252 = vector.load %arg20[%c0_105, %c0_106, %c0_107] : memref<1x1x256xf32, #tpu.memory_space<vmem>>, vector<1x1x256xf32>
    %253 = vector.shape_cast %252 : vector<1x1x256xf32> to vector<1x256xf32>
    %254 = vector.broadcast %253 : vector<1x256xf32> to vector<32x256xf32>
    %255 = arith.addf %251, %254 : vector<32x256xf32>
    %256 = arith.mulf %255, %255 : vector<32x256xf32>
    %257 = arith.mulf %255, %256 : vector<32x256xf32>
    %cst_108 = arith.constant 4.471500e-02 : f32
    %258 = vector.broadcast %cst_108 : f32 to vector<32x256xf32>
    %259 = arith.mulf %258, %257 : vector<32x256xf32>
    %260 = arith.addf %255, %259 : vector<32x256xf32>
    %cst_109 = arith.constant 0.797884583 : f32
    %261 = vector.broadcast %cst_109 : f32 to vector<32x256xf32>
    %262 = arith.mulf %261, %260 : vector<32x256xf32>
    %263 = math.tanh %262 : vector<32x256xf32>
    %cst_110 = arith.constant 1.000000e+00 : f32
    %264 = vector.broadcast %cst_110 : f32 to vector<32x256xf32>
    %265 = arith.addf %264, %263 : vector<32x256xf32>
    %cst_111 = arith.constant 5.000000e-01 : f32
    %266 = vector.broadcast %cst_111 : f32 to vector<32x256xf32>
    %267 = arith.mulf %266, %265 : vector<32x256xf32>
    %268 = arith.mulf %255, %267 : vector<32x256xf32>
    %269 = arith.truncf %268 : vector<32x256xf32> to vector<32x256xbf16>
    %c0_112 = arith.constant 0 : index
    %c0_113 = arith.constant 0 : index
    %c0_114 = arith.constant 0 : index
    %270 = vector.load %arg21[%c0_112, %c0_113, %c0_114] : memref<1x256x128xbf16, #tpu.memory_space<vmem>>, vector<1x256x128xbf16>
    %271 = vector.shape_cast %270 : vector<1x256x128xbf16> to vector<256x128xbf16>
    %cst_115 = arith.constant dense<0.000000e+00> : vector<32x128xf32>
    %272 = tpu.matmul %269, %271, %cst_115 {dimension_numbers = #tpu.dot_dimension_numbers<[1], [0], [0], [1], [0, 0, 1, 1], [], []>} : vector<32x256xbf16>, vector<256x128xbf16>, vector<32x128xf32> -> vector<32x128xf32>
    %c0_116 = arith.constant 0 : index
    %c0_117 = arith.constant 0 : index
    %c0_118 = arith.constant 0 : index
    %273 = vector.load %arg22[%c0_116, %c0_117, %c0_118] : memref<1x1x128xf32, #tpu.memory_space<vmem>>, vector<1x1x128xf32>
    %274 = vector.shape_cast %273 : vector<1x1x128xf32> to vector<1x128xf32>
    %275 = vector.broadcast %274 : vector<1x128xf32> to vector<32x128xf32>
    %276 = arith.addf %272, %275 : vector<32x128xf32>
    %277 = vector.extract_strided_slice %8 {offsets = [5, 0], sizes = [1, 128], strides = [1, 1]} : vector<6x128xf32> to vector<1x128xf32>
    %278 = vector.broadcast %277 : vector<1x128xf32> to vector<32x128xf32>
    %279 = arith.mulf %276, %278 : vector<32x128xf32>
    %280 = arith.addf %223, %279 : vector<32x128xf32>
    %c0_119 = arith.constant 0 : index
    %c0_120 = arith.constant 0 : index
    %281 = vector.load %arg29[%c0_119, %c0_120] : memref<32x128xf32, #tpu.memory_space<vmem>>, vector<32x128xf32>
    tpu.vector_store %arg29[%c0_119, %c0_120], %280 {strides = array<i32>} : memref<32x128xf32, #tpu.memory_space<vmem>>, vector<32x128xf32>,
    %c1_i32 = arith.constant 1 : i32
    %282 = arith.cmpi eq, %arg0, %c1_i32 : i32
    %283 = arith.extui %282 : i1 to i32
    %c0_i32_121 = arith.constant 0 : i32
    %284 = arith.cmpi ne, %283, %c0_i32_121 : i32
    scf.if %284 {
      %c0_124 = arith.constant 0 : index
      %c0_125 = arith.constant 0 : index
      %288 = vector.load %arg26[%c0_124, %c0_125] : memref<32x128xf32, #tpu.memory_space<vmem>>, vector<32x128xf32>
      tpu.vector_store %arg26[%c0_124, %c0_125], %280 {strides = array<i32>} : memref<32x128xf32, #tpu.memory_space<vmem>>, vector<32x128xf32>,
    } else {
    }
    %c1_i32_122 = arith.constant 1 : i32
    %285 = arith.cmpi eq, %arg0, %c1_i32_122 : i32
    %286 = arith.extui %285 : i1 to i32
    %c0_i32_123 = arith.constant 0 : i32
    %287 = arith.cmpi ne, %286, %c0_i32_123 : i32
    scf.if %287 {
      %c0_124 = arith.constant 0 : index
      %c0_125 = arith.constant 0 : index
      %288 = vector.load %arg27[%c0_124, %c0_125] : memref<32x128xf32, #tpu.memory_space<vmem>>, vector<32x128xf32>
      tpu.vector_store %arg27[%c0_124, %c0_125], %280 {strides = array<i32>} : memref<32x128xf32, #tpu.memory_space<vmem>>, vector<32x128xf32>,
      %c0_126 = arith.constant 0 : index
      %c0_127 = arith.constant 0 : index
      %289 = vector.load %arg23[%c0_126, %c0_127] : memref<2x128xf32, #tpu.memory_space<vmem>>, vector<2x128xf32>
      %290 = vector.broadcast %4 : vector<1x128xf32> to vector<2x128xf32>
      %291 = arith.addf %289, %290 : vector<2x128xf32>
      %cst_128 = arith.constant dense<0.000000e+00> : vector<32xf32>
      %292 = vector.multi_reduction <add>, %280, %cst_128 [1] : vector<32x128xf32> to vector<32xf32>
      %293 = vector.shape_cast %292 : vector<32xf32> to vector<32x1xf32>
      %cst_129 = arith.constant 1.280000e+02 : f32
      %294 = vector.broadcast %cst_129 : f32 to vector<32x1xf32>
      %295 = arith.divf %293, %294 : vector<32x1xf32>
      %296 = vector.broadcast %295 : vector<32x1xf32> to vector<32x128xf32>
      %297 = arith.subf %280, %296 : vector<32x128xf32>
      %298 = arith.mulf %297, %297 : vector<32x128xf32>
      %cst_130 = arith.constant dense<0.000000e+00> : vector<32xf32>
      %299 = vector.multi_reduction <add>, %298, %cst_130 [1] : vector<32x128xf32> to vector<32xf32>
      %300 = vector.shape_cast %299 : vector<32xf32> to vector<32x1xf32>
      %cst_131 = arith.constant 1.280000e+02 : f32
      %301 = vector.broadcast %cst_131 : f32 to vector<32x1xf32>
      %302 = arith.divf %300, %301 : vector<32x1xf32>
      %cst_132 = arith.constant 9.99999997E-7 : f32
      %303 = vector.broadcast %cst_132 : f32 to vector<32x1xf32>
      %304 = arith.addf %302, %303 : vector<32x1xf32>
      %305 = math.rsqrt %304 : vector<32x1xf32>
      %306 = vector.broadcast %305 : vector<32x1xf32> to vector<32x128xf32>
      %307 = arith.mulf %297, %306 : vector<32x128xf32>
      %308 = vector.extract_strided_slice %291 {offsets = [1, 0], sizes = [1, 128], strides = [1, 1]} : vector<2x128xf32> to vector<1x128xf32>
      %cst_133 = arith.constant 1.000000e+00 : f32
      %309 = vector.broadcast %cst_133 : f32 to vector<1x128xf32>
      %310 = arith.addf %309, %308 : vector<1x128xf32>
      %311 = vector.broadcast %310 : vector<1x128xf32> to vector<32x128xf32>
      %312 = arith.mulf %307, %311 : vector<32x128xf32>
      %313 = vector.extract_strided_slice %291 {offsets = [0, 0], sizes = [1, 128], strides = [1, 1]} : vector<2x128xf32> to vector<1x128xf32>
      %314 = vector.broadcast %313 : vector<1x128xf32> to vector<32x128xf32>
      %315 = arith.addf %312, %314 : vector<32x128xf32>
      %316 = arith.truncf %315 : vector<32x128xf32> to vector<32x128xbf16>
      %c0_134 = arith.constant 0 : index
      %c0_135 = arith.constant 0 : index
      %317 = vector.load %arg24[%c0_134, %c0_135] : memref<128x128xbf16, #tpu.memory_space<vmem>>, vector<128x128xbf16>
      %cst_136 = arith.constant dense<0.000000e+00> : vector<32x128xf32>
      %318 = tpu.matmul %316, %317, %cst_136 {dimension_numbers = #tpu.dot_dimension_numbers<[1], [0], [0], [1], [0, 0, 1, 1], [], []>} : vector<32x128xbf16>, vector<128x128xbf16>, vector<32x128xf32> -> vector<32x128xf32>
      %c0_137 = arith.constant 0 : index
      %c0_138 = arith.constant 0 : index
      %319 = vector.load %arg25[%c0_137, %c0_138] : memref<1x128xf32, #tpu.memory_space<vmem>>, vector<1x128xf32>
      %320 = vector.broadcast %319 : vector<1x128xf32> to vector<32x128xf32>
      %321 = arith.addf %318, %320 : vector<32x128xf32>
      %c0_139 = arith.constant 0 : index
      %c0_140 = arith.constant 0 : index
      %322 = vector.load %arg28[%c0_139, %c0_140] : memref<32x128xf32, #tpu.memory_space<vmem>>, vector<32x128xf32>
      tpu.vector_store %arg28[%c0_139, %c0_140], %321 {strides = array<i32>} : memref<32x128xf32, #tpu.memory_space<vmem>>, vector<32x128xf32>,
    } else {
    }
    return
  }
  func.func @transform_0(%arg0: i32) -> (i32, i32) {
    %c0_i32 = arith.constant 0 : i32
    %c0_i32_0 = arith.constant 0 : i32
    %c0_i32_1 = arith.constant 0 : i32
    return %c0_i32, %c0_i32_0 : i32, i32
  }
  func.func @transform_1(%arg0: i32) -> (i32, i32) {
    %c0_i32 = arith.constant 0 : i32
    %c0_i32_0 = arith.constant 0 : i32
    %c0_i32_1 = arith.constant 0 : i32
    return %c0_i32, %c0_i32_0 : i32, i32
  }
  func.func @transform_2(%arg0: i32) -> (i32, i32) {
    %c0_i32 = arith.constant 0 : i32
    %c0_i32_0 = arith.constant 0 : i32
    %c0_i32_1 = arith.constant 0 : i32
    return %c0_i32, %c0_i32_0 : i32, i32
  }
  func.func @transform_3(%arg0: i32) -> (i32, i32) {
    %c0_i32 = arith.constant 0 : i32
    %c0_i32_0 = arith.constant 0 : i32
    %c0_i32_1 = arith.constant 0 : i32
    return %c0_i32, %c0_i32_0 : i32, i32
  }
  func.func @transform_4(%arg0: i32) -> (i32, i32) {
    %c0_i32 = arith.constant 0 : i32
    %c0_i32_0 = arith.constant 0 : i32
    %c0_i32_1 = arith.constant 0 : i32
    return %c0_i32, %c0_i32_0 : i32, i32
  }
  func.func @transform_5(%arg0: i32) -> (i32, i32) {
    %c0_i32 = arith.constant 0 : i32
    %c0_i32_0 = arith.constant 0 : i32
    %c0_i32_1 = arith.constant 0 : i32
    return %c0_i32, %c0_i32_0 : i32, i32
  }
  func.func @transform_6(%arg0: i32) -> (i32, i32) {
    %c0_i32 = arith.constant 0 : i32
    %c0_i32_0 = arith.constant 0 : i32
    %c0_i32_1 = arith.constant 0 : i32
    return %c0_i32, %c0_i32_0 : i32, i32
  }
  func.func @transform_7(%arg0: i32) -> (i32, i32) {
    %c0_i32 = arith.constant 0 : i32
    %c0_i32_0 = arith.constant 0 : i32
    %c0_i32_1 = arith.constant 0 : i32
    return %c0_i32, %c0_i32_0 : i32, i32
  }
  func.func @transform_8(%arg0: i32) -> (i32, i32) {
    %c0_i32 = arith.constant 0 : i32
    %c0_i32_0 = arith.constant 0 : i32
    %c0_i32_1 = arith.constant 0 : i32
    return %c0_i32, %c0_i32_0 : i32, i32
  }
  func.func @transform_9(%arg0: i32) -> (i32, i32) {
    %c0_i32 = arith.constant 0 : i32
    %c0_i32_0 = arith.constant 0 : i32
    %c0_i32_1 = arith.constant 0 : i32
    return %c0_i32, %c0_i32_0 : i32, i32
  }
  func.func @transform_10(%arg0: i32) -> (i32, i32) {
    %c0_i32 = arith.constant 0 : i32
    %c0_i32_0 = arith.constant 0 : i32
    %c0_i32_1 = arith.constant 0 : i32
    return %c0_i32, %c0_i32_0 : i32, i32
  }
  func.func @transform_11(%arg0: i32) -> (i32, i32) {
    %c0_i32 = arith.constant 0 : i32
    %c0_i32_0 = arith.constant 0 : i32
    %c0_i32_1 = arith.constant 0 : i32
    return %c0_i32, %c0_i32_0 : i32, i32
  }
  func.func @transform_12(%arg0: i32) -> (i32, i32, i32) {
    %c0_i32 = arith.constant 0 : i32
    %c0_i32_0 = arith.constant 0 : i32
    %c0_i32_1 = arith.constant 0 : i32
    return %arg0, %c0_i32, %c0_i32_0 : i32, i32, i32
  }
  func.func @transform_13(%arg0: i32) -> (i32, i32, i32, i32) {
    %c0_i32 = arith.constant 0 : i32
    %c0_i32_0 = arith.constant 0 : i32
    %c0_i32_1 = arith.constant 0 : i32
    %c0_i32_2 = arith.constant 0 : i32
    return %arg0, %c0_i32, %c0_i32_0, %c0_i32_1 : i32, i32, i32, i32
  }
  func.func @transform_14(%arg0: i32) -> (i32, i32, i32) {
    %c0_i32 = arith.constant 0 : i32
    %c0_i32_0 = arith.constant 0 : i32
    %c0_i32_1 = arith.constant 0 : i32
    return %arg0, %c0_i32, %c0_i32_0 : i32, i32, i32
  }
  func.func @transform_15(%arg0: i32) -> (i32, i32, i32, i32) {
    %c0_i32 = arith.constant 0 : i32
    %c0_i32_0 = arith.constant 0 : i32
    %c0_i32_1 = arith.constant 0 : i32
    %c0_i32_2 = arith.constant 0 : i32
    return %arg0, %c0_i32, %c0_i32_0, %c0_i32_1 : i32, i32, i32, i32
  }
  func.func @transform_16(%arg0: i32) -> (i32, i32, i32) {
    %c0_i32 = arith.constant 0 : i32
    %c0_i32_0 = arith.constant 0 : i32
    %c0_i32_1 = arith.constant 0 : i32
    return %arg0, %c0_i32, %c0_i32_0 : i32, i32, i32
  }
  func.func @transform_17(%arg0: i32) -> (i32, i32, i32) {
    %c0_i32 = arith.constant 0 : i32
    %c0_i32_0 = arith.constant 0 : i32
    %c0_i32_1 = arith.constant 0 : i32
    return %arg0, %c0_i32, %c0_i32_0 : i32, i32, i32
  }
  func.func @transform_18(%arg0: i32) -> (i32, i32, i32) {
    %c0_i32 = arith.constant 0 : i32
    %c0_i32_0 = arith.constant 0 : i32
    %c0_i32_1 = arith.constant 0 : i32
    return %arg0, %c0_i32, %c0_i32_0 : i32, i32, i32
  }
  func.func @transform_19(%arg0: i32) -> (i32, i32, i32) {
    %c0_i32 = arith.constant 0 : i32
    %c0_i32_0 = arith.constant 0 : i32
    %c0_i32_1 = arith.constant 0 : i32
    return %arg0, %c0_i32, %c0_i32_0 : i32, i32, i32
  }
  func.func @transform_20(%arg0: i32) -> (i32, i32, i32) {
    %c0_i32 = arith.constant 0 : i32
    %c0_i32_0 = arith.constant 0 : i32
    %c0_i32_1 = arith.constant 0 : i32
    return %arg0, %c0_i32, %c0_i32_0 : i32, i32, i32
  }
  func.func @transform_21(%arg0: i32) -> (i32, i32, i32) {
    %c0_i32 = arith.constant 0 : i32
    %c0_i32_0 = arith.constant 0 : i32
    %c0_i32_1 = arith.constant 0 : i32
    return %arg0, %c0_i32, %c0_i32_0 : i32, i32, i32
  }
  func.func @transform_22(%arg0: i32) -> (i32, i32) {
    %c0_i32 = arith.constant 0 : i32
    %c0_i32_0 = arith.constant 0 : i32
    %c0_i32_1 = arith.constant 0 : i32
    return %c0_i32, %c0_i32_0 : i32, i32
  }
  func.func @transform_23(%arg0: i32) -> (i32, i32) {
    %c0_i32 = arith.constant 0 : i32
    %c0_i32_0 = arith.constant 0 : i32
    %c0_i32_1 = arith.constant 0 : i32
    return %c0_i32, %c0_i32_0 : i32, i32
  }
  func.func @transform_24(%arg0: i32) -> (i32, i32) {
    %c0_i32 = arith.constant 0 : i32
    %c0_i32_0 = arith.constant 0 : i32
    %c0_i32_1 = arith.constant 0 : i32
    return %c0_i32, %c0_i32_0 : i32, i32
  }
  func.func @transform_25(%arg0: i32) -> (i32, i32) {
    %c0_i32 = arith.constant 0 : i32
    %c0_i32_0 = arith.constant 0 : i32
    %c0_i32_1 = arith.constant 0 : i32
    return %c0_i32, %c0_i32_0 : i32, i32
  }
  func.func @transform_26(%arg0: i32) -> (i32, i32) {
    %c0_i32 = arith.constant 0 : i32
    %c0_i32_0 = arith.constant 0 : i32
    %c0_i32_1 = arith.constant 0 : i32
    return %c0_i32, %c0_i32_0 : i32, i32
  }
  func.func @transform_27(%arg0: i32) -> (i32, i32) {
    %c0_i32 = arith.constant 0 : i32
    %c0_i32_0 = arith.constant 0 : i32
    %c0_i32_1 = arith.constant 0 : i32
    return %c0_i32, %c0_i32_0 : i32, i32
  }
}

</mosaic_0001>

<bundles_post_ra>
// kernel: tile.15
= control target key start
LH: loop header
LB: loop body
LE: loop exit
PB: predicated region body
PF: predicated region fallthrough
CT: control target
= control target key end

     0   :  { %s40_s0 = inlined_call_operand.vmem [shape: f32[2], index: 0, kind: input, shape index: {}]   ;;  %s41_s1 = inlined_call_operand.vmem [shape: f32[32,2], index: 1, kind: output, shape index: {}]  }
   0x1   :  { %v4_v0 = vld [vmem:[%s40_s0] ss:$0 sm:$0xff] }
   0x2   :  { %5 = vst [vmem:[%s41_s1] sm:$0xff] %v4_v0  ;;  %12 = vst [vmem:[%s41_s1 + $0x8] sm:$0xff] %v4_v0 }
   0x3   :  { %13 = vst [vmem:[%s41_s1 + $0x10] sm:$0xff] %v4_v0  ;;  %14 = vst [vmem:[%s41_s1 + $0x18] sm:$0xff] %v4_v0 }

// kernel: tile.25
= control target key start
LH: loop header
LB: loop body
LE: loop exit
PB: predicated region body
PF: predicated region fallthrough
CT: control target
= control target key end

     0   :  { %vm162_vm0 = vcmask 1047556   ;;  %s304_s10 = smov 64   ;;  %vm164_vm1 = vcmask 523264   ;;  %vm201_vm2 = vcmask 1048064   ;;  %s451_s0 = inlined_call_operand.vmem [shape: f32[32,2,64], index: 0, kind: input, shape index: {}]   ;;  %s452_s1 = inlined_call_operand.vmem [shape: f32[32,128], index: 1, kind: output, shape index: {}]  }
   0x1   :  { %v290_v0 = vld [vmem:[%s451_s0 + $0xe] sm:$0x3]  ;;  %v291_v1 = vld [vmem:[%s451_s0 + $0xc] sm:$0x3]  ;;  %v292_v2 = vld [vmem:[%s451_s0 + $0xa] sm:$0x3] }
   0x2   :  { %128 = vst [vmem:[#allocation0 + $0x38] sm:$0x3] %v290_v0  ;;  %133 = vst [vmem:[#allocation0 + $0x30] sm:$0x3] %v291_v1  ;;  %v293_v3 = vld [vmem:[%s451_s0 + $0x8] sm:$0x3] }
   0x3   :  { %138 = vst [vmem:[#allocation0 + $0x28] sm:$0x3] %v292_v2  ;;  %v294_v4 = vld [vmem:[%s451_s0 + $0x6] sm:$0x3]  ;;  %v295_v5 = vld [vmem:[%s451_s0 + $0x4] sm:$0x3] }
   0x4   :  { %143 = vst [vmem:[#allocation0 + $0x20] sm:$0x3] %v293_v3  ;;  %148 = vst [vmem:[#allocation0 + $0x18] sm:$0x3] %v294_v4  ;;  %v296_v6 = vld [vmem:[%s451_s0 + $0x2] sm:$0x3] }
   0x5   :  { %153 = vst [vmem:[#allocation0 + $0x10] sm:$0x3] %v295_v5  ;;  %v158_v7 = vld [vmem:[%s451_s0] sm:$0x3]  ;;  %157 = vst [vmem:[#allocation0 + $0x8] sm:$0x3] %v296_v6 }
   0x6   :  { %159 = vst [vmem:[#allocation0] sm:$0x3] %v158_v7  ;;  %v274_v8 = vld [vmem:[%s451_s0 + $0x2e] sm:$0x3]  ;;  %v275_v9 = vld [vmem:[%s451_s0 + $0x2c] sm:$0x3] }
   0x7   :  { %v276_v10 = vld [vmem:[%s451_s0 + $0x2a] sm:$0x3]  ;;  %48 = vst [vmem:[#allocation0 + $0xb8] sm:$0x3] %v274_v8  ;;  %53 = vst [vmem:[#allocation0 + $0xb0] sm:$0x3] %v275_v9 }
   0x8   :  { %58 = vst [vmem:[#allocation0 + $0xa8] sm:$0x3] %v276_v10  ;;  %v277_v11 = vld [vmem:[%s451_s0 + $0x28] sm:$0x3]  ;;  %v278_v12 = vld [vmem:[%s451_s0 + $0x26] sm:$0x3] }
   0x9   :  { %v279_v13 = vld [vmem:[%s451_s0 + $0x24] sm:$0x3]  ;;  %63 = vst [vmem:[#allocation0 + $0xa0] sm:$0x3] %v277_v11  ;;  %68 = vst [vmem:[#allocation0 + $0x98] sm:$0x3] %v278_v12 }
   0xa   :  { %73 = vst [vmem:[#allocation0 + $0x90] sm:$0x3] %v279_v13  ;;  %v280_v14 = vld [vmem:[%s451_s0 + $0x22] sm:$0x3]  ;;  %v281_v15 = vld [vmem:[%s451_s0 + $0x20] sm:$0x3] }
   0xb   :  { %v282_v16 = vld [vmem:[%s451_s0 + $0x1e] sm:$0x3]  ;;  %78 = vst [vmem:[#allocation0 + $0x88] sm:$0x3] %v280_v14  ;;  %83 = vst [vmem:[#allocation0 + $0x80] sm:$0x3] %v281_v15 }
   0xc   :  { %88 = vst [vmem:[#allocation0 + $0x78] sm:$0x3] %v282_v16  ;;  %v283_v17 = vld [vmem:[%s451_s0 + $0x1c] sm:$0x3]  ;;  %v284_v18 = vld [vmem:[%s451_s0 + $0x1a] sm:$0x3] }
   0xd   :  { %v285_v19 = vld [vmem:[%s451_s0 + $0x18] sm:$0x3]  ;;  %93 = vst [vmem:[#allocation0 + $0x70] sm:$0x3] %v283_v17  ;;  %98 = vst [vmem:[#allocation0 + $0x68] sm:$0x3] %v284_v18 }
   0xe   :  { %103 = vst [vmem:[#allocation0 + $0x60] sm:$0x3] %v285_v19  ;;  %v286_v20 = vld [vmem:[%s451_s0 + $0x16] sm:$0x3]  ;;  %v287_v21 = vld [vmem:[%s451_s0 + $0x14] sm:$0x3] }
   0xf   :  { %v288_v22 = vld [vmem:[%s451_s0 + $0x12] sm:$0x3]  ;;  %108 = vst [vmem:[#allocation0 + $0x58] sm:$0x3] %v286_v20  ;;  %113 = vst [vmem:[#allocation0 + $0x50] sm:$0x3] %v287_v21 }
  0x10   :  { %118 = vst [vmem:[#allocation0 + $0x48] sm:$0x3] %v288_v22  ;;  %v289_v23 = vld [vmem:[%s451_s0 + $0x10] sm:$0x3]  ;;  %v266_v24 = vld [vmem:[%s451_s0 + $0x3e] sm:$0x3] }
  0x11   :  { %v267_v25 = vld [vmem:[%s451_s0 + $0x3c] sm:$0x3]  ;;  %v196_v26 = vld [vmem:[#allocation0 + $0x1] ss:$8 sm:$0xf0]  }
  0x12   :  { %123 = vst [vmem:[#allocation0 + $0x40] sm:$0x3] %v289_v23  ;;  %8 = vst [vmem:[#allocation0 + $0xf8] sm:$0x3] %v266_v24  ;;  %v268_v27 = vld [vmem:[%s451_s0 + $0x3a] sm:$0x3] }
  0x13   :  { %13 = vst [vmem:[#allocation0 + $0xf0] sm:$0x3] %v267_v25  ;;  %v194_v28 = vld [vmem:[#allocation0 + $0x1] ss:$8 sm:$0xf]  }
  0x14   :  { %18 = vst [vmem:[#allocation0 + $0xe8] sm:$0x3] %v268_v27  ;;  %v269_v29 = vld [vmem:[%s451_s0 + $0x38] sm:$0x3]  ;;  %v198_v30 = vsel %vm162_vm0, %v196_v26, %v194_v28  ;;  %v270_v31 = vld [vmem:[%s451_s0 + $0x36] sm:$0x3] }
  0x15   :  { %23 = vst [vmem:[#allocation0 + $0xe0] sm:$0x3] %v269_v29  ;;  %v271_v32 = vld [vmem:[%s451_s0 + $0x34] sm:$0x3]  ;;  %v272_v33 = vld [vmem:[%s451_s0 + $0x32] sm:$0x3]  ;;  %199 = vrot.lane.b32.xlu0 %v198_v30, %s304_s10 }
  0x16   :  { %v217_v34 = vld [vmem:[#allocation0 + $0x81] ss:$8 sm:$0xf0]   ;;  %28 = vst [vmem:[#allocation0 + $0xd8] sm:$0x3] %v270_v31 }
  0x17   :  { %33 = vst [vmem:[#allocation0 + $0xd0] sm:$0x3] %v271_v32  ;;  %38 = vst [vmem:[#allocation0 + $0xc8] sm:$0x3] %v272_v33  ;;  %v273_v35 = vld [vmem:[%s451_s0 + $0x30] sm:$0x3] }
  0x18   :  { %v215_v36 = vld [vmem:[#allocation0 + $0x81] ss:$8 sm:$0xf]   ;;  %43 = vst [vmem:[#allocation0 + $0xc0] sm:$0x3] %v273_v35 }
  0x19   :  { %v160_v37 = vld [vmem:[#allocation0] ss:$8 sm:$0xf]   ;;  %v219_v38 = vsel %vm162_vm0, %v217_v34, %v215_v36  ;;  %v206_v39 = vld [vmem:[#allocation0 + $0x41] ss:$8 sm:$0xf0]  }
  0x1a   :  { %v161_v40 = vld [vmem:[#allocation0] ss:$8 sm:$0xf0]   ;;  %220 = vrot.lane.b32.xlu1 %v219_v38, %s304_s10  ;;  %v204_v44 = vld [vmem:[#allocation0 + $0x41] ss:$8 sm:$0xf]  }
  0x1b   :  { %v163_v41 = vsel %vm162_vm0, %v161_v40, %v160_v37  ;;  %v176_v42 = vld [vmem:[#allocation0 + $0x80] ss:$8 sm:$0xf]   ;;  %v208_v47 = vsel %vm162_vm0, %v206_v39, %v204_v44 }
  0x1c   :  { %v178_v43 = vld [vmem:[#allocation0 + $0x80] ss:$8 sm:$0xf0]   ;;  %165 = vst.msk [vmem:[%s452_s1] sm:$0xff] %vm164_vm1, %v163_v41   ;;  %209 = vrot.lane.b32.xlu0 %v208_v47, %s304_s10 }
  0x1d   :  { %v180_v45 = vsel %vm162_vm0, %v178_v43, %v176_v42  ;;  %v167_v46 = vld [vmem:[#allocation0 + $0x40] ss:$8 sm:$0xf]   ;;  %v228_v49 = vld [vmem:[#allocation0 + $0xc1] ss:$8 sm:$0xf0]  }
  0x1e   :  { %298 = vst.msk [vmem:[%s452_s1 + $0x10] sm:$0xff] %vm164_vm1, %v180_v45   ;;  %v169_v48 = vld [vmem:[#allocation0 + $0x40] ss:$8 sm:$0xf0]  }
  0x1f   :  { %v171_v50 = vsel %vm162_vm0, %v169_v48, %v167_v46  ;;  %v187_v51 = vld [vmem:[#allocation0 + $0xc0] ss:$8 sm:$0xf0]   ;;  %v226_v52 = vld [vmem:[#allocation0 + $0xc1] ss:$8 sm:$0xf]  }
  0x20   :  { %297 = vst.msk [vmem:[%s452_s1 + $0x8] sm:$0xff] %vm164_vm1, %v171_v50   ;;  %v185_v53 = vld [vmem:[#allocation0 + $0xc0] ss:$8 sm:$0xf]   ;;  %v230_v54 = vsel %vm162_vm0, %v228_v49, %v226_v52 }
  0x21   :  { %v189_v55 = vsel %vm162_vm0, %v187_v51, %v185_v53  ;;  %231 = vrot.lane.b32.xlu1 %v230_v54, %s304_s10 }
  0x22   :  { %299 = vst.msk [vmem:[%s452_s1 + $0x18] sm:$0xff] %vm164_vm1, %v189_v55  }
  0x87   :  { %v200_v56 = vpop.permute.xlu0 %199  }
  0x88   :  { %202 = vst.msk [vmem:[%s452_s1] sm:$0xff] %vm201_vm2, %v200_v56  }
  0x8c   :  { %v221_v57 = vpop.permute.xlu1 %220  }
  0x8d   :  { %301 = vst.msk [vmem:[%s452_s1 + $0x10] sm:$0xff] %vm201_vm2, %v221_v57  }
  0x8e   :  { %v210_v58 = vpop.permute.xlu0 %209  }
  0x8f   :  { %300 = vst.msk [vmem:[%s452_s1 + $0x8] sm:$0xff] %vm201_vm2, %v210_v58  }
  0x93   :  { %v232_v59 = vpop.permute.xlu1 %231  }
  0x94   :  { %302 = vst.msk [vmem:[%s452_s1 + $0x18] sm:$0xff] %vm201_vm2, %v232_v59  }

// kernel: feature_extractor_forward.1
= control target key start
LH: loop header
LB: loop body
LE: loop exit
PB: predicated region body
PF: predicated region fallthrough
CT: control target
= control target key end

     0   :  { %s6709_s0 = inlined_call_operand.vmem [shape: bf16[32,128], index: 0, kind: input, shape index: {}]   ;;  %s6710_s1 = inlined_call_operand.vmem [shape: bf16[128,128], index: 1, kind: input, shape index: {}]   ;;  %s6711_s2 = inlined_call_operand.vmem [shape: f32[1,128], index: 2, kind: input, shape index: {}]   ;;  %s6712_s3 = inlined_call_operand.vmem [shape: f32[1,256], index: 3, kind: input, shape index: {}]   ;;  %s6713_s4 = inlined_call_operand.vmem [shape: bf16[256,128], index: 4, kind: input, shape index: {}]   ;;  %s6714_s5 = inlined_call_operand.vmem [shape: f32[1,128], index: 5, kind: input, shape index: {}]   ;;  %s6715_s6 = inlined_call_operand.vmem [shape: bf16[128,128], index: 6, kind: input, shape index: {}]   ;;  %s6716_s7 = inlined_call_operand.vmem [shape: f32[1,128], index: 7, kind: input, shape index: {}]   ;;  %s6717_s8 = inlined_call_operand.vmem [shape: bf16[16,128], index: 8, kind: input, shape index: {}]   ;;  %s6718_s9 = inlined_call_operand.vmem [shape: f32[32,128], index: 9, kind: input, shape index: {}]   ;;  %s6719_s10 = inlined_call_operand.vmem [shape: f32[32,128], index: 10, kind: input, shape index: {}]   ;;  %s6720_s11 = inlined_call_operand.vmem [shape: f32[128,128], index: 11, kind: input, shape index: {}]   ;;  %s6721_s12 = inlined_call_operand.vmem [shape: f32[2,6,128], index: 12, kind: input, shape index: {}]   ;;  %s6722_s13 = inlined_call_operand.vmem [shape: bf16[2,4,128,128], index: 13, kind: input, shape index: {}]   ;;  %s6723_s14 = inlined_call_operand.vmem [shape: f32[2,4,128], index: 14, kind: input, shape index: {}]   ;;  %s6724_s15 = inlined_call_operand.vmem [shape: bf16[2,4,128,128], index: 15, kind: input, shape index: {}]   ;;  %s6725_s16 = inlined_call_operand.vmem [shape: f32[2,4,128], index: 16, kind: input, shape index: {}]   ;;  %s6726_s17 = inlined_call_operand.vmem [shape: f32[2,2,128], index: 17, kind: input, shape index: {}]   ;;  %s6727_s18 = inlined_call_operand.vmem [shape: bf16[2,128,256], index: 18, kind: input, shape index: {}]   ;;  %s6728_s19 = inlined_call_operand.vmem [shape: f32[2,1,256], index: 19, kind: input, shape index: {}]   ;;  %s6729_s20 = inlined_call_operand.vmem [shape: bf16[2,256,128], index: 20, kind: input, shape index: {}]   ;;  %s6730_s21 = inlined_call_operand.vmem [shape: f32[2,1,128], index: 21, kind: input, shape index: {}]   ;;  %s6731_s22 = inlined_call_operand.vmem [shape: f32[2,128], index: 22, kind: input, shape index: {}]   ;;  %s6732_s23 = inlined_call_operand.vmem [shape: bf16[128,128], index: 23, kind: input, shape index: {}]   ;;  %s6733_s24 = inlined_call_operand.vmem [shape: f32[1,128], index: 24, kind: input, shape index: {}]   ;;  %s6734_s25 = inlined_call_operand.hbm [shape: f32[32,128], index: 25, kind: output, shape index: {0}]   ;;  %s6735_s26 = inlined_call_operand.hbm [shape: f32[32,128], index: 26, kind: output, shape index: {1}]   ;;  %s6736_s27 = inlined_call_operand.vmem [shape: f32[32,128], index: 27, kind: output, shape index: {2}]  }
   0x1   :  { %6749 = sst [smem:[#allocation11_spill]] %s6709_s0 }
   0x2   :  { %6750 = sst [smem:[#allocation12_spill]] %s6710_s1 }
   0x3   :  { %6751 = sst [smem:[#allocation13_spill]] %s6711_s2 }
   0x4   :  { %6752 = sst [smem:[#allocation14_spill]] %s6712_s3 }
   0x5   :  { %6753 = sst [smem:[#allocation15_spill]] %s6713_s4 }
   0x6   :  { %6754 = sst [smem:[#allocation16_spill]] %s6714_s5 }
   0x7   :  { %6755 = sst [smem:[#allocation17_spill]] %s6715_s6 }
   0x8   :  { %6756 = sst [smem:[#allocation18_spill]] %s6716_s7 }
   0x9   :  { %6757 = sst [smem:[#allocation19_spill]] %s6717_s8 }
   0xa   :  { %6758 = sst [smem:[#allocation20_spill]] %s6718_s9 }
   0xb   :  { %6759 = sst [smem:[#allocation21_spill]] %s6719_s10 }
   0xc   :  { %6760 = sst [smem:[#allocation22_spill]] %s6720_s11 }
   0xd   :  { %6761 = sst [smem:[#allocation23_spill]] %s6721_s12 }
   0xe   :  { %6762 = sst [smem:[#allocation24_spill]] %s6722_s13 }
   0xf   :  { %6763 = sst [smem:[#allocation25_spill]] %s6723_s14 }
  0x10   :  { %6764 = sst [smem:[#allocation26_spill]] %s6724_s15 }
  0x11   :  { %6765 = sst [smem:[#allocation27_spill]] %s6725_s16 }
  0x12   :  { %6766 = sst [smem:[#allocation28_spill]] %s6726_s17 }
  0x13   :  { %6767 = sst [smem:[#allocation29_spill]] %s6727_s18 }
  0x14   :  { %6768 = sst [smem:[#allocation30_spill]] %s6734_s25 }
  0x15   :  { %6769 = sst [smem:[#allocation31_spill]] %s6735_s26 }
  0x16   :  { %6770 = sst [smem:[#allocation32_spill]] %s6736_s27 }
  0x17   :  { %33 = vsyncpa [#allocation5], 0 }
  0x18   :  { %34 = vsyncpa [#allocation7], 0  ;;  %s5912_s7 = smov 0  }
  0x19 LB: > { %6771 = sst [smem:[#allocation10_spill]] %s5760_s7  ;;  %s5918_s4 = sadd.s32 4294967295, %s5760_s7   ;;  %s5760_s7 = sphi %s5912_s7, %s40_s7  }
  0x1a   : > { %p4440_p0 = scmp.ge.s32.totalorder %s5760_s7, 1  ;;  %p812_p1 = scmp.lt.s32.totalorder %s5760_s7, 3 }
  0x1c   : > { %p813_p2 = pnand %p4440_p0, %p812_p1 }
  0x1d   : > { %p917_p3 = scmp.lt.s32.totalorder (!%p813_p2), %s5918_s4, 1  ;;  %s6772_s12 = sld [smem:[#allocation23_spill]] (!%p813_p2) }
  0x1e   : > { %816 = sbr.rel (%p813_p2) target bundleno = 5423 (0x152f), region = 120  ;;  %s6773_s13 = sld [smem:[#allocation24_spill]] (!%p813_p2) }
  0x1f   : > { %s6774_s15 = sld [smem:[#allocation26_spill]] (!%p813_p2)  ;;  %s6775_s14 = sld [smem:[#allocation25_spill]] (!%p813_p2) }
  0x20   : > { %s6776_s16 = sld [smem:[#allocation27_spill]] (!%p813_p2)  ;;  %s6777_s17 = sld [smem:[#allocation28_spill]] (!%p813_p2) }
  0x21   : > { %s6778_s18 = sld [smem:[#allocation29_spill]] (!%p813_p2)  ;;  %p4454_p4 = scmp.ne.s32.totalorder (!%p813_p2), %s5918_s4, 0 }
  0x25   : > { %s5924_s8 = scalar_select %p917_p3, %s5918_s4, 1 }
  0x26   : > { %v1107_v5 = vlaneseq (!%p4454_p4)  ;;  %s6780_s11 = sld [smem:[#allocation14_spill]] (!%p4454_p4)  ;;  %s6781_s7 = sld [smem:[#allocation12_spill]] (!%p4454_p4)  ;;  %v5762_v36 = vmov (!%p4454_p4), 0.0   ;;  %vm5763_vm0 = vmmov (!%p4454_p4), 0  }
  0x27   : > { %s4441_s30 = sshll.u32 %s5924_s8, 3  ;;  %s4726_s9 = sshll.u32 %s5924_s8, 8 }
  0x28   : > { %s5931_s0 = scalar_lea.vmem %s6772_s12, %s4441_s30  ;;  %s5936_s1 = scalar_lea.vmem %s6773_s13, %s4726_s9  ;;  %v1108_v8 = vshrl.u32 (!%p4454_p4), %v1107_v5, 7 }
  0x29   : > { %s4444_s6 = sshll.u32 %s5924_s8, 2  ;;  %s5942_s3 = scalar_lea.vmem %s6774_s15, %s4726_s9 }
  0x2a   : > { %s5947_s25 = scalar_lea.vmem %s6775_s14, %s4444_s6  ;;  %s5952_s30 = scalar_lea.vmem %s6776_s16, %s4444_s6  ;;  %v1113_v11 = vsub.s32 (!%p4454_p4), 1, %v1108_v8  ;;  %v1109_v23 = vsub.s32 (!%p4454_p4), 0, %v1108_v8 }
  0x2b   : > { %s4448_s28 = sshll.u32 %s5924_s8, 1  ;;  %s4728_s10 = sshll.u32 %s5924_s8, 7 }
  0x2c   : > { %s5959_s13 = scalar_lea.vmem %s6777_s17, %s4448_s28  ;;  %s5964_s2 = scalar_lea.vmem %s6778_s18, %s4728_s10  ;;  %v1105_v14 = vld [vmem:[%s6780_s11] sm:$0x3] (!%p4454_p4) }
  0x2d   : > { %s5969_s14 = scalar_lea.vmem %s6728_s19, %s4448_s28  ;;  %s5974_s5 = scalar_lea.vmem %s6729_s20, %s4728_s10  ;;  %v1114_v15 = vrot.slane (!%p4454_p4), %v1105_v14, %v1113_v11  ;;  %v5443_v16 = vld [vmem:[%s6781_s7] sm:$0xff] (!%p4454_p4)   ;;  %v1110_v27 = vrot.slane (!%p4454_p4), %v1105_v14, %v1109_v23 }
  0x2e   : > { %964 = sbr.rel (%p4454_p4) target bundleno = 547 (0x223), region = 124  ;;  %s6779_s9 = sld [smem:[#allocation15_spill]] (!%p4454_p4)  ;;  %4959 = vmatprep.subr.bf16.mxu0 (!%p4454_p4), %v5443_v16 }
  0x2f   : > { %s6782_s10 = smov (!%p4454_p4), %s6781_s7  ;;  %v1118_v19 = vpack.c.bf16 (!%p4454_p4), %v1114_v15, %v1114_v15  ;;  %4960 = vmatpush3.bf16.msra.mxu0 (!%p4454_p4), %v5443_v16  ;;  %v1117_v29 = vpack.c.bf16 (!%p4454_p4), %v1110_v27, %v1110_v27  ;;  %s6783_s15 = sld [smem:[#allocation11_spill]] (!%p4454_p4) }
  0x30   : > { %v5444_v17 = vld [vmem:[%s6782_s10 + $0x8] sm:$0xff] (!%p4454_p4)   ;;  %v5445_v21 = vld [vmem:[%s6782_s10 + $0x10] sm:$0xff] (!%p4454_p4)   ;;  %v5446_v25 = vld [vmem:[%s6782_s10 + $0x18] sm:$0xff] (!%p4454_p4)   ;;  %s6784_s29 = sld [smem:[#allocation17_spill]] (!%p4454_p4)  ;;  %s6785_s16 = sld [smem:[#allocation16_spill]] (!%p4454_p4) }
  0x31   : > { %1280 = vmatprep.mubr.bf16.mxu1 (!%p4454_p4), %v1118_v19  ;;  %4961 = vmatprep.subr.bf16.mxu0 (!%p4454_p4), %v5444_v17  ;;  %v5447_v28 = vld [vmem:[%s6782_s10 + $0x20] sm:$0xff] (!%p4454_p4)   ;;  %v5448_v30 = vld [vmem:[%s6782_s10 + $0x28] sm:$0xff] (!%p4454_p4)   ;;  %v5449_v31 = vld [vmem:[%s6782_s10 + $0x30] sm:$0xff] (!%p4454_p4)   ;;  %s6786_s17 = sld [smem:[#allocation13_spill]] (!%p4454_p4)  ;;  %s6787_s11 = sld [smem:[#allocation18_spill]] (!%p4454_p4) }
  0x32   : > { %v5450_v32 = vld [vmem:[%s6782_s10 + $0x38] sm:$0xff] (!%p4454_p4)  }
  0x33   : > { %4962 = vmatpush3.bf16.msra.mxu0 (!%p4454_p4), %v5444_v17 }
  0x34   : > { %v5427_v0 = vld [vmem:[%s6779_s9 + $0x40] sm:$0xff] (!%p4454_p4)   ;;  %v5429_v2 = vld [vmem:[%s6779_s9 + $0x48] sm:$0xff] (!%p4454_p4)   ;;  %v5431_v4 = vld [vmem:[%s6779_s9 + $0x50] sm:$0xff] (!%p4454_p4)   ;;  %4963 = vmatprep.subr.bf16.mxu0 (!%p4454_p4), %v5445_v21 }
  0x35   : > { %v5428_v1 = vld [vmem:[%s6779_s9] sm:$0xff]   ;;  %4740 = vmatprep.subr.bf16.mxu1 %v5427_v0  ;;  %v5430_v3 = vld [vmem:[%s6779_s9 + $0x8] sm:$0xff]   ;;  %v5432_v6 = vld [vmem:[%s6779_s9 + $0x10] sm:$0xff]  }
  0x36   : > { %4741 = vmatpush3.bf16.msra.mxu1 %v5428_v1  ;;  %v5433_v7 = vld [vmem:[%s6779_s9 + $0x58] sm:$0xff]   ;;  %v5435_v10 = vld [vmem:[%s6779_s9 + $0x60] sm:$0xff]   ;;  %v5437_v13 = vld [vmem:[%s6779_s9 + $0x68] sm:$0xff]  }
  0x37   : > { %4742 = vmatprep.subr.bf16.mxu1 %v5429_v2  ;;  %v5434_v9 = vld [vmem:[%s6779_s9 + $0x18] sm:$0xff]   ;;  %v5436_v12 = vld [vmem:[%s6779_s9 + $0x20] sm:$0xff]   ;;  %v5438_v18 = vld [vmem:[%s6779_s9 + $0x28] sm:$0xff]   ;;  %4964 = vmatpush3.bf16.msra.mxu0 %v5445_v21 }
  0x38   : > { %v5439_v20 = vld [vmem:[%s6779_s9 + $0x70] sm:$0xff]   ;;  %v5441_v24 = vld [vmem:[%s6779_s9 + $0x78] sm:$0xff]   ;;  %4965 = vmatprep.subr.bf16.mxu0 %v5446_v25  ;;  %v5451_v33 = vld [vmem:[%s6783_s15] sm:$0xff]  }
  0x39   : > { %v5440_v22 = vld [vmem:[%s6779_s9 + $0x30] sm:$0xff]   ;;  %v5442_v26 = vld [vmem:[%s6779_s9 + $0x38] sm:$0xff]   ;;  %v5452_v34 = vld [vmem:[%s6783_s15 + $0x8] sm:$0xff]   ;;  %4975 = vmatprep.mubr.bf16.mxu0 %v5451_v33 }
  0x3a   : > { %4743 = vmatpush3.bf16.msra.mxu1 %v5430_v3  ;;  %v5453_v35 = vld [vmem:[%s6784_s29] sm:$0xff]   ;;  %v5454_v37 = vld [vmem:[%s6784_s29 + $0x8] sm:$0xff]   ;;  %v5455_v38 = vld [vmem:[%s6784_s29 + $0x10] sm:$0xff]  }
  0x3b   : > { %4744 = vmatprep.subr.bf16.mxu1 %v5431_v4  ;;  %4966 = vmatpush3.bf16.msra.mxu0 %v5446_v25  ;;  %v5456_v39 = vld [vmem:[%s6784_s29 + $0x18] sm:$0xff]   ;;  %v5457_v40 = vld [vmem:[%s6784_s29 + $0x20] sm:$0xff]   ;;  %v5458_v41 = vld [vmem:[%s6784_s29 + $0x28] sm:$0xff]  }
  0x3c   : > { %4967 = vmatprep.subr.bf16.mxu0 %v5447_v28  ;;  %v5459_v42 = vld [vmem:[%s6784_s29 + $0x30] sm:$0xff]   ;;  %v5460_v43 = vld [vmem:[%s6784_s29 + $0x38] sm:$0xff]   ;;  %v1151_v45 = vld [vmem:[%s6785_s16] sm:$0x1] }
  0x3d   : > { %v4455_v57 = vld [vmem:[%s6786_s17] ss:$0 sm:$0xff] }
  0x3e   : > { %4745 = vmatpush3.bf16.msra.mxu1 %v5432_v6  ;;  %v1312_v2 = vld [vmem:[%s6787_s11] sm:$0x1] }
  0x3f   : > { %4746 = vmatprep.subr.bf16.mxu1 %v5433_v7  ;;  %4968 = vmatpush3.bf16.msra.mxu0 %v5447_v28 }
  0x40   : > { %4969 = vmatprep.subr.bf16.mxu0 %v5448_v30 }
  0x42   : > { %4747 = vmatpush3.bf16.msra.mxu1 %v5434_v9 }
  0x43   : > { %4748 = vmatprep.subr.bf16.mxu1 %v5435_v10  ;;  %4970 = vmatpush3.bf16.msra.mxu0 %v5448_v30 }
  0x44   : > { %4971 = vmatprep.subr.bf16.mxu0 %v5449_v31 }
  0x46   : > { %4749 = vmatpush3.bf16.msra.mxu1 %v5436_v12 }
  0x47   : > { %4750 = vmatprep.subr.bf16.mxu1 %v5437_v13  ;;  %4972 = vmatpush3.bf16.msra.mxu0 %v5449_v31 }
  0x48   : > { %4973 = vmatprep.subr.bf16.mxu0 %v5450_v32 }
  0x4a   : > { %4751 = vmatpush3.bf16.msra.mxu1 %v5438_v18 }
  0x4b   : > { %4752 = vmatprep.subr.bf16.mxu1 %v5439_v20  ;;  %4974 = vmatpush3.bf16.msra.mxu0 %v5450_v32 }
  0x4c   : > { %4979 = vmatprep.subr.bf16.mxu0 %v5762_v36 }
  0x4e   : > { %4753 = vmatpush3.bf16.msra.mxu1 %v5440_v22  ;;  %4976 = vmatmul.mubr.bf16.vlgmr.msra.gmra.mrb[0].mxu0 %v5452_v34 }
  0x4f   : > { %4754 = vmatprep.subr.bf16.mxu1 %v5441_v24  ;;  %4980 = vmatpush3.bf16.msra.mxu0 %v5453_v35 }
  0x50   : > { %4981 = vmatprep.subr.bf16.mxu0 %v5762_v36  ;;  %4995 = vmatprep.mubr.msk.bf16.mxu0 %vm5763_vm0, %v5762_v36 }
  0x52   : > { %4755 = vmatpush3.bf16.msra.mxu1 %v5442_v26 }
  0x53   : > { %4982 = vmatpush3.bf16.msra.mxu0 %v5454_v37 }
  0x54   : > { %4983 = vmatprep.subr.bf16.mxu0 %v5762_v36 }
  0x55   : > { %1281 = vmatmul.mubr.bf16.vlgmr.msra.gmra.mrb[0].mxu1 %v1117_v29 }
  0x57   : > { %4984 = vmatpush3.bf16.msra.mxu0 %v5455_v38 }
  0x58   : > { %4985 = vmatprep.subr.bf16.mxu0 %v5762_v36 }
  0x5b   : > { %4986 = vmatpush3.bf16.msra.mxu0 %v5456_v39 }
  0x5c   : > { %4987 = vmatprep.subr.bf16.mxu0 %v5762_v36 }
  0x5f   : > { %4988 = vmatpush3.bf16.msra.mxu0 %v5457_v40 }
  0x60   : > { %4989 = vmatprep.subr.bf16.mxu0 %v5762_v36 }
  0x63   : > { %4990 = vmatpush3.bf16.msra.mxu0 %v5458_v41 }
  0x64   : > { %4991 = vmatprep.subr.bf16.mxu0 %v5762_v36 }
  0x67   : > { %4992 = vmatpush3.bf16.msra.mxu0 %v5459_v42 }
  0x68   : > { %4993 = vmatprep.subr.bf16.mxu0 %v5762_v36 }
  0x6b   : > { %4994 = vmatpush3.bf16.msra.mxu0 %v5460_v43 }
 0x121   : > { %v4977_v58 = vpop.f32.mrb[0].mxu0 }
 0x122   : > { %v1095_v59 = vadd.f32 %v4977_v58, %v4455_v57  ;;  %v1086_v60 = vpop.f32.mrb[1].mxu0 }
 0x123   : > { %v1087_v61 = vadd.f32 %v4455_v57, %v1086_v60  ;;  %v4978_v62 = vpop.f32.mrb[2].mxu0 }
 0x124   : > { %1103 = vst [vmem:[#allocation2 + $0x10] sm:$0xff] %v1095_v59  ;;  %v1098_v63 = vadd.f32 %v4978_v62, %v4455_v57  ;;  %v1089_v0 = vpop.f32.mrb[3].mxu0 }
 0x125   : > { %1101 = vst [vmem:[#allocation2] sm:$0xff] %v1087_v61  ;;  %v1090_v1 = vadd.f32 %v4455_v57, %v1089_v0 }
 0x126   : > { %1104 = vst [vmem:[#allocation2 + $0x18] sm:$0xff] %v1098_v63 }
 0x127   : > { %1102 = vst [vmem:[#allocation2 + $0x8] sm:$0xff] %v1090_v1 }
 0x128   : > { %v4756_v44 = vpop.f32.mrb[0].mxu1 }
 0x129   : > { %v4757_v46 = vpop.f32.mrb[1].mxu1 }
 0x12a   : > { %v4758_v47 = vadd.f32 %v4757_v46, %v4756_v44  ;;  %v4759_v48 = vpop.f32.mrb[2].mxu1 }
 0x12b   : > { %v4760_v49 = vpop.f32.mrb[3].mxu1 }
 0x12c   : > { %v1283_v50 = vadd.f32 %v4758_v47, %v1151_v45 }
 0x12e   : > { %v4482_v51 = vmul.f32 -1.442695, %v1283_v50 }
 0x130   : > { %5461 = vpow2.f32 %v4482_v51 }
 0x13a   : > { %v5462_v52 = vpop.eup %5461 }
 0x13b   : > { %v1291_v53 = vadd.f32 1.0, %v5462_v52 }
 0x13d   : > { %5463 = vrcp.f32 %v1291_v53 }
 0x147   : > { %v5464_v54 = vpop.eup %5463 }
 0x148   : > { %v1294_v55 = vmul.f32 %v5464_v54, %v1283_v50 }
 0x14a   : > { %v1295_v56 = vpack.c.bf16 %v1294_v55, %v1294_v55 }
 0x14c   : > { %4996 = vmatmul.mubr.bf16.vlgmr.msra.gmra.mrb[4].mxu0 %v1295_v56 }
 0x21f   : > { %v1395_v3 = vpop.f32.mrb[4].mxu0 }
 0x220   : > { %v1396_v4 = vadd.f32 %v1395_v3, %v1312_v2  ;;  %v4997_v5 = vpop.f32.mrb[5].mxu0 }
 0x221   : > { %v1398_v6 = vpop.f32.mrb[6].mxu0 }
 0x222   : > { %1401 = vst [vmem:[#allocation3] sm:$0x1] %v1396_v4  ;;  %v4998_v7 = vpop.f32.mrb[7].mxu0 }
 0x223 PF: > { %v1402_v8 = vld [vmem:[#allocation2] sm:$0xff]  ;;  %v1404_v9 = vld [vmem:[#allocation2 + $0x10] sm:$0xff]  ;;  %v1403_v10 = vld [vmem:[#allocation2 + $0x8] sm:$0xff]  ;;  %s6788_s7 = sld [smem:[#allocation22_spill]]  ;;  %v1488_v53 = vlaneseq  ;;  %s6790_s6 = sld [smem:[#allocation20_spill]]  ;;  %vm2076_vm1 = vcmask 523264  }
 0x224   : > { %1442 = vadd.xlane.f32.xlu0 %v1402_v8  ;;  %1446 = vadd.xlane.f32.xlu1 %v1404_v9  ;;  %v1405_v11 = vld [vmem:[#allocation2 + $0x18] sm:$0xff]  ;;  %v5465_v12 = vld [vmem:[%s5936_s1] sm:$0xff]   ;;  %v5467_v30 = vld [vmem:[%s5936_s1 + $0x8] sm:$0xff]   ;;  %s6791_s18 = sld [smem:[#allocation21_spill]]  ;;  %vm2142_vm2 = vcmask 261120   ;;  %s5764_s11 = smov 64  }
 0x225   : > { %v5466_v13 = vld [vmem:[%s5936_s1 + $0x40] sm:$0xff]   ;;  %4999 = vmatprep.subr.bf16.mxu0 %v5465_v12  ;;  %v5468_v31 = vld [vmem:[%s5936_s1 + $0x48] sm:$0xff]   ;;  %v5469_v32 = vld [vmem:[%s5936_s1 + $0x10] sm:$0xff]   ;;  %v6143_v62 = vshrl.u32 %v1488_v53, 7  ;;  %s6792_s28 = sld [smem:[#allocation19_spill]]  ;;  %vm5766_vm3 = vmmov 0  }
 0x226   : > { %5019 = vmatprep.subr.bf16.mxu1 %v5466_v13  ;;  %5000 = vmatpush3.bf16.msra.mxu0 %v5465_v12  ;;  %v5470_v33 = vld [vmem:[%s5936_s1 + $0x50] sm:$0xff]   ;;  %v5471_v34 = vld [vmem:[%s5936_s1 + $0x18] sm:$0xff]   ;;  %v5473_v36 = vld [vmem:[%s5936_s1 + $0x20] sm:$0xff]   ;;  %vm3102_vm4 = vcmask 130048   ;;  %p4710_p5 = scmp.ne.s32.totalorder %s5918_s4, 1 }
 0x227   : > { %5020 = vmatpush3.bf16.msra.mxu1 %v5466_v13  ;;  %5001 = vmatprep.subr.bf16.mxu0 %v5467_v30  ;;  %v5472_v35 = vld [vmem:[%s5936_s1 + $0x58] sm:$0xff]   ;;  %v5474_v37 = vld [vmem:[%s5936_s1 + $0x60] sm:$0xff]   ;;  %v5475_v38 = vld [vmem:[%s5936_s1 + $0x28] sm:$0xff]   ;;  %v6149_v2 = vsub.s32 1, %v6143_v62  ;;  %v6155_v6 = vsub.s32 0, %v6143_v62 }
 0x228   : > { %1444 = vadd.xlane.f32.xlu0 %v1403_v10  ;;  %1448 = vadd.xlane.f32.xlu1 %v1405_v11  ;;  %v5476_v39 = vld [vmem:[%s5936_s1 + $0x68] sm:$0xff]   ;;  %v5477_v40 = vld [vmem:[%s5936_s1 + $0x30] sm:$0xff]   ;;  %v5479_v42 = vld [vmem:[%s5936_s1 + $0x38] sm:$0xff]  }
 0x229   : > { %5021 = vmatprep.subr.bf16.mxu1 %v5468_v31  ;;  %v5478_v41 = vld [vmem:[%s5936_s1 + $0x70] sm:$0xff]   ;;  %v5480_v43 = vld [vmem:[%s5936_s1 + $0x78] sm:$0xff]   ;;  %v5481_v44 = vld [vmem:[%s5936_s1 + $0x80] sm:$0xff]   ;;  %s6789_s16 = smov %s6788_s7 }
 0x22a   : > { %5002 = vmatpush3.bf16.msra.mxu0 %v5467_v30  ;;  %v1423_v45 = vld [vmem:[%s6788_s7] sm:$0xff]  ;;  %v1424_v46 = vld [vmem:[%s6789_s16 + $0x8] sm:$0xff]  ;;  %v5483_v30 = vld [vmem:[%s5936_s1 + $0x90] sm:$0xff]   ;;  %s6794_s7 = sld [smem:[#allocation32_spill]] (!%p4710_p5) }
 0x22b   : > { %5022 = vmatpush3.bf16.msra.mxu1 %v5468_v31  ;;  %5003 = vmatprep.subr.bf16.mxu0 %v5469_v32  ;;  %v6134_v47 = vpack.c.bf16 %v1424_v46, %v1423_v45  ;;  %v6137_v56 = vld [vmem:[#allocation3] ss:$0 sm:$0xff]  ;;  %v1436_v45 = vld [vmem:[%s6789_s16 + $0x68] sm:$0xff]  ;;  %v5487_v46 = vld [vmem:[%s5936_s1 + $0xb0] sm:$0xff]  }
 0x22c   : > { %5023 = vmatprep.subr.bf16.mxu1 %v5470_v33  ;;  %v1407_v57 = vld [vmem:[%s5931_s0] sm:$0x3f] }
 0x22d   : > { %v6141_v61 = vadd.f32 %v6137_v56, %v1407_v57 }
 0x22e   : > { %5004 = vmatpush3.bf16.msra.mxu0 %v5469_v32  ;;  %v1429_v32 = vld [vmem:[%s6789_s16 + $0x30] sm:$0xff] }
 0x22f   : > { %5024 = vmatpush3.bf16.msra.mxu1 %v5470_v33  ;;  %5005 = vmatprep.subr.bf16.mxu0 %v5471_v34  ;;  %v6146_v1 = vadd.f32 1.0, %v6141_v61  ;;  %v1430_v33 = vld [vmem:[%s6789_s16 + $0x38] sm:$0xff] }
 0x230   : > { %5025 = vmatprep.subr.bf16.mxu1 %v5472_v35 }
 0x231   : > { %v1491_v5 = vrot.slane %v6146_v1, %v6149_v2 }
 0x232   : > { %5006 = vmatpush3.bf16.msra.mxu0 %v5471_v34  ;;  %v5484_v34 = vld [vmem:[%s5936_s1 + $0x98] sm:$0xff]  }
 0x233   : > { %5026 = vmatpush3.bf16.msra.mxu1 %v5472_v35  ;;  %5007 = vmatprep.subr.bf16.mxu0 %v5473_v36  ;;  %v5331_v35 = vpack.c.bf16 %v1430_v33, %v1429_v32  ;;  %v1418_v32 = vld [vmem:[%s6790_s6 + $0x18] sm:$0xff] }
 0x234   : > { %5027 = vmatprep.subr.bf16.mxu1 %v5474_v37 }
 0x236   : > { %5008 = vmatpush3.bf16.msra.mxu0 %v5473_v36  ;;  %v1431_v36 = vld [vmem:[%s6789_s16 + $0x40] sm:$0xff] }
 0x237   : > { %5028 = vmatpush3.bf16.msra.mxu1 %v5474_v37  ;;  %5009 = vmatprep.subr.bf16.mxu0 %v5475_v38  ;;  %v1432_v37 = vld [vmem:[%s6789_s16 + $0x48] sm:$0xff] }
 0x238   : > { %5029 = vmatprep.subr.bf16.mxu1 %v5476_v39 }
 0x23a   : > { %5010 = vmatpush3.bf16.msra.mxu0 %v5475_v38  ;;  %v5485_v38 = vld [vmem:[%s5936_s1 + $0xa0] sm:$0xff]  }
 0x23b   : > { %5030 = vmatpush3.bf16.msra.mxu1 %v5476_v39  ;;  %5011 = vmatprep.subr.bf16.mxu0 %v5477_v40  ;;  %v5335_v39 = vpack.c.bf16 %v1432_v37, %v1431_v36 }
 0x23c   : > { %5031 = vmatprep.subr.bf16.mxu1 %v5478_v41 }
 0x23e   : > { %5012 = vmatpush3.bf16.msra.mxu0 %v5477_v40  ;;  %v1433_v40 = vld [vmem:[%s6789_s16 + $0x50] sm:$0xff] }
 0x23f   : > { %5032 = vmatpush3.bf16.msra.mxu1 %v5478_v41  ;;  %5013 = vmatprep.subr.bf16.mxu0 %v5479_v42  ;;  %v1434_v41 = vld [vmem:[%s6789_s16 + $0x58] sm:$0xff] }
 0x240   : > { %5033 = vmatprep.subr.bf16.mxu1 %v5480_v43 }
 0x242   : > { %5014 = vmatpush3.bf16.msra.mxu0 %v5479_v42  ;;  %v5486_v42 = vld [vmem:[%s5936_s1 + $0xa8] sm:$0xff]  }
 0x243   : > { %5034 = vmatpush3.bf16.msra.mxu1 %v5480_v43  ;;  %5039 = vmatprep.subr.bf16.mxu0 %v5481_v44  ;;  %v5339_v43 = vpack.c.bf16 %v1434_v41, %v1433_v40 }
 0x244   : > { %5320 = vmatprep.subr.bf16.mxu1 %v6134_v47 }
 0x2b1   : > { %v1443_v14 = vpop.xlane.xlu0 %1442  ;;  %v1447_v15 = vpop.xlane.xlu1 %1446 }
 0x2b2   : > { %v1451_v16 = vmul.f32 0.0078125, %v1443_v14  ;;  %v1453_v17 = vmul.f32 0.0078125, %v1447_v15 }
 0x2b4   : > { %v6097_v18 = vsub.f32 %v1402_v8, %v1451_v16  ;;  %v6099_v19 = vsub.f32 %v1404_v9, %v1453_v17 }
 0x2b5   : > { %v1445_v20 = vpop.xlane.xlu0 %1444  ;;  %v1449_v21 = vpop.xlane.xlu1 %1448 }
 0x2b6   : > { %v1452_v22 = vmul.f32 0.0078125, %v1445_v20  ;;  %v1459_v23 = vmul.f32 %v6097_v18, %v6097_v18  ;;  %v1454_v24 = vmul.f32 0.0078125, %v1449_v21  ;;  %v1461_v27 = vmul.f32 %v6099_v19, %v6099_v19 }
 0x2b8   : > { %v6103_v25 = vsub.f32 %v1403_v10, %v1452_v22  ;;  %1463 = vadd.xlane.f32.xlu0 %v1459_v23  ;;  %v6105_v26 = vsub.f32 %v1405_v11, %v1454_v24  ;;  %v1499_v11 = vrot.slane %v6141_v61, %v6155_v6  ;;  %v1425_v24 = vld [vmem:[%s6789_s16 + $0x10] sm:$0xff] }
 0x2ba   : > { %v1460_v28 = vmul.f32 %v6103_v25, %v6103_v25  ;;  %v1462_v29 = vmul.f32 %v6105_v26, %v6105_v26 }
 0x2bc   : > { %1467 = vadd.xlane.f32.xlu0 %v1461_v27  ;;  %1465 = vadd.xlane.f32.xlu1 %v1460_v28  ;;  %v5482_v27 = vld [vmem:[%s5936_s1 + $0x88] sm:$0xff]  }
 0x2c0   : > { %1469 = vadd.xlane.f32.xlu1 %v1462_v29  ;;  %v1428_v29 = vld [vmem:[%s6789_s16 + $0x28] sm:$0xff] }
 0x345   : > { %v1464_v48 = vpop.xlane.xlu0 %1463 }
 0x346   : > { %v1471_v49 = vmul.f32 0.0078125, %v1464_v48 }
 0x348   : > { %v1475_v50 = vadd.f32 1e-06, %v1471_v49  ;;  %v5488_v49 = vld [vmem:[%s5936_s1 + $0xb8] sm:$0xff]  }
 0x349   : > { %v1466_v51 = vpop.xlane.xlu1 %1465  ;;  %v1468_v52 = vpop.xlane.xlu0 %1467 }
 0x34a   : > { %5570 = vrsqrt.f32 %v1475_v50  ;;  %v1472_v54 = vmul.f32 0.0078125, %v1466_v51  ;;  %v1473_v55 = vmul.f32 0.0078125, %v1468_v52  ;;  %v1437_v50 = vld [vmem:[%s6789_s16 + $0x70] sm:$0xff]  ;;  %v6215_v52 = vld [vmem:[%s5947_s25] sm:$0xf]  ;;  %s6795_s25 = smov (!%p4710_p5), %s6794_s7 }
 0x34b   : > { %v1525_v53 = vrot.slane %v6215_v52, %v6155_v6 }
 0x34c   : > { %v1476_v58 = vadd.f32 1e-06, %v1472_v54  ;;  %v1477_v59 = vadd.f32 1e-06, %v1473_v55  ;;  %v1643_v54 = vrot.slane %v6215_v52, %v6149_v2 }
 0x34d   : > { %v1470_v60 = vpop.xlane.xlu1 %1469 }
 0x34e   : > { %5572 = vrsqrt.f32 %v1476_v58  ;;  %v1474_v63 = vmul.f32 0.0078125, %v1470_v60 }
 0x34f   : > { %5574 = vrsqrt.f32 %v1477_v59 }
 0x350   : > { %v1478_v0 = vadd.f32 1e-06, %v1474_v63 }
 0x352   : > { %5576 = vrsqrt.f32 %v1478_v0 }
 0x354   : > { %v5571_v3 = vpop.eup %5570 }
 0x355   : > { %v1483_v4 = vmul.f32 %v5571_v3, %v6097_v18 }
 0x357   : > { %v1492_v10 = vmul.f32 %v1491_v5, %v1483_v4 }
 0x358   : > { %v5573_v7 = vpop.eup %5572 }
 0x359   : > { %v5575_v8 = vpop.eup %5574  ;;  %v1484_v9 = vmul.f32 %v5573_v7, %v6103_v25  ;;  %v1500_v15 = vadd.f32 %v1499_v11, %v1492_v10 }
 0x35a   : > { %v1485_v12 = vmul.f32 %v5575_v8, %v6099_v19  ;;  %v1426_v19 = vld [vmem:[%s6789_s16 + $0x18] sm:$0xff] }
 0x35b   : > { %v1493_v13 = vmul.f32 %v1491_v5, %v1484_v9  ;;  %v5323_v28 = vpack.c.bf16 %v1426_v19, %v1425_v24 }
 0x35c   : > { %v5577_v14 = vpop.eup %5576  ;;  %v1494_v18 = vmul.f32 %v1491_v5, %v1485_v12 }
 0x35d   : > { %v1501_v16 = vadd.f32 %v1499_v11, %v1493_v13  ;;  %v1486_v17 = vmul.f32 %v5577_v14, %v6105_v26  ;;  %v1427_v26 = vld [vmem:[%s6789_s16 + $0x20] sm:$0xff]  ;;  %v6222_v13 = vsub.s32 2, %v6143_v62 }
 0x35e   : > { %v1502_v22 = vadd.f32 %v1499_v11, %v1494_v18  ;;  %v5327_v31 = vpack.c.bf16 %v1428_v29, %v1427_v26  ;;  %v1419_v26 = vld [vmem:[%s6791_s18] sm:$0xff]  ;;  %v1417_v29 = vld [vmem:[%s6790_s6 + $0x10] sm:$0xff] }
 0x35f   : > { %v1504_v20 = vpack.c.bf16 %v1501_v16, %v1500_v15  ;;  %v1495_v21 = vmul.f32 %v1491_v5, %v1486_v17  ;;  %v1761_v14 = vrot.slane %v6215_v52, %v6222_v13 }
 0x361   : > { %5015 = vmatprep.mubr.bf16.mxu0 %v1504_v20  ;;  %5035 = vmatprep.mubr.bf16.mxu1 %v1504_v20  ;;  %v1503_v23 = vadd.f32 %v1499_v11, %v1495_v21 }
 0x363   : > { %v1505_v25 = vpack.c.bf16 %v1503_v23, %v1502_v22 }
 0x365   : > { %5016 = vmatmul.mubr.bf16.vlgmr.msra.gmra.mrb[0].mxu0 %v1505_v25  ;;  %5036 = vmatmul.mubr.bf16.vlgmr.msra.gmra.mrb[0].mxu1 %v1505_v25 }
 0x366   : > { %5040 = vmatpush3.bf16.msra.mxu0 %v5481_v44  ;;  %5055 = vmatprep.mubr.bf16.mxu0 %v1504_v20  ;;  %v1435_v44 = vld [vmem:[%s6789_s16 + $0x60] sm:$0xff] }
 0x367   : > { %5041 = vmatprep.subr.bf16.mxu0 %v5482_v27  ;;  %5322 = vmatpush3.bf16.msra.mxu1 %v6134_v47  ;;  %v5343_v48 = vpack.c.bf16 %v1436_v45, %v1435_v44 }
 0x368   : > { %5324 = vmatprep.subr.bf16.mxu1 %v5323_v28 }
 0x36a   : > { %5042 = vmatpush3.bf16.msra.mxu0 %v5482_v27  ;;  %v1420_v27 = vld [vmem:[%s6791_s18 + $0x8] sm:$0xff] }
 0x36b   : > { %5043 = vmatprep.subr.bf16.mxu0 %v5483_v30  ;;  %5326 = vmatpush3.bf16.msra.mxu1 %v5323_v28 }
 0x36c   : > { %5328 = vmatprep.subr.bf16.mxu1 %v5327_v31 }
 0x36e   : > { %5044 = vmatpush3.bf16.msra.mxu0 %v5483_v30 }
 0x36f   : > { %5045 = vmatprep.subr.bf16.mxu0 %v5484_v34  ;;  %5330 = vmatpush3.bf16.msra.mxu1 %v5327_v31 }
 0x370   : > { %5332 = vmatprep.subr.bf16.mxu1 %v5331_v35 }
 0x372   : > { %5046 = vmatpush3.bf16.msra.mxu0 %v5484_v34 }
 0x373   : > { %5047 = vmatprep.subr.bf16.mxu0 %v5485_v38  ;;  %5334 = vmatpush3.bf16.msra.mxu1 %v5331_v35 }
 0x374   : > { %5336 = vmatprep.subr.bf16.mxu1 %v5335_v39 }
 0x376   : > { %5048 = vmatpush3.bf16.msra.mxu0 %v5485_v38 }
 0x377   : > { %5049 = vmatprep.subr.bf16.mxu0 %v5486_v42  ;;  %5338 = vmatpush3.bf16.msra.mxu1 %v5335_v39 }
 0x378   : > { %5340 = vmatprep.subr.bf16.mxu1 %v5339_v43 }
 0x37a   : > { %5050 = vmatpush3.bf16.msra.mxu0 %v5486_v42 }
 0x37b   : > { %5051 = vmatprep.subr.bf16.mxu0 %v5487_v46  ;;  %5342 = vmatpush3.bf16.msra.mxu1 %v5339_v43 }
 0x37c   : > { %5344 = vmatprep.subr.bf16.mxu1 %v5343_v48 }
 0x37e   : > { %5052 = vmatpush3.bf16.msra.mxu0 %v5487_v46 }
 0x37f   : > { %5053 = vmatprep.subr.bf16.mxu0 %v5488_v49  ;;  %5346 = vmatpush3.bf16.msra.mxu1 %v5343_v48 }
 0x382   : > { %5054 = vmatpush3.bf16.msra.mxu0 %v5488_v49 }
 0x383   : > { %5352 = vmatprep.subr.bf16.mxu0 %v6134_v47 }
 0x385   : > { %5056 = vmatmul.mubr.bf16.vlgmr.msra.gmra.mrb[4].mxu0 %v1505_v25  ;;  %v1416_v25 = vld [vmem:[%s6790_s6 + $0x8] sm:$0xff] }
 0x386   : > { %5354 = vmatpush3.bf16.msra.mxu0 %v6134_v47  ;;  %v1438_v47 = vld [vmem:[%s6789_s16 + $0x78] sm:$0xff] }
 0x387   : > { %5356 = vmatprep.subr.bf16.mxu0 %v5323_v28  ;;  %v5347_v51 = vpack.c.bf16 %v1438_v47, %v1437_v50 }
 0x389   : > { %5348 = vmatprep.subr.bf16.mxu1 %v5347_v51 }
 0x38a   : > { %5358 = vmatpush3.bf16.msra.mxu0 %v5323_v28  ;;  %5350 = vmatpush3.bf16.msra.mxu1 %v5347_v51  ;;  %v1415_v28 = vld [vmem:[%s6790_s6] sm:$0xff] }
 0x38b   : > { %5360 = vmatprep.subr.bf16.mxu0 %v5327_v31 }
 0x38e   : > { %5362 = vmatpush3.bf16.msra.mxu0 %v5327_v31 }
 0x38f   : > { %5364 = vmatprep.subr.bf16.mxu0 %v5331_v35 }
 0x392   : > { %5366 = vmatpush3.bf16.msra.mxu0 %v5331_v35 }
 0x393   : > { %5368 = vmatprep.subr.bf16.mxu0 %v5335_v39 }
 0x396   : > { %5370 = vmatpush3.bf16.msra.mxu0 %v5335_v39 }
 0x397   : > { %5372 = vmatprep.subr.bf16.mxu0 %v5339_v43 }
 0x39a   : > { %5374 = vmatpush3.bf16.msra.mxu0 %v5339_v43  ;;  %v1422_v43 = vld [vmem:[%s6791_s18 + $0x18] sm:$0xff] }
 0x39b   : > { %5376 = vmatprep.subr.bf16.mxu0 %v5343_v48 }
 0x39e   : > { %5378 = vmatpush3.bf16.msra.mxu0 %v5343_v48  ;;  %v1421_v48 = vld [vmem:[%s6791_s18 + $0x10] sm:$0xff] }
 0x39f   : > { %5380 = vmatprep.subr.bf16.mxu0 %v5347_v51 }
 0x3a2   : > { %5382 = vmatpush3.bf16.msra.mxu0 %v5347_v51 }
 0x438   : > { %v5017_v55 = vpop.f32.mrb[0].mxu0  ;;  %v5037_v57 = vpop.f32.mrb[0].mxu1 }
 0x439   : > { %v1608_v58 = vpop.f32.mrb[1].mxu0  ;;  %v1726_v59 = vpop.f32.mrb[1].mxu1  ;;  %v1617_v9 = vadd.f32 %v5017_v55, %v1525_v53  ;;  %v1735_v10 = vadd.f32 %v5037_v57, %v1643_v54 }
 0x43a   : > { %v1609_v60 = vadd.f32 %v1608_v58, %v1525_v53  ;;  %v1727_v63 = vadd.f32 %v1726_v59, %v1643_v54  ;;  %v5018_v0 = vpop.f32.mrb[2].mxu0  ;;  %v5038_v3 = vpop.f32.mrb[2].mxu1 }
 0x43b   : > { %v1611_v4 = vpop.f32.mrb[3].mxu0  ;;  %v1729_v5 = vpop.f32.mrb[3].mxu1  ;;  %v1620_v11 = vadd.f32 %v5018_v0, %v1525_v53  ;;  %v1738_v12 = vadd.f32 %v5038_v3, %v1643_v54  ;;  %v1861_v44 = vmul.f32 %v1617_v9, %v1417_v29  ;;  %v1958_v49 = vmul.f32 %v1735_v10, %v1417_v29 }
 0x43c   : > { %v1612_v7 = vadd.f32 %v1611_v4, %v1525_v53  ;;  %v1730_v8 = vadd.f32 %v1729_v5, %v1643_v54  ;;  %5091 = vmatprep.mubr.f32.mxu1 %v1609_v60  ;;  %5129 = vmatprep.mubr.f32.mxu0 %v1727_v63  ;;  %v1859_v39 = vmul.f32 %v1609_v60, %v1415_v28 }
 0x43d   : > { %v1956_v40 = vmul.f32 %v1727_v63, %v1415_v28  ;;  %v1862_v50 = vmul.f32 %v1620_v11, %v1418_v32  ;;  %v1959_v55 = vmul.f32 %v1738_v12, %v1418_v32 }
 0x43e   : > { %5092 = vmatmul.mubr.f32.vlgmr.msra.gmra.mrb[4].mxu1 %v1612_v7  ;;  %5130 = vmatmul.mubr.f32.vlgmr.msra.gmra.mrb[8].mxu0 %v1730_v8  ;;  %v1860_v33 = vmul.f32 %v1612_v7, %v1416_v25  ;;  %v1957_v34 = vmul.f32 %v1730_v8, %v1416_v25 }
 0x43f   : > { %5094 = vmatprep.mubr.f32.mxu1 %v1617_v9  ;;  %5132 = vmatprep.mubr.f32.mxu0 %v1735_v10 }
 0x442   : > { %5095 = vmatmul.mubr.f32.gmra.mrb[6].mxu1 %v1620_v11  ;;  %5133 = vmatmul.mubr.f32.gmra.mrb[10].mxu0 %v1738_v12 }
 0x458   : > { %v5057_v15 = vpop.f32.mrb[4].mxu0 }
 0x459   : > { %v1844_v16 = vpop.f32.mrb[5].mxu0  ;;  %v1853_v18 = vadd.f32 %v5057_v15, %v1761_v14 }
 0x45a   : > { %v5058_v17 = vpop.f32.mrb[6].mxu0  ;;  %v1845_v22 = vadd.f32 %v1844_v16, %v1761_v14 }
 0x45b   : > { %v1856_v20 = vadd.f32 %v5058_v17, %v1761_v14  ;;  %v1847_v21 = vpop.f32.mrb[7].mxu0 }
 0x45c   : > { %v1848_v23 = vadd.f32 %v1847_v21, %v1761_v14 }
 0x45d   : > { %v6226_v24 = vpack.c.bf16 %v1856_v20, %v1853_v18 }
 0x45e   : > { %v6228_v19 = vpack.c.bf16 %v1848_v23, %v1845_v22 }
 0x511   : > { %v5093_v30 = vpop.f32.mrb[4].mxu1  ;;  %v5131_v31 = vpop.f32.mrb[8].mxu0 }
 0x512   : > { %v1949_v35 = vmul.f32 %v5093_v30, %v1420_v27  ;;  %v2046_v36 = vmul.f32 %v5131_v31, %v1420_v27  ;;  %v1929_v37 = vpop.f32.mrb[5].mxu1  ;;  %v2026_v38 = vpop.f32.mrb[9].mxu0 }
 0x513   : > { %v1948_v41 = vmul.f32 %v1929_v37, %v1419_v26  ;;  %v2045_v42 = vmul.f32 %v2026_v38, %v1419_v26 }
 0x514   : > { %v1953_v45 = vadd.f32 %v1949_v35, %v1860_v33  ;;  %v2050_v46 = vadd.f32 %v2046_v36, %v1957_v34 }
 0x515   : > { %v1952_v47 = vadd.f32 %v1948_v41, %v1859_v39  ;;  %v2049_v51 = vadd.f32 %v2045_v42, %v1956_v40  ;;  %v5096_v53 = vpop.f32.mrb[6].mxu1  ;;  %v5134_v54 = vpop.f32.mrb[10].mxu0 }
 0x516   : > { %v1951_v57 = vmul.f32 %v5096_v53, %v1422_v43  ;;  %v2048_v58 = vmul.f32 %v5134_v54, %v1422_v43  ;;  %v1939_v59 = vpop.f32.mrb[7].mxu1  ;;  %v2036_v60 = vpop.f32.mrb[11].mxu0 }
 0x517   : > { %v2070_v63 = vpack.c.bf16 %v1953_v45, %v1952_v47  ;;  %v2072_v0 = vpack.c.bf16 %v2050_v46, %v2049_v51  ;;  %v1950_v3 = vmul.f32 %v1939_v59, %v1421_v48  ;;  %v2047_v4 = vmul.f32 %v2036_v60, %v1421_v48 }
 0x518   : > { %v1955_v5 = vadd.f32 %v1951_v57, %v1862_v50  ;;  %v2052_v7 = vadd.f32 %v2048_v58, %v1959_v55 }
 0x519   : > { %v1954_v8 = vadd.f32 %v1950_v3, %v1861_v44  ;;  %v2051_v9 = vadd.f32 %v2047_v4, %v1958_v49  ;;  %5391 = vmatprep.subr.msk.bf16.mxu1 %vm2076_vm1, %v2072_v0  ;;  %5139 = vmatprep.mubr.msk.bf16.mxu1 %vm2076_vm1, %v2070_v63  ;;  %v2084_v10 = vsel %vm2076_vm1, %v2072_v0, 0 }
 0x51a   : > { %5136 = vmatpush3.bf16.xpose.msra.mxu1 %v2084_v10 }
 0x51b   : > { %v2071_v11 = vpack.c.bf16 %v1955_v5, %v1954_v8  ;;  %v2073_v12 = vpack.c.bf16 %v2052_v7, %v2051_v9 }
 0x51d   : > { %5392 = vmatprep.subr.msk.bf16.mxu1 %vm2076_vm1, %v2073_v12  ;;  %v2087_v14 = vsel %vm2076_vm1, %v2073_v12, 0 }
 0x522   : > { %5138 = vmatpush3.bf16.xpose.msra.mxu1 %v2087_v14 }
 0x523   : > { %5143 = vmatprep.subr.bf16.mxu1 %v6228_v19 }
 0x529   : > { %5140 = vmatmul.mubr.msk.bf16.vlgmr.msra.gmra.mrb[8].mxu1 %vm2076_vm1, %v2071_v11 }
 0x52a   : > { %5144 = vmatpush3.bf16.msra.mxu1 %v6228_v19 }
 0x52b   : > { %5145 = vmatprep.subr.bf16.mxu1 %v6226_v24 }
 0x52e   : > { %5146 = vmatpush3.bf16.msra.mxu1 %v6226_v24 }
 0x5fc   : > { %v5141_v15 = vpop.f32.mrb[8].mxu1 }
 0x5fd   : > { %v2140_v16 = vmul.f32 0.125, %v5141_v15  ;;  %v2123_v17 = vpop.f32.mrb[9].mxu1 }
 0x5fe   : > { %v5142_v18 = vpop.f32.mrb[10].mxu1  ;;  %v2138_v20 = vmul.f32 0.125, %v2123_v17 }
 0x5ff   : > { %v2126_v21 = vpop.f32.mrb[11].mxu1  ;;  %v2149_v22 = vsel %vm2142_vm2, %v2140_v16, -inf  ;;  %v2141_v25 = vmul.f32 0.125, %v5142_v18 }
 0x600   : > { %v2139_v23 = vmul.f32 0.125, %v2126_v21  ;;  %2150 = vmax.xlane.f32.xlu0 %v2149_v22  ;;  %v2143_v28 = vsel %vm2142_vm2, %v2138_v20, -inf }
 0x601   : > { %v2152_v26 = vsel %vm2142_vm2, %v2141_v25, -inf }
 0x602   : > { %v2146_v27 = vsel %vm2142_vm2, %v2139_v23, -inf }
 0x603   : > { %2147 = vmax.xlane.f32.xlu1 %v2146_v27 }
 0x604   : > { %2144 = vmax.xlane.f32.xlu0 %v2143_v28 }
 0x607   : > { %2153 = vmax.xlane.f32.xlu1 %v2152_v26 }
 0x618   : > { %2256 = vrot.lane.b32.xlu1 %v2073_v12, %s5764_s11 }
 0x61a   : > { %2254 = vrot.lane.b32.xlu0 %v2072_v0, %s5764_s11 }
 0x61c   : > { %2248 = vrot.lane.b32.xlu1 %v2070_v63, %s5764_s11 }
 0x620   : > { %2250 = vrot.lane.b32.xlu1 %v2071_v11, %s5764_s11 }
 0x68d   : > { %v2151_v29 = vpop.xlane.xlu0 %2150 }
 0x68e   : > { %v2157_v30 = vsub.f32 %v2140_v16, %v2151_v29 }
 0x690   : > { %v2148_v31 = vpop.xlane.xlu1 %2147  ;;  %v2163_v36 = vmul.f32 1.442695, %v2157_v30 }
 0x691   : > { %v2156_v32 = vsub.f32 %v2139_v23, %v2148_v31  ;;  %v2145_v33 = vpop.xlane.xlu0 %2144  ;;  %v5489_v31 = vld [vmem:[%s5936_s1 + $0xc0] sm:$0xff]  }
 0x692   : > { %v2155_v34 = vsub.f32 %v2138_v20, %v2145_v33 }
 0x693   : > { %v2161_v35 = vmul.f32 1.442695, %v2156_v32 }
 0x694   : > { %v2159_v37 = vmul.f32 1.442695, %v2155_v34  ;;  %v2154_v38 = vpop.xlane.xlu1 %2153 }
 0x695   : > { %5578 = vpow2.f32 %v2161_v35  ;;  %v2158_v39 = vsub.f32 %v2141_v25, %v2154_v38  ;;  %v2255_v40 = vpop.permute.xlu0 %2254 }
 0x696   : > { %5580 = vpow2.f32 %v2159_v37  ;;  %5393 = vmatprep.subr.msk.bf16.mxu1 %vm2076_vm1, %v2255_v40  ;;  %v2265_v50 = vsel %vm2076_vm1, %v2255_v40, 0 }
 0x697   : > { %v2165_v41 = vmul.f32 1.442695, %v2158_v39  ;;  %5582 = vpow2.f32 %v2163_v36 }
 0x698   : > { %v2257_v44 = vpop.permute.xlu1 %2256 }
 0x699   : > { %5584 = vpow2.f32 %v2165_v41  ;;  %v2268_v51 = vsel %vm2076_vm1, %v2257_v44, 0 }
 0x69c   : > { %v2249_v47 = vpop.permute.xlu1 %2248 }
 0x69f   : > { %v5579_v42 = vpop.eup %5578 }
 0x6a0   : > { %v5581_v43 = vpop.eup %5580  ;;  %v2251_v53 = vpop.permute.xlu1 %2250  ;;  %v2170_v15 = vsel %vm2142_vm2, %v5579_v42, 0.0 }
 0x6a1   : > { %v2179_v45 = vpack.c.bf16 %v5579_v42, %v5581_v43  ;;  %v5583_v46 = vpop.eup %5582  ;;  %v2167_v12 = vsel %vm2142_vm2, %v5581_v43, 0.0  ;;  %v5490_v42 = vld [vmem:[%s5936_s1 + $0xc8] sm:$0xff]   ;;  %v5491_v43 = vld [vmem:[%s5936_s1 + $0xd0] sm:$0xff]  }
 0x6a2   : > { %v2173_v16 = vsel %vm2142_vm2, %v5583_v46, 0.0 }
 0x6a3   : > { %v5585_v48 = vpop.eup %5584  ;;  %5147 = vmatprep.mubr.msk.bf16.mxu1 %vm2142_vm2, %v2179_v45  ;;  %v5493_v45 = vld [vmem:[%s5936_s1 + $0xe0] sm:$0xff]  }
 0x6a4   : > { %v2180_v49 = vpack.c.bf16 %v5585_v48, %v5583_v46  ;;  %v2176_v14 = vsel %vm2142_vm2, %v5585_v48, 0.0  ;;  %v5494_v46 = vld [vmem:[%s5936_s1 + $0xe8] sm:$0xff]  }
 0x6a6   : > { %5148 = vmatmul.mubr.msk.bf16.vlgmr.msra.gmra.mrb[12].mxu1 %vm2142_vm2, %v2180_v49 }
 0x6a7   : > { %5152 = vmatpush3.bf16.xpose.msra.mxu1 %v2265_v50  ;;  %5155 = vmatprep.mubr.msk.bf16.mxu1 %vm2076_vm1, %v2249_v47 }
 0x6a8   : > { %5394 = vmatprep.subr.msk.bf16.mxu1 %vm2076_vm1, %v2257_v44  ;;  %v5492_v44 = vld [vmem:[%s5936_s1 + $0xd8] sm:$0xff]  }
 0x6af   : > { %5154 = vmatpush3.bf16.xpose.msra.mxu1 %v2268_v51 }
 0x6b0   : > { %5167 = vmatprep.subr.bf16.mxu1 %v5493_v45 }
 0x6b6   : > { %5156 = vmatmul.mubr.msk.bf16.vlgmr.msra.gmra.mrb[16].mxu1 %vm2076_vm1, %v2251_v53 }
 0x6b7   : > { %5168 = vmatpush3.bf16.msra.mxu1 %v5493_v45 }
 0x6b8   : > { %5169 = vmatprep.subr.bf16.mxu1 %v5494_v46 }
 0x6bb   : > { %5170 = vmatpush3.bf16.msra.mxu1 %v5494_v46 }
 0x779   : > { %v6280_v54 = vpop.f32.mrb[12].mxu1 }
 0x77a   : > { %v6282_v55 = vpop.f32.mrb[13].mxu1 }
 0x77b   : > { %v6284_v57 = vpop.f32.mrb[14].mxu1 }
 0x77c   : > { %v6286_v58 = vpop.f32.mrb[15].mxu1 }
 0x789   : > { %v5157_v59 = vpop.f32.mrb[16].mxu1 }
 0x78a   : > { %v2321_v60 = vmul.f32 0.125, %v5157_v59  ;;  %v2304_v63 = vpop.f32.mrb[17].mxu1 }
 0x78b   : > { %v5158_v0 = vpop.f32.mrb[18].mxu1  ;;  %v2319_v3 = vmul.f32 0.125, %v2304_v63 }
 0x78c   : > { %v2307_v4 = vpop.f32.mrb[19].mxu1  ;;  %v2329_v5 = vsel %vm2142_vm2, %v2321_v60, -inf  ;;  %v2322_v9 = vmul.f32 0.125, %v5158_v0 }
 0x78d   : > { %v2320_v7 = vmul.f32 0.125, %v2307_v4  ;;  %2330 = vmax.xlane.f32.xlu0 %v2329_v5  ;;  %v2323_v10 = vsel %vm2142_vm2, %v2319_v3, -inf }
 0x78e   : > { %v2332_v11 = vsel %vm2142_vm2, %v2322_v9, -inf }
 0x78f   : > { %v2326_v8 = vsel %vm2142_vm2, %v2320_v7, -inf }
 0x790   : > { %2327 = vmax.xlane.f32.xlu1 %v2326_v8  ;;  %v5495_v8 = vld [vmem:[%s5936_s1 + $0xf0] sm:$0xff]  }
 0x791   : > { %2324 = vmax.xlane.f32.xlu0 %v2323_v10  ;;  %5171 = vmatprep.subr.bf16.mxu1 %v5495_v8 }
 0x792   : > { %5172 = vmatpush3.bf16.msra.mxu1 %v5495_v8 }
 0x795   : > { %2333 = vmax.xlane.f32.xlu0 %v2332_v11 }
 0x7a1   : > { %2365 = vrot.lane.b32.xlu1 %v6226_v24, %s5764_s11 }
 0x7ab   : > { %2363 = vrot.lane.b32.xlu0 %v6228_v19, %s5764_s11 }
 0x7c5   : > { %2168 = vadd.xlane.f32.xlu1 %v2167_v12 }
 0x7c9   : > { %2177 = vadd.xlane.f32.xlu1 %v2176_v14 }
 0x7ca   : > { %2171 = vadd.xlane.f32.xlu0 %v2170_v15 }
 0x7ce   : > { %2174 = vadd.xlane.f32.xlu0 %v2173_v16 }
 0x81a   : > { %v2331_v17 = vpop.xlane.xlu0 %2330 }
 0x81b   : > { %v2337_v18 = vsub.f32 %v2321_v60, %v2331_v17 }
 0x81d   : > { %v2328_v20 = vpop.xlane.xlu1 %2327  ;;  %v2343_v23 = vmul.f32 1.442695, %v2337_v18 }
 0x81e   : > { %v2336_v21 = vsub.f32 %v2320_v7, %v2328_v20  ;;  %v2325_v24 = vpop.xlane.xlu0 %2324 }
 0x81f   : > { %v2335_v22 = vsub.f32 %v2319_v3, %v2325_v24 }
 0x820   : > { %v2341_v19 = vmul.f32 1.442695, %v2336_v21 }
 0x821   : > { %v2339_v25 = vmul.f32 1.442695, %v2335_v22  ;;  %v2366_v30 = vpop.permute.xlu1 %2365 }
 0x822   : > { %5586 = vpow2.f32 %v2341_v19  ;;  %v2334_v27 = vpop.xlane.xlu0 %2333 }
 0x823   : > { %5588 = vpow2.f32 %v2339_v25  ;;  %v2338_v28 = vsub.f32 %v2322_v9, %v2334_v27  ;;  %v5496_v9 = vld [vmem:[%s5936_s1 + $0xf8] sm:$0xff]  }
 0x824   : > { %5590 = vpow2.f32 %v2343_v23  ;;  %5173 = vmatprep.subr.bf16.mxu1 %v5496_v9 }
 0x825   : > { %v2345_v26 = vmul.f32 1.442695, %v2338_v28  ;;  %5174 = vmatpush3.bf16.msra.mxu1 %v5496_v9 }
 0x826   : > { %v2364_v29 = vpop.permute.xlu0 %2363 }
 0x827   : > { %5592 = vpow2.f32 %v2345_v26  ;;  %5159 = vmatprep.subr.bf16.mxu0 %v2364_v29 }
 0x828   : > { %5160 = vmatpush3.bf16.msra.mxu0 %v2364_v29  ;;  %v6323_v29 = vsub.s32 3, %v6143_v62 }
 0x829   : > { %5161 = vmatprep.subr.bf16.mxu0 %v2366_v30 }
 0x82c   : > { %v5587_v32 = vpop.eup %5586  ;;  %5162 = vmatpush3.bf16.msra.mxu0 %v2366_v30 }
 0x82d   : > { %v5589_v33 = vpop.eup %5588  ;;  %v2350_v34 = vsel %vm2142_vm2, %v5587_v32, 0.0  ;;  %5179 = vmatprep.subr.bf16.mxu0 %v5489_v31 }
 0x82e   : > { %2351 = vadd.xlane.f32.xlu1 %v2350_v34  ;;  %v2347_v35 = vsel %vm2142_vm2, %v5589_v33, 0.0  ;;  %v2359_v36 = vpack.c.bf16 %v5587_v32, %v5589_v33  ;;  %v5591_v37 = vpop.eup %5590  ;;  %v2603_v34 = vrot.slane %v6141_v61, %v6222_v13 }
 0x82f   : > { %2348 = vadd.xlane.f32.xlu0 %v2347_v35  ;;  %v2353_v40 = vsel %vm2142_vm2, %v5591_v37, 0.0 }
 0x830   : > { %5163 = vmatprep.mubr.msk.bf16.mxu0 %vm2142_vm2, %v2359_v36 }
 0x831   : > { %v5593_v38 = vpop.eup %5592 }
 0x832   : > { %v2360_v39 = vpack.c.bf16 %v5593_v38, %v5591_v37  ;;  %v2356_v41 = vsel %vm2142_vm2, %v5593_v38, 0.0 }
 0x833   : > { %2354 = vadd.xlane.f32.xlu0 %v2353_v40  ;;  %2357 = vadd.xlane.f32.xlu1 %v2356_v41 }
 0x834   : > { %5164 = vmatmul.mubr.msk.bf16.vlgmr.msra.gmra.mrb[12].mxu0 %vm2142_vm2, %v2360_v39 }
 0x835   : > { %5180 = vmatpush3.bf16.msra.mxu0 %v5489_v31  ;;  %v2595_v31 = vrot.slane %v6215_v52, %v6323_v29  ;;  %v5674_v52 = vld [vmem:[#allocation2] sm:$0xff] }
 0x836   : > { %5181 = vmatprep.subr.bf16.mxu0 %v5490_v42 }
 0x839   : > { %5182 = vmatpush3.bf16.msra.mxu0 %v5490_v42 }
 0x83a   : > { %5183 = vmatprep.subr.bf16.mxu0 %v5491_v43 }
 0x83d   : > { %5184 = vmatpush3.bf16.msra.mxu0 %v5491_v43 }
 0x83e   : > { %5185 = vmatprep.subr.bf16.mxu0 %v5492_v44 }
 0x841   : > { %5186 = vmatpush3.bf16.msra.mxu0 %v5492_v44 }
 0x852   : > { %v2169_v48 = vpop.xlane.xlu1 %2168 }
 0x853   : > { %5594 = vrcp.f32 %v2169_v48 }
 0x856   : > { %v2178_v49 = vpop.xlane.xlu1 %2177 }
 0x857   : > { %v2172_v50 = vpop.xlane.xlu0 %2171 }
 0x858   : > { %5596 = vrcp.f32 %v2172_v50  ;;  %v5675_v50 = vld [vmem:[#allocation2 + $0x8] sm:$0xff] }
 0x859   : > { %5598 = vrcp.f32 %v2178_v49 }
 0x85b   : > { %v2175_v47 = vpop.xlane.xlu0 %2174 }
 0x85c   : > { %5600 = vrcp.f32 %v2175_v47 }
 0x85d   : > { %v5595_v51 = vpop.eup %5594 }
 0x85e   : > { %v2240_v59 = vmul.f32 %v5595_v51, %v6282_v55  ;;  %v5676_v51 = vld [vmem:[#allocation2 + $0x10] sm:$0xff] }
 0x862   : > { %v5597_v53 = vpop.eup %5596 }
 0x863   : > { %v2241_v60 = vmul.f32 %v5597_v53, %v6286_v58  ;;  %v5599_v63 = vpop.eup %5598 }
 0x864   : > { %v2243_v4 = vmul.f32 %v5599_v63, %v6284_v57  ;;  %v5497_v63 = vld [vmem:[%s5942_s3 + $0x40] sm:$0xff]  }
 0x865   : > { %v2244_v0 = vpack.c.bf16 %v2241_v60, %v2240_v59  ;;  %v5677_v59 = vld [vmem:[#allocation2 + $0x18] sm:$0xff] }
 0x866   : > { %v5601_v3 = vpop.eup %5600 }
 0x867   : > { %v2242_v5 = vmul.f32 %v5601_v3, %v6280_v54  ;;  %5187 = vmatprep.mubr.msk.bf16.mxu0 %vm2076_vm1, %v2244_v0  ;;  %v5499_v0 = vld [vmem:[%s5942_s3] sm:$0xff]   ;;  %v5765_v3 = vmov 0.0  }
 0x868   : > { %5211 = vmatprep.subr.bf16.mxu0 %v5765_v3  ;;  %5191 = vmatprep.subr.bf16.mxu1 %v5499_v0 }
 0x869   : > { %v2245_v7 = vpack.c.bf16 %v2243_v4, %v2242_v5  ;;  %v5498_v4 = vld [vmem:[%s5942_s3 + $0x48] sm:$0xff]   ;;  %v5500_v5 = vld [vmem:[%s5942_s3 + $0x50] sm:$0xff]  }
 0x86b   : > { %5188 = vmatmul.mubr.msk.bf16.vlgmr.msra.gmra.mrb[16].mxu0 %vm2076_vm1, %v2245_v7 }
 0x86c   : > { %5212 = vmatpush3.bf16.msra.mxu0 %v5497_v63  ;;  %5227 = vmatprep.mubr.msk.bf16.mxu0 %vm5766_vm3, %v5765_v3 }
 0x86d   : > { %5213 = vmatprep.subr.bf16.mxu0 %v5765_v3 }
 0x870   : > { %5214 = vmatpush3.bf16.msra.mxu0 %v5498_v4 }
 0x871   : > { %5215 = vmatprep.subr.bf16.mxu0 %v5765_v3 }
 0x874   : > { %5216 = vmatpush3.bf16.msra.mxu0 %v5500_v5 }
 0x875   : > { %5217 = vmatprep.subr.bf16.mxu0 %v5765_v3 }
 0x8bb   : > { %v2352_v58 = vpop.xlane.xlu1 %2351 }
 0x8bc   : > { %v2349_v55 = vpop.xlane.xlu0 %2348  ;;  %5602 = vrcp.f32 %v2352_v58 }
 0x8c0   : > { %v2355_v10 = vpop.xlane.xlu0 %2354  ;;  %v2358_v11 = vpop.xlane.xlu1 %2357 }
 0x8c1   : > { %5604 = vrcp.f32 %v2355_v10 }
 0x8c2   : > { %5606 = vrcp.f32 %v2358_v11 }
 0x8c3   : > { %5608 = vrcp.f32 %v2349_v55 }
 0x8c6   : > { %v5603_v54 = vpop.eup %5602 }
 0x8cb   : > { %v5605_v12 = vpop.eup %5604 }
 0x8cc   : > { %v5607_v15 = vpop.eup %5606 }
 0x8cd   : > { %v5609_v17 = vpop.eup %5608 }
 0x907   : > { %v5165_v57 = vpop.f32.mrb[12].mxu0 }
 0x908   : > { %v2409_v14 = vpop.f32.mrb[13].mxu0  ;;  %v2430_v18 = vmul.f32 %v5605_v12, %v5165_v57 }
 0x909   : > { %v5166_v16 = vpop.f32.mrb[14].mxu0  ;;  %v2428_v24 = vmul.f32 %v5609_v17, %v2409_v14 }
 0x90a   : > { %v2431_v20 = vmul.f32 %v5607_v15, %v5166_v16  ;;  %v2412_v21 = vpop.f32.mrb[15].mxu0 }
 0x90b   : > { %v2429_v22 = vmul.f32 %v5603_v54, %v2412_v21  ;;  %v5501_v21 = vld [vmem:[%s5942_s3 + $0x8] sm:$0xff]  }
 0x90c   : > { %v2433_v19 = vpack.c.bf16 %v2431_v20, %v2430_v18 }
 0x90d   : > { %v2432_v23 = vpack.c.bf16 %v2429_v22, %v2428_v24  ;;  %v5502_v24 = vld [vmem:[%s5942_s3 + $0x58] sm:$0xff]   ;;  %v5503_v22 = vld [vmem:[%s5942_s3 + $0x10] sm:$0xff]  }
 0x90e   : > { %5218 = vmatpush3.bf16.msra.mxu0 %v5502_v24 }
 0x90f   : > { %5175 = vmatprep.mubr.msk.bf16.mxu1 %vm2076_vm1, %v2432_v23  ;;  %5219 = vmatprep.subr.bf16.mxu0 %v5765_v3  ;;  %v5505_v23 = vld [vmem:[%s5942_s3 + $0x18] sm:$0xff]  }
 0x910   : > { %5176 = vmatmul.mubr.msk.bf16.vlgmr.msra.gmra.mrb[20].mxu1 %vm2076_vm1, %v2433_v19  ;;  %v5504_v19 = vld [vmem:[%s5942_s3 + $0x60] sm:$0xff]  }
 0x911   : > { %5192 = vmatpush3.bf16.msra.mxu1 %v5499_v0 }
 0x912   : > { %5193 = vmatprep.subr.bf16.mxu1 %v5501_v21  ;;  %5220 = vmatpush3.bf16.msra.mxu0 %v5504_v19 }
 0x913   : > { %5221 = vmatprep.subr.bf16.mxu0 %v5765_v3 }
 0x915   : > { %5194 = vmatpush3.bf16.msra.mxu1 %v5501_v21 }
 0x916   : > { %5195 = vmatprep.subr.bf16.mxu1 %v5503_v22 }
 0x919   : > { %5196 = vmatpush3.bf16.msra.mxu1 %v5503_v22 }
 0x91a   : > { %5197 = vmatprep.subr.bf16.mxu1 %v5505_v23 }
 0x91d   : > { %5198 = vmatpush3.bf16.msra.mxu1 %v5505_v23 }
 0x93e   : > { %v5189_v25 = vpop.f32.mrb[16].mxu0 }
 0x93f   : > { %v2577_v27 = vpop.f32.mrb[17].mxu0 }
 0x940   : > { %v5190_v28 = vpop.f32.mrb[18].mxu0 }
 0x941   : > { %v2580_v26 = vpop.f32.mrb[19].mxu0 }
 0x9e3   : > { %v5177_v30 = vpop.f32.mrb[20].mxu1 }
 0x9e4   : > { %v2586_v32 = vadd.f32 %v5189_v25, %v5177_v30  ;;  %v2498_v33 = vpop.f32.mrb[21].mxu1  ;;  %v5506_v25 = vld [vmem:[%s5942_s3 + $0x68] sm:$0xff]   ;;  %v5510_v30 = vld [vmem:[%s5942_s3 + $0x78] sm:$0xff]  }
 0x9e5   : > { %v2578_v35 = vadd.f32 %v2577_v27, %v2498_v33  ;;  %v5178_v36 = vpop.f32.mrb[22].mxu1  ;;  %v5507_v27 = vld [vmem:[%s5942_s3 + $0x20] sm:$0xff]   ;;  %5222 = vmatpush3.bf16.msra.mxu0 %v5506_v25  ;;  %v5513_v33 = vld [vmem:[%s5942_s3 + $0x38] sm:$0xff]  }
 0x9e6   : > { %v2589_v37 = vadd.f32 %v5190_v28, %v5178_v36  ;;  %v2501_v38 = vpop.f32.mrb[23].mxu1  ;;  %v2598_v39 = vadd.f32 %v2595_v31, %v2586_v32  ;;  %5199 = vmatprep.subr.bf16.mxu1 %v5507_v27  ;;  %5223 = vmatprep.subr.bf16.mxu0 %v5765_v3  ;;  %v5508_v28 = vld [vmem:[%s5942_s3 + $0x70] sm:$0xff]   ;;  %v6387_v32 = vld [vmem:[%s6792_s28] sm:$0xff]  }
 0x9e7   : > { %v2596_v40 = vadd.f32 %v2595_v31, %v2578_v35  ;;  %v2581_v41 = vadd.f32 %v2580_v26, %v2501_v38  ;;  %5200 = vmatpush3.bf16.msra.mxu1 %v5507_v27  ;;  %v5509_v26 = vld [vmem:[%s5942_s3 + $0x28] sm:$0xff]   ;;  %v5514_v25 = vld [vmem:[%s5942_s3 + $0x80] sm:$0xff]  }
 0x9e8   : > { %v2599_v43 = vadd.f32 %v2595_v31, %v2589_v37  ;;  %v2606_v45 = vmul.f32 %v2603_v34, %v2598_v39  ;;  %5201 = vmatprep.subr.bf16.mxu1 %v5509_v26  ;;  %v5515_v27 = vld [vmem:[%s5942_s3 + $0x88] sm:$0xff]  }
 0x9e9   : > { %v2604_v42 = vmul.f32 %v2603_v34, %v2596_v40  ;;  %v2597_v44 = vadd.f32 %v2595_v31, %v2581_v41  ;;  %5224 = vmatpush3.bf16.msra.mxu0 %v5508_v28  ;;  %v5511_v31 = vld [vmem:[%s5942_s3 + $0x30] sm:$0xff]  }
 0x9ea   : > { %v2607_v49 = vmul.f32 %v2603_v34, %v2599_v43  ;;  %v6335_v53 = vadd.f32 %v5676_v51, %v2606_v45  ;;  %5225 = vmatprep.subr.bf16.mxu0 %v5765_v3  ;;  %v5516_v28 = vld [vmem:[%s5942_s3 + $0x90] sm:$0xff]  }
 0x9eb   : > { %v2605_v46 = vmul.f32 %v2603_v34, %v2597_v44  ;;  %v6329_v48 = vadd.f32 %v5674_v52, %v2604_v42  ;;  %5202 = vmatpush3.bf16.msra.mxu1 %v5509_v26 }
 0x9ec   : > { %v6338_v60 = vadd.f32 %v5677_v59, %v2607_v49  ;;  %5203 = vmatprep.subr.bf16.mxu1 %v5511_v31 }
 0x9ed   : > { %2612 = vadd.xlane.f32.xlu0 %v6329_v48  ;;  %v6332_v47 = vadd.f32 %v5675_v50, %v2605_v46  ;;  %5226 = vmatpush3.bf16.msra.mxu0 %v5510_v30  ;;  %v1441_v46 = vld [vmem:[%s5959_s13] sm:$0x3]  ;;  %v5517_v30 = vld [vmem:[%s5942_s3 + $0x98] sm:$0xff]  }
 0x9ee   : > { %v2659_v52 = vrot.slane %v1441_v46, %v6155_v6  ;;  %v2667_v0 = vrot.slane %v1441_v46, %v6149_v2 }
 0x9ef   : > { %2614 = vadd.xlane.f32.xlu1 %v6332_v47  ;;  %5204 = vmatpush3.bf16.msra.mxu1 %v5511_v31 }
 0x9f0   : > { %5228 = vmatmul.mubr.bf16.vlgmr.msra.gmra.mrb[20].mxu0 %v6387_v32  ;;  %5205 = vmatprep.subr.bf16.mxu1 %v5513_v33 }
 0x9f1   : > { %2616 = vadd.xlane.f32.xlu0 %v6335_v53 }
 0x9f3   : > { %2618 = vadd.xlane.f32.xlu1 %v6338_v60  ;;  %5206 = vmatpush3.bf16.msra.mxu1 %v5513_v33  ;;  %v5518_v33 = vld [vmem:[%s5942_s3 + $0xa0] sm:$0xff]  }
 0x9f4   : > { %5231 = vmatprep.subr.bf16.mxu1 %v5765_v3 }
 0xa7a   : > { %v2613_v7 = vpop.xlane.xlu0 %2612 }
 0xa7b   : > { %v2620_v8 = vmul.f32 0.0078125, %v2613_v7 }
 0xa7c   : > { %v2615_v9 = vpop.xlane.xlu1 %2614 }
 0xa7d   : > { %v6350_v55 = vsub.f32 %v6329_v48, %v2620_v8  ;;  %v2621_v58 = vmul.f32 0.0078125, %v2615_v9 }
 0xa7e   : > { %v2617_v10 = vpop.xlane.xlu0 %2616 }
 0xa7f   : > { %v6353_v11 = vsub.f32 %v6332_v47, %v2621_v58  ;;  %v2622_v54 = vmul.f32 0.0078125, %v2617_v10  ;;  %v2628_v57 = vmul.f32 %v6350_v55, %v6350_v55 }
 0xa80   : > { %v2619_v12 = vpop.xlane.xlu1 %2618 }
 0xa81   : > { %v6358_v14 = vsub.f32 %v6335_v53, %v2622_v54  ;;  %v2623_v15 = vmul.f32 0.0078125, %v2619_v12  ;;  %2632 = vadd.xlane.f32.xlu0 %v2628_v57  ;;  %v2629_v16 = vmul.f32 %v6353_v11, %v6353_v11 }
 0xa83   : > { %v6363_v17 = vsub.f32 %v6338_v60, %v2623_v15  ;;  %2634 = vadd.xlane.f32.xlu1 %v2629_v16  ;;  %v2630_v18 = vmul.f32 %v6358_v14, %v6358_v14 }
 0xa85   : > { %2636 = vadd.xlane.f32.xlu0 %v2630_v18  ;;  %v2631_v20 = vmul.f32 %v6363_v17, %v6363_v17 }
 0xa87   : > { %2638 = vadd.xlane.f32.xlu1 %v2631_v20 }
 0xb0e   : > { %v2633_v34 = vpop.xlane.xlu0 %2632 }
 0xb0f   : > { %v2640_v35 = vmul.f32 0.0078125, %v2633_v34 }
 0xb10   : > { %v2635_v36 = vpop.xlane.xlu1 %2634 }
 0xb11   : > { %v2644_v37 = vadd.f32 1e-06, %v2640_v35  ;;  %v2641_v38 = vmul.f32 0.0078125, %v2635_v36  ;;  %v5519_v36 = vld [vmem:[%s5942_s3 + $0xa8] sm:$0xff]  }
 0xb12   : > { %v2637_v39 = vpop.xlane.xlu0 %2636 }
 0xb13   : > { %5610 = vrsqrt.f32 %v2644_v37  ;;  %v2645_v40 = vadd.f32 1e-06, %v2641_v38  ;;  %v2642_v41 = vmul.f32 0.0078125, %v2637_v39 }
 0xb14   : > { %v2639_v42 = vpop.xlane.xlu1 %2638 }
 0xb15   : > { %5612 = vrsqrt.f32 %v2645_v40  ;;  %v2646_v43 = vadd.f32 1e-06, %v2642_v41  ;;  %v2643_v44 = vmul.f32 0.0078125, %v2639_v42 }
 0xb17   : > { %5614 = vrsqrt.f32 %v2646_v43  ;;  %v2647_v45 = vadd.f32 1e-06, %v2643_v44  ;;  %v5520_v44 = vld [vmem:[%s5942_s3 + $0xb0] sm:$0xff]  }
 0xb19   : > { %5616 = vrsqrt.f32 %v2647_v45 }
 0xb1d   : > { %v5611_v49 = vpop.eup %5610 }
 0xb1e   : > { %v2652_v50 = vmul.f32 %v5611_v49, %v6350_v55 }
 0xb1f   : > { %v5613_v51 = vpop.eup %5612 }
 0xb20   : > { %v2653_v59 = vmul.f32 %v5613_v51, %v6353_v11  ;;  %v2660_v63 = vmul.f32 %v2659_v52, %v2652_v50 }
 0xb21   : > { %v5615_v4 = vpop.eup %5614 }
 0xb22   : > { %v2654_v5 = vmul.f32 %v5615_v4, %v6358_v14  ;;  %v2661_v7 = vmul.f32 %v2659_v52, %v2653_v59  ;;  %v2668_v58 = vadd.f32 %v2667_v0, %v2660_v63  ;;  %v6404_v14 = vld [vmem:[%s5952_s30] sm:$0xf] }
 0xb23   : > { %v5617_v8 = vpop.eup %5616  ;;  %v2813_v16 = vrot.slane %v6404_v14, %v6149_v2  ;;  %v2695_v31 = vrot.slane %v6404_v14, %v6155_v6 }
 0xb24   : > { %v2655_v9 = vmul.f32 %v5617_v8, %v6363_v17  ;;  %v2669_v10 = vadd.f32 %v2667_v0, %v2661_v7  ;;  %v2662_v54 = vmul.f32 %v2659_v52, %v2654_v5  ;;  %v2902_v17 = vpop.f32.mrb[20].mxu0 }
 0xb25   : > { %v2903_v18 = vadd.f32 %v2902_v17, %v2813_v16  ;;  %v5229_v20 = vpop.f32.mrb[21].mxu0 }
 0xb26   : > { %v2672_v57 = vpack.c.bf16 %v2669_v10, %v2668_v58  ;;  %v2663_v12 = vmul.f32 %v2659_v52, %v2655_v9  ;;  %v2670_v55 = vadd.f32 %v2667_v0, %v2662_v54  ;;  %v2905_v21 = vpop.f32.mrb[22].mxu0  ;;  %v5521_v52 = vld [vmem:[%s5942_s3 + $0xb8] sm:$0xff]  }
 0xb27   : > { %v2906_v24 = vadd.f32 %v2905_v21, %v2813_v16  ;;  %v5230_v22 = vpop.f32.mrb[23].mxu0 }
 0xb28   : > { %5207 = vmatprep.mubr.bf16.mxu1 %v2672_v57  ;;  %v2671_v15 = vadd.f32 %v2667_v0, %v2663_v12 }
 0xb29   : > { %v3038_v19 = vpack.c.bf16 %v2906_v24, %v2903_v18 }
 0xb2a   : > { %v2673_v11 = vpack.c.bf16 %v2671_v15, %v2670_v55 }
 0xb2b   : > { %5395 = vmatprep.subr.msk.bf16.mxu0 %vm2076_vm1, %v3038_v19  ;;  %3213 = vrot.lane.b32.xlu0 %v3038_v19, %s5764_s11  ;;  %v3047_v23 = vsel %vm2076_vm1, %v3038_v19, 0 }
 0xb2c   : > { %5208 = vmatmul.mubr.bf16.vlgmr.msra.gmra.mrb[24].mxu1 %v2673_v11  ;;  %5252 = vmatpush3.bf16.xpose.msra.mxu0 %v3047_v23 }
 0xb2d   : > { %5247 = vmatprep.mubr.msk.bf16.mxu1 %vm5766_vm3, %v5765_v3  ;;  %5232 = vmatpush3.bf16.msra.mxu1 %v5514_v25 }
 0xb2e   : > { %5233 = vmatprep.subr.bf16.mxu1 %v5765_v3 }
 0xb31   : > { %5234 = vmatpush3.bf16.msra.mxu1 %v5515_v27 }
 0xb32   : > { %5235 = vmatprep.subr.bf16.mxu1 %v5765_v3 }
 0xb35   : > { %5236 = vmatpush3.bf16.msra.mxu1 %v5516_v28 }
 0xb36   : > { %5237 = vmatprep.subr.bf16.mxu1 %v5765_v3 }
 0xb39   : > { %5238 = vmatpush3.bf16.msra.mxu1 %v5517_v30 }
 0xb3a   : > { %5239 = vmatprep.subr.bf16.mxu1 %v5765_v3 }
 0xb3d   : > { %5240 = vmatpush3.bf16.msra.mxu1 %v5518_v33 }
 0xb3e   : > { %5241 = vmatprep.subr.bf16.mxu1 %v5765_v3 }
 0xb41   : > { %5242 = vmatpush3.bf16.msra.mxu1 %v5519_v36 }
 0xb42   : > { %5243 = vmatprep.subr.bf16.mxu1 %v5765_v3 }
 0xb45   : > { %5244 = vmatpush3.bf16.msra.mxu1 %v5520_v44 }
 0xb46   : > { %5245 = vmatprep.subr.bf16.mxu1 %v5765_v3 }
 0xb49   : > { %5246 = vmatpush3.bf16.msra.mxu1 %v5521_v52 }
 0xb4c   : > { %5248 = vmatmul.mubr.bf16.vlgmr.msra.gmra.mrb[28].mxu1 %v6387_v32  ;;  %v2929_v32 = vrot.slane %v6404_v14, %v6222_v13 }
 0xb9d   : > { %v3214_v26 = vpop.permute.xlu0 %3213 }
 0xb9e   : > { %5396 = vmatprep.subr.msk.bf16.mxu0 %vm2076_vm1, %v3214_v26  ;;  %v3222_v46 = vsel %vm2076_vm1, %v3214_v26, 0 }
 0xbff   : > { %v5209_v34 = vpop.f32.mrb[24].mxu1 }
 0xc00   : > { %v2778_v35 = vpop.f32.mrb[25].mxu1  ;;  %v2787_v38 = vadd.f32 %v5209_v34, %v2695_v31 }
 0xc01   : > { %v5210_v37 = vpop.f32.mrb[26].mxu1  ;;  %v2779_v41 = vadd.f32 %v2778_v35, %v2695_v31 }
 0xc02   : > { %v2790_v39 = vadd.f32 %v5210_v37, %v2695_v31  ;;  %v2781_v40 = vpop.f32.mrb[27].mxu1 }
 0xc03   : > { %v2782_v42 = vadd.f32 %v2781_v40, %v2695_v31 }
 0xc04   : > { %v3037_v43 = vpack.c.bf16 %v2790_v39, %v2787_v38 }
 0xc05   : > { %v3036_v45 = vpack.c.bf16 %v2782_v42, %v2779_v41 }
 0xc07   : > { %3208 = vrot.lane.b32.xlu1 %v3036_v45, %s5764_s11  ;;  %5253 = vmatprep.mubr.msk.bf16.mxu0 %vm2076_vm1, %v3036_v45 }
 0xc08   : > { %5254 = vmatmul.mubr.msk.bf16.vlgmr.msra.gmra.mrb[24].mxu0 %vm2076_vm1, %v3037_v43 }
 0xc09   : > { %5264 = vmatpush3.bf16.xpose.msra.mxu0 %v3222_v46 }
 0xc0b   : > { %3210 = vrot.lane.b32.xlu1 %v3037_v43, %s5764_s11 }
 0xc1f   : > { %v3012_v10 = vpop.f32.mrb[28].mxu1 }
 0xc20   : > { %v3013_v54 = vadd.f32 %v3012_v10, %v2929_v32  ;;  %v5249_v57 = vpop.f32.mrb[29].mxu1 }
 0xc21   : > { %v3015_v12 = vpop.f32.mrb[30].mxu1 }
 0xc22   : > { %v3016_v55 = vadd.f32 %v3015_v12, %v2929_v32  ;;  %v5250_v15 = vpop.f32.mrb[31].mxu1 }
 0xc24   : > { %v3039_v16 = vpack.c.bf16 %v3016_v55, %v3013_v54 }
 0xc26   : > { %5257 = vmatprep.subr.bf16.mxu1 %v3039_v16 }
 0xc27   : > { %5258 = vmatpush3.bf16.msra.mxu1 %v3039_v16 }
 0xc79   : > { %v3209_v49 = vpop.permute.xlu1 %3208 }
 0xc7a   : > { %5265 = vmatprep.mubr.msk.bf16.mxu0 %vm2076_vm1, %v3209_v49 }
 0xc7d   : > { %v3211_v50 = vpop.permute.xlu1 %3210 }
 0xc7e   : > { %5266 = vmatmul.mubr.msk.bf16.vlgmr.msra.gmra.mrb[28].mxu0 %vm2076_vm1, %v3211_v50 }
 0xcdb   : > { %v5255_v51 = vpop.f32.mrb[24].mxu0 }
 0xcdc   : > { %v3100_v59 = vmul.f32 0.125, %v5255_v51  ;;  %v3083_v63 = vpop.f32.mrb[25].mxu0 }
 0xcdd   : > { %v3098_v0 = vmul.f32 0.125, %v3083_v63  ;;  %v5256_v4 = vpop.f32.mrb[26].mxu0 }
 0xcde   : > { %v3086_v5 = vpop.f32.mrb[27].mxu0  ;;  %v3109_v3 = vsel %vm3102_vm4, %v3100_v59, -inf  ;;  %v3101_v58 = vmul.f32 0.125, %v5256_v4 }
 0xcdf   : > { %v3099_v7 = vmul.f32 0.125, %v3086_v5  ;;  %3110 = vmax.xlane.f32.xlu0 %v3109_v3  ;;  %v3103_v8 = vsel %vm3102_vm4, %v3098_v0, -inf }
 0xce0   : > { %3104 = vmax.xlane.f32.xlu1 %v3103_v8  ;;  %v3112_v11 = vsel %vm3102_vm4, %v3101_v58, -inf }
 0xce1   : > { %v3106_v9 = vsel %vm3102_vm4, %v3099_v7, -inf }
 0xce3   : > { %3107 = vmax.xlane.f32.xlu0 %v3106_v9 }
 0xce7   : > { %3113 = vmax.xlane.f32.xlu0 %v3112_v11 }
 0xd51   : > { %v5267_v17 = vpop.f32.mrb[28].mxu0 }
 0xd52   : > { %v3275_v18 = vmul.f32 0.125, %v5267_v17  ;;  %v3258_v13 = vpop.f32.mrb[29].mxu0 }
 0xd53   : > { %v5268_v20 = vpop.f32.mrb[30].mxu0  ;;  %v3273_v21 = vmul.f32 0.125, %v3258_v13 }
 0xd54   : > { %v3261_v24 = vpop.f32.mrb[31].mxu0  ;;  %v3283_v22 = vsel %vm3102_vm4, %v3275_v18, -inf  ;;  %v3276_v23 = vmul.f32 0.125, %v5268_v20 }
 0xd55   : > { %v3274_v19 = vmul.f32 0.125, %v3261_v24  ;;  %3284 = vmax.xlane.f32.xlu1 %v3283_v22  ;;  %v3277_v27 = vsel %vm3102_vm4, %v3273_v21, -inf  ;;  %v5522_v24 = vld [vmem:[%s5942_s3 + $0xe0] sm:$0xff]   ;;  %v5523_v22 = vld [vmem:[%s5942_s3 + $0xe8] sm:$0xff]  }
 0xd56   : > { %v3286_v28 = vsel %vm3102_vm4, %v3276_v23, -inf  ;;  %5275 = vmatprep.subr.bf16.mxu0 %v5522_v24 }
 0xd57   : > { %v3280_v25 = vsel %vm3102_vm4, %v3274_v19, -inf  ;;  %5276 = vmatpush3.bf16.msra.mxu0 %v5522_v24 }
 0xd58   : > { %3281 = vmax.xlane.f32.xlu0 %v3280_v25  ;;  %5277 = vmatprep.subr.bf16.mxu0 %v5523_v22  ;;  %v5526_v25 = vld [vmem:[%s5942_s3 + $0xc0] sm:$0xff]  }
 0xd59   : > { %3278 = vmax.xlane.f32.xlu1 %v3277_v27 }
 0xd5b   : > { %5278 = vmatpush3.bf16.msra.mxu0 %v5523_v22 }
 0xd5c   : > { %3287 = vmax.xlane.f32.xlu0 %v3286_v28 }
 0xd6a   : > { %3316 = vrot.lane.b32.xlu1 %v3039_v16, %s5764_s11 }
 0xd6c   : > { %v3111_v26 = vpop.xlane.xlu0 %3110 }
 0xd6d   : > { %v3105_v30 = vpop.xlane.xlu1 %3104  ;;  %v3117_v33 = vsub.f32 %v3100_v59, %v3111_v26 }
 0xd6e   : > { %v3115_v31 = vsub.f32 %v3098_v0, %v3105_v30 }
 0xd6f   : > { %v3123_v38 = vmul.f32 1.442695, %v3117_v33 }
 0xd70   : > { %v3119_v34 = vmul.f32 1.442695, %v3115_v31  ;;  %v3108_v35 = vpop.xlane.xlu0 %3107 }
 0xd71   : > { %v3116_v36 = vsub.f32 %v3099_v7, %v3108_v35 }
 0xd72   : > { %5618 = vpow2.f32 %v3119_v34 }
 0xd73   : > { %v3121_v37 = vmul.f32 1.442695, %v3116_v36 }
 0xd74   : > { %v3114_v39 = vpop.xlane.xlu0 %3113 }
 0xd75   : > { %5620 = vpow2.f32 %v3121_v37  ;;  %v3118_v40 = vsub.f32 %v3101_v58, %v3114_v39 }
 0xd76   : > { %5622 = vpow2.f32 %v3123_v38 }
 0xd77   : > { %v3125_v41 = vmul.f32 1.442695, %v3118_v40 }
 0xd79   : > { %5624 = vpow2.f32 %v3125_v41 }
 0xd7c   : > { %v5619_v42 = vpop.eup %5618 }
 0xd7d   : > { %v3127_v49 = vsel %vm3102_vm4, %v5619_v42, 0.0 }
 0xd7f   : > { %v5621_v43 = vpop.eup %5620 }
 0xd80   : > { %v3139_v44 = vpack.c.bf16 %v5621_v43, %v5619_v42  ;;  %v5623_v45 = vpop.eup %5622  ;;  %v3130_v13 = vsel %vm3102_vm4, %v5621_v43, 0.0 }
 0xd81   : > { %v3133_v20 = vsel %vm3102_vm4, %v5623_v45, 0.0 }
 0xd82   : > { %5259 = vmatprep.mubr.msk.bf16.mxu1 %vm3102_vm4, %v3139_v44 }
 0xd83   : > { %v5625_v46 = vpop.eup %5624 }
 0xd84   : > { %v3140_v52 = vpack.c.bf16 %v5625_v46, %v5623_v45 }
 0xd86   : > { %5260 = vmatmul.mubr.msk.bf16.vlgmr.msra.gmra.mrb[32].mxu1 %vm3102_vm4, %v3140_v52 }
 0xd8e   : > { %3128 = vadd.xlane.f32.xlu1 %v3127_v49 }
 0xde2   : > { %v3285_v50 = vpop.xlane.xlu1 %3284 }
 0xde3   : > { %v3291_v51 = vsub.f32 %v3275_v18, %v3285_v50 }
 0xde5   : > { %v3297_v59 = vmul.f32 1.442695, %v3291_v51  ;;  %v3282_v63 = vpop.xlane.xlu0 %3281 }
 0xde6   : > { %v3290_v0 = vsub.f32 %v3274_v19, %v3282_v63  ;;  %v3279_v4 = vpop.xlane.xlu1 %3278  ;;  %v5524_v19 = vld [vmem:[%s5942_s3 + $0xf0] sm:$0xff]  }
 0xde7   : > { %5626 = vpow2.f32 %v3297_v59  ;;  %v3289_v5 = vsub.f32 %v3273_v21, %v3279_v4  ;;  %v3136_v21 = vsel %vm3102_vm4, %v5625_v46, 0.0  ;;  %5279 = vmatprep.subr.bf16.mxu0 %v5524_v19 }
 0xde8   : > { %v3295_v3 = vmul.f32 1.442695, %v3290_v0  ;;  %5280 = vmatpush3.bf16.msra.mxu0 %v5524_v19 }
 0xde9   : > { %v3293_v7 = vmul.f32 1.442695, %v3289_v5  ;;  %v3288_v8 = vpop.xlane.xlu0 %3287 }
 0xdea   : > { %5628 = vpow2.f32 %v3295_v3  ;;  %v3292_v32 = vsub.f32 %v3276_v23, %v3288_v8  ;;  %v3317_v9 = vpop.permute.xlu1 %3316  ;;  %v5525_v23 = vld [vmem:[%s5942_s3 + $0xf8] sm:$0xff]  }
 0xdeb   : > { %5630 = vpow2.f32 %v3293_v7  ;;  %5269 = vmatprep.subr.bf16.mxu1 %v3317_v9  ;;  %5281 = vmatprep.subr.bf16.mxu0 %v5525_v23 }
 0xdec   : > { %v3299_v58 = vmul.f32 1.442695, %v3292_v32  ;;  %5270 = vmatpush3.bf16.msra.mxu1 %v3317_v9  ;;  %5282 = vmatpush3.bf16.msra.mxu0 %v5525_v23 }
 0xded   : > { %5287 = vmatprep.subr.bf16.mxu0 %v5526_v25 }
 0xdee   : > { %5632 = vpow2.f32 %v3299_v58 }
 0xdf1   : > { %v5627_v10 = vpop.eup %5626 }
 0xdf2   : > { %v3307_v54 = vsel %vm3102_vm4, %v5627_v10, 0.0 }
 0xdf3   : > { %3308 = vadd.xlane.f32.xlu0 %v3307_v54 }
 0xdf4   : > { %v5629_v57 = vpop.eup %5628 }
 0xdf5   : > { %v5631_v12 = vpop.eup %5630  ;;  %v3304_v17 = vsel %vm3102_vm4, %v5629_v57, 0.0 }
 0xdf6   : > { %v3301_v55 = vsel %vm3102_vm4, %v5631_v12, 0.0  ;;  %v3313_v15 = vpack.c.bf16 %v5629_v57, %v5631_v12  ;;  %v5527_v57 = vld [vmem:[%s5942_s3 + $0xc8] sm:$0xff]   ;;  %v5528_v12 = vld [vmem:[%s5942_s3 + $0xd0] sm:$0xff]  }
 0xdf7   : > { %3302 = vadd.xlane.f32.xlu0 %v3301_v55  ;;  %v5529_v55 = vld [vmem:[%s5942_s3 + $0xd8] sm:$0xff]   ;;  %s6793_s3 = scalar_lea.vmem %s6730_s21, %s5924_s8 }
 0xdf8   : > { %v5633_v11 = vpop.eup %5632  ;;  %5271 = vmatprep.mubr.msk.bf16.mxu1 %vm3102_vm4, %v3313_v15  ;;  %v3545_v15 = vrot.slane %v6404_v14, %v6323_v29 }
 0xdf9   : > { %v3314_v16 = vpack.c.bf16 %v5633_v11, %v5627_v10  ;;  %v3310_v18 = vsel %vm3102_vm4, %v5633_v11, 0.0 }
 0xdfb   : > { %3305 = vadd.xlane.f32.xlu0 %v3304_v17  ;;  %5272 = vmatmul.mubr.msk.bf16.vlgmr.msra.gmra.mrb[36].mxu1 %vm3102_vm4, %v3314_v16 }
 0xdff   : > { %3311 = vadd.xlane.f32.xlu0 %v3310_v18 }
 0xe03   : > { %3131 = vadd.xlane.f32.xlu0 %v3130_v13 }
 0xe07   : > { %3134 = vadd.xlane.f32.xlu0 %v3133_v20 }
 0xe0b   : > { %3137 = vadd.xlane.f32.xlu0 %v3136_v21 }
 0xe1b   : > { %v3129_v36 = vpop.xlane.xlu1 %3128 }
 0xe1c   : > { %5634 = vrcp.f32 %v3129_v36 }
 0xe26   : > { %v5635_v40 = vpop.eup %5634 }
 0xe59   : > { %v5261_v27 = vpop.f32.mrb[32].mxu1 }
 0xe5a   : > { %v3181_v28 = vpop.f32.mrb[33].mxu1 }
 0xe5b   : > { %v5262_v26 = vpop.f32.mrb[34].mxu1  ;;  %v3200_v42 = vmul.f32 %v5635_v40, %v3181_v28 }
 0xe5c   : > { %v3184_v30 = vpop.f32.mrb[35].mxu1 }
 0xe80   : > { %v3309_v31 = vpop.xlane.xlu0 %3308 }
 0xe84   : > { %v3303_v33 = vpop.xlane.xlu0 %3302 }
 0xe88   : > { %v3306_v34 = vpop.xlane.xlu0 %3305 }
 0xe8c   : > { %v3312_v35 = vpop.xlane.xlu0 %3311 }
 0xe90   : > { %v3132_v37 = vpop.xlane.xlu0 %3131 }
 0xe91   : > { %5636 = vrcp.f32 %v3132_v37 }
 0xe94   : > { %v3135_v38 = vpop.xlane.xlu0 %3134 }
 0xe95   : > { %5638 = vrcp.f32 %v3135_v38 }
 0xe98   : > { %v3138_v39 = vpop.xlane.xlu0 %3137 }
 0xe99   : > { %5640 = vrcp.f32 %v3138_v39 }
 0xe9a   : > { %5642 = vrcp.f32 %v3309_v31 }
 0xe9b   : > { %v5637_v41 = vpop.eup %5636  ;;  %5644 = vrcp.f32 %v3303_v33 }
 0xe9c   : > { %v3201_v43 = vmul.f32 %v5637_v41, %v3184_v30  ;;  %5646 = vrcp.f32 %v3312_v35 }
 0xe9d   : > { %5648 = vrcp.f32 %v3306_v34 }
 0xe9e   : > { %v3204_v44 = vpack.c.bf16 %v3201_v43, %v3200_v42  ;;  %v5538_v43 = vld [vmem:[%s5964_s2 + $0x24] ss:$8 sps:$4 sm:$0xff]  }
 0xe9f   : > { %v5639_v45 = vpop.eup %5638 }
 0xea0   : > { %v3202_v52 = vmul.f32 %v5639_v45, %v5261_v27  ;;  %v5535_v27 = vld [vmem:[%s5964_s2 + $0x14] ss:$8 sps:$4 sm:$0xff]  }
 0xea1   : > { %v5541_v45 = vld [vmem:[%s5964_s2 + $0x34] ss:$8 sps:$4 sm:$0xff]  }
 0xea3   : > { %v5641_v46 = vpop.eup %5640 }
 0xea4   : > { %v3203_v49 = vmul.f32 %v5641_v46, %v5262_v26  ;;  %v5643_v51 = vpop.eup %5642  ;;  %v5539_v46 = vld [vmem:[%s5964_s2 + $0x30] ss:$8 sps:$4 sm:$0xff]  }
 0xea5   : > { %v5645_v63 = vpop.eup %5644 }
 0xea6   : > { %v3205_v50 = vpack.c.bf16 %v3203_v49, %v3202_v52  ;;  %v5647_v4 = vpop.eup %5646  ;;  %v5544_v52 = vld [vmem:[%s5964_s2 + $0x44] ss:$8 sps:$4 sm:$0xff]   ;;  %v5542_v49 = vld [vmem:[%s5964_s2 + $0x40] ss:$8 sps:$4 sm:$0xff]  }
 0xea7   : > { %v5649_v3 = vpop.eup %5648 }
 0xece   : > { %v5273_v59 = vpop.f32.mrb[36].mxu1 }
 0xecf   : > { %v3359_v0 = vpop.f32.mrb[37].mxu1  ;;  %v3380_v7 = vmul.f32 %v5643_v51, %v5273_v59  ;;  %v5545_v51 = vld [vmem:[%s5964_s2 + $0x50] ss:$8 sps:$4 sm:$0xff]   ;;  %v5550_v59 = vld [vmem:[%s5964_s2 + $0x64] ss:$8 sps:$4 sm:$0xff]  }
 0xed0   : > { %v5274_v5 = vpop.f32.mrb[38].mxu1  ;;  %v3378_v9 = vmul.f32 %v5645_v63, %v3359_v0  ;;  %v5548_v63 = vld [vmem:[%s5964_s2 + $0x60] ss:$8 sps:$4 sm:$0xff]   ;;  %v5553_v0 = vld [vmem:[%s5964_s2 + $0x74] ss:$8 sps:$4 sm:$0xff]  }
 0xed1   : > { %v3381_v8 = vmul.f32 %v5647_v4, %v5274_v5  ;;  %v3362_v32 = vpop.f32.mrb[39].mxu1  ;;  %v5551_v4 = vld [vmem:[%s5964_s2 + $0x70] ss:$8 sps:$4 sm:$0xff]   ;;  %v5767_v5 = vmov 0  }
 0xed2   : > { %v3379_v58 = vmul.f32 %v5649_v3, %v3362_v32  ;;  %3756 = vmatprep.mubr.bf16.mxu1 %v5767_v5 }
 0xed3   : > { %v3383_v10 = vpack.c.bf16 %v3381_v8, %v3380_v7 }
 0xed4   : > { %v3382_v54 = vpack.c.bf16 %v3379_v58, %v3378_v9 }
 0xed6   : > { %5283 = vmatprep.mubr.msk.bf16.mxu0 %vm2076_vm1, %v3382_v54 }
 0xed7   : > { %5284 = vmatmul.mubr.msk.bf16.vlgmr.msra.gmra.mrb[32].mxu0 %vm2076_vm1, %v3383_v10 }
 0xed8   : > { %5288 = vmatpush3.bf16.msra.mxu0 %v5526_v25  ;;  %5295 = vmatprep.mubr.msk.bf16.mxu0 %vm2076_vm1, %v3204_v44  ;;  %v5532_v25 = vld [vmem:[%s5964_s2 + $0x4] ss:$8 sps:$4 sm:$0xff]   ;;  %v5536_v44 = vld [vmem:[%s5964_s2 + $0x20] ss:$8 sps:$4 sm:$0xff]  }
 0xed9   : > { %5289 = vmatprep.subr.bf16.mxu0 %v5527_v57  ;;  %3724 = vmatprep.subr.bf16.mxu1 %v5532_v25 }
 0xedc   : > { %5290 = vmatpush3.bf16.msra.mxu0 %v5527_v57 }
 0xedd   : > { %5291 = vmatprep.subr.bf16.mxu0 %v5528_v12 }
 0xee0   : > { %5292 = vmatpush3.bf16.msra.mxu0 %v5528_v12 }
 0xee1   : > { %5293 = vmatprep.subr.bf16.mxu0 %v5529_v55 }
 0xee4   : > { %5294 = vmatpush3.bf16.msra.mxu0 %v5529_v55  ;;  %v3600_v55 = vsub.s32 4, %v6143_v62 }
 0xee7   : > { %5296 = vmatmul.mubr.msk.bf16.vlgmr.msra.gmra.mrb[32].mxu0 %vm2076_vm1, %v3205_v50  ;;  %v5547_v50 = vld [vmem:[%s5964_s2 + $0x54] ss:$8 sps:$4 sm:$0xff]  }
 0xfba   : > { %v5297_v11 = vpop.f32.mrb[32].mxu0 }
 0xfbb   : > { %v3527_v16 = vpop.f32.mrb[33].mxu0  ;;  %v3548_v24 = vadd.f32 %v5297_v11, %v3545_v15 }
 0xfbc   : > { %v3546_v17 = vadd.f32 %v3545_v15, %v3527_v16  ;;  %v5298_v18 = vpop.f32.mrb[34].mxu0 }
 0xfbd   : > { %v3530_v13 = vpop.f32.mrb[35].mxu0  ;;  %v6483_v14 = vadd.f32 %v3548_v24, %v6335_v53  ;;  %v3549_v19 = vadd.f32 %v5298_v18, %v3545_v15  ;;  %v3601_v18 = vrot.slane %v6146_v1, %v3600_v55 }
 0xfbe   : > { %v6475_v20 = vadd.f32 %v3546_v17, %v6329_v48  ;;  %v3547_v21 = vadd.f32 %v3545_v15, %v3530_v13  ;;  %v5530_v48 = vld [vmem:[%s5964_s2] ss:$8 sps:$4 sm:$0xff]  }
 0xfbf   : > { %v6487_v23 = vadd.f32 %v3549_v19, %v6338_v60  ;;  %3725 = vmatpush1.bf16.msra.mxu1 %v5530_v48  ;;  %v3609_v19 = vrot.slane %v6141_v61, %v6323_v29 }
 0xfc0   : > { %3554 = vadd.xlane.f32.xlu0 %v6475_v20  ;;  %v6479_v22 = vadd.f32 %v3547_v21, %v6332_v47  ;;  %v5533_v47 = vld [vmem:[%s5964_s2 + $0x10] ss:$8 sps:$4 sm:$0xff]   ;;  %3726 = vmatprep.subr.bf16.mxu1 %v5535_v27 }
 0xfc3   : > { %3727 = vmatpush1.bf16.msra.mxu1 %v5533_v47 }
 0xfc4   : > { %3556 = vadd.xlane.f32.xlu0 %v6479_v22  ;;  %3728 = vmatprep.subr.bf16.mxu1 %v5538_v43  ;;  %v5563_v43 = vld [vmem:[%s5974_s5 + $0x20] sm:$0xff]  }
 0xfc7   : > { %3729 = vmatpush1.bf16.msra.mxu1 %v5536_v44  ;;  %v5564_v44 = vld [vmem:[%s5974_s5 + $0x68] sm:$0xff]  }
 0xfc8   : > { %3558 = vadd.xlane.f32.xlu0 %v6483_v14  ;;  %3730 = vmatprep.subr.bf16.mxu1 %v5541_v45  ;;  %v5565_v45 = vld [vmem:[%s5974_s5 + $0x28] sm:$0xff]  }
 0xfcb   : > { %3731 = vmatpush1.bf16.msra.mxu1 %v5539_v46  ;;  %v5566_v46 = vld [vmem:[%s5974_s5 + $0x70] sm:$0xff]  }
 0xfcc   : > { %3560 = vadd.xlane.f32.xlu0 %v6487_v23  ;;  %3732 = vmatprep.subr.bf16.mxu1 %v5544_v52  ;;  %v5567_v52 = vld [vmem:[%s5974_s5 + $0x30] sm:$0xff]  }
 0xfcf   : > { %3733 = vmatpush1.bf16.msra.mxu1 %v5542_v49  ;;  %v5568_v49 = vld [vmem:[%s5974_s5 + $0x78] sm:$0xff]  }
 0xfd0   : > { %3734 = vmatprep.subr.bf16.mxu1 %v5547_v50  ;;  %v5569_v50 = vld [vmem:[%s5974_s5 + $0x38] sm:$0xff]  }
 0xfd3   : > { %3735 = vmatpush1.bf16.msra.mxu1 %v5545_v51  ;;  %v3632_v51 = vld [vmem:[%s5969_s14] sm:$0x3] }
 0xfd4   : > { %3736 = vmatprep.subr.bf16.mxu1 %v5550_v59  ;;  %v3637_v59 = vrot.slane %v3632_v51, %v6155_v6 }
 0xfd7   : > { %3737 = vmatpush1.bf16.msra.mxu1 %v5548_v63  ;;  %v3641_v63 = vrot.slane %v3632_v51, %v6149_v2 }
 0xfd8   : > { %3738 = vmatprep.subr.bf16.mxu1 %v5553_v0 }
 0xfdb   : > { %3739 = vmatpush1.bf16.msra.mxu1 %v5551_v4 }
0x104d   : > { %v3555_v28 = vpop.xlane.xlu0 %3554 }
0x104e   : > { %v3562_v26 = vmul.f32 0.0078125, %v3555_v28 }
0x1050   : > { %v3566_v53 = vsub.f32 %v6475_v20, %v3562_v26 }
0x1051   : > { %v3557_v30 = vpop.xlane.xlu0 %3556 }
0x1052   : > { %v3563_v31 = vmul.f32 0.0078125, %v3557_v30  ;;  %v3570_v33 = vmul.f32 %v3566_v53, %v3566_v53 }
0x1054   : > { %v3567_v60 = vsub.f32 %v6479_v22, %v3563_v31  ;;  %3574 = vadd.xlane.f32.xlu0 %v3570_v33 }
0x1055   : > { %v3559_v34 = vpop.xlane.xlu0 %3558 }
0x1056   : > { %v3564_v35 = vmul.f32 0.0078125, %v3559_v34  ;;  %v3571_v36 = vmul.f32 %v3567_v60, %v3567_v60  ;;  %v5554_v34 = vld [vmem:[%s5974_s5 + $0x40] sm:$0xff]  }
0x1057   : > { %4921 = vmatprep.subr.bf16.mxu0 %v5554_v34 }
0x1058   : > { %v6497_v37 = vsub.f32 %v6483_v14, %v3564_v35  ;;  %3576 = vadd.xlane.f32.xlu0 %v3571_v36  ;;  %v5555_v35 = vld [vmem:[%s5974_s5] sm:$0xff]   ;;  %v5556_v36 = vld [vmem:[%s5974_s5 + $0x48] sm:$0xff]  }
0x1059   : > { %v3561_v38 = vpop.xlane.xlu0 %3560  ;;  %4922 = vmatpush3.bf16.msra.mxu0 %v5555_v35 }
0x105a   : > { %v3565_v39 = vmul.f32 0.0078125, %v3561_v38  ;;  %v3572_v40 = vmul.f32 %v6497_v37, %v6497_v37  ;;  %4923 = vmatprep.subr.bf16.mxu0 %v5556_v36  ;;  %v5558_v38 = vld [vmem:[%s5974_s5 + $0x50] sm:$0xff]  }
0x105c   : > { %v3569_v41 = vsub.f32 %v6487_v23, %v3565_v39  ;;  %3578 = vadd.xlane.f32.xlu1 %v3572_v40  ;;  %v5559_v39 = vld [vmem:[%s5974_s5 + $0x10] sm:$0xff]   ;;  %v5560_v40 = vld [vmem:[%s5974_s5 + $0x58] sm:$0xff]  }
0x105e   : > { %v3573_v42 = vmul.f32 %v3569_v41, %v3569_v41 }
0x1060   : > { %3580 = vadd.xlane.f32.xlu0 %v3573_v42  ;;  %v5562_v42 = vld [vmem:[%s5974_s5 + $0x60] sm:$0xff]  }
0x10e1   : > { %v3575_v3 = vpop.xlane.xlu0 %3574 }
0x10e2   : > { %v3582_v7 = vmul.f32 0.0078125, %v3575_v3 }
0x10e4   : > { %v3586_v8 = vadd.f32 1e-06, %v3582_v7 }
0x10e5   : > { %v3577_v32 = vpop.xlane.xlu0 %3576 }
0x10e6   : > { %5650 = vrsqrt.f32 %v3586_v8  ;;  %v3583_v9 = vmul.f32 0.0078125, %v3577_v32 }
0x10e8   : > { %v3587_v58 = vadd.f32 1e-06, %v3583_v9 }
0x10e9   : > { %v3579_v10 = vpop.xlane.xlu1 %3578 }
0x10ea   : > { %5652 = vrsqrt.f32 %v3587_v58  ;;  %v3584_v54 = vmul.f32 0.0078125, %v3579_v10 }
0x10ec   : > { %v3588_v57 = vadd.f32 1e-06, %v3584_v54 }
0x10ed   : > { %v3581_v12 = vpop.xlane.xlu0 %3580 }
0x10ee   : > { %5654 = vrsqrt.f32 %v3588_v57  ;;  %v3585_v15 = vmul.f32 0.0078125, %v3581_v12 }
0x10f0   : > { %v5651_v11 = vpop.eup %5650  ;;  %v3589_v16 = vadd.f32 1e-06, %v3585_v15 }
0x10f1   : > { %v3594_v17 = vmul.f32 %v5651_v11, %v3566_v53 }
0x10f2   : > { %5656 = vrsqrt.f32 %v3589_v16 }
0x10f3   : > { %v3602_v24 = vmul.f32 %v3601_v18, %v3594_v17 }
0x10f4   : > { %v5653_v13 = vpop.eup %5652 }
0x10f5   : > { %v3595_v21 = vmul.f32 %v5653_v13, %v3567_v60  ;;  %v3610_v27 = vadd.f32 %v3609_v19, %v3602_v24 }
0x10f7   : > { %v3603_v48 = vmul.f32 %v3601_v18, %v3595_v21 }
0x10f8   : > { %v5655_v25 = vpop.eup %5654 }
0x10f9   : > { %v3611_v47 = vadd.f32 %v3609_v19, %v3603_v48  ;;  %v3596_v28 = vmul.f32 %v5655_v25, %v6497_v37  ;;  %v5557_v37 = vld [vmem:[%s5974_s5 + $0x8] sm:$0xff]  }
0x10fa   : > { %4924 = vmatpush3.bf16.msra.mxu0 %v5557_v37 }
0x10fb   : > { %v3614_v26 = vpack.c.bf16 %v3611_v47, %v3610_v27  ;;  %v3604_v30 = vmul.f32 %v3601_v18, %v3596_v28  ;;  %4925 = vmatprep.subr.bf16.mxu0 %v5558_v38 }
0x10fc   : > { %v5657_v53 = vpop.eup %5656 }
0x10fd   : > { %3757 = vmatmul.mubr.bf16.vlgmr.msra.gmra.mrb[40].mxu1 %v3614_v26  ;;  %v3597_v1 = vmul.f32 %v5657_v53, %v3569_v41  ;;  %v3612_v29 = vadd.f32 %v3609_v19, %v3604_v30  ;;  %v5561_v41 = vld [vmem:[%s5974_s5 + $0x18] sm:$0xff]  }
0x10fe   : > { %3766 = vmatprep.mubr.bf16.mxu1 %v5767_v5  ;;  %4926 = vmatpush3.bf16.msra.mxu0 %v5559_v39 }
0x10ff   : > { %v3605_v31 = vmul.f32 %v3601_v18, %v3597_v1  ;;  %4927 = vmatprep.subr.bf16.mxu0 %v5560_v40 }
0x1101   : > { %v3613_v33 = vadd.f32 %v3609_v19, %v3605_v31 }
0x1102   : > { %4928 = vmatpush3.bf16.msra.mxu0 %v5561_v41 }
0x1103   : > { %v3615_v60 = vpack.c.bf16 %v3613_v33, %v3612_v29  ;;  %4929 = vmatprep.subr.bf16.mxu0 %v5562_v42 }
0x1105   : > { %3767 = vmatmul.mubr.bf16.gmra.mrb[44].mxu1 %v3615_v60 }
0x1106   : > { %4930 = vmatpush3.bf16.msra.mxu0 %v5563_v43 }
0x1107   : > { %4931 = vmatprep.subr.bf16.mxu0 %v5564_v44 }
0x110a   : > { %4932 = vmatpush3.bf16.msra.mxu0 %v5565_v45 }
0x110b   : > { %4933 = vmatprep.subr.bf16.mxu0 %v5566_v46 }
0x110e   : > { %4934 = vmatpush3.bf16.msra.mxu0 %v5567_v52 }
0x110f   : > { %4935 = vmatprep.subr.bf16.mxu0 %v5568_v49 }
0x1112   : > { %4936 = vmatpush3.bf16.msra.mxu0 %v5569_v50 }
0x11d0   : > { %v3758_v0 = vpop.f32.mrb[40].mxu1 }
0x11d1   : > { %v6538_v4 = vadd.f32 %v3758_v0, %v3637_v59  ;;  %v3760_v5 = vpop.f32.mrb[41].mxu1 }
0x11d2   : > { %v6540_v3 = vadd.f32 %v3760_v5, %v3641_v63  ;;  %v3762_v7 = vpop.f32.mrb[42].mxu1 }
0x11d3   : > { %v3777_v8 = vmul.f32 %v6538_v4, %v6538_v4  ;;  %v6544_v32 = vadd.f32 %v3762_v7, %v3637_v59  ;;  %v3764_v9 = vpop.f32.mrb[43].mxu1 }
0x11d4   : > { %v3778_v58 = vmul.f32 %v6540_v3, %v6540_v3  ;;  %v6548_v10 = vadd.f32 %v3764_v9, %v3641_v63 }
0x11d5   : > { %v3785_v54 = vmul.f32 %v3777_v8, %v6538_v4  ;;  %v3779_v57 = vmul.f32 %v6544_v32, %v6544_v32 }
0x11d6   : > { %v3786_v12 = vmul.f32 %v3778_v58, %v6540_v3  ;;  %v3780_v55 = vmul.f32 %v6548_v10, %v6548_v10 }
0x11d7   : > { %v3793_v15 = vmul.f32 0.044715, %v3785_v54  ;;  %v3787_v11 = vmul.f32 %v3779_v57, %v6544_v32 }
0x11d8   : > { %v3794_v16 = vmul.f32 0.044715, %v3786_v12  ;;  %v3788_v17 = vmul.f32 %v3780_v55, %v6548_v10  ;;  %v3768_v18 = vpop.f32.mrb[44].mxu1 }
0x11d9   : > { %v3801_v13 = vadd.f32 %v3793_v15, %v6538_v4  ;;  %v3795_v21 = vmul.f32 0.044715, %v3787_v11  ;;  %v6559_v24 = vadd.f32 %v3768_v18, %v3637_v59  ;;  %v3770_v19 = vpop.f32.mrb[45].mxu1 }
0x11da   : > { %v3802_v48 = vadd.f32 %v3794_v16, %v6540_v3  ;;  %v3796_v25 = vmul.f32 0.044715, %v3788_v17  ;;  %v6562_v27 = vadd.f32 %v3770_v19, %v3641_v63  ;;  %v3772_v47 = vpop.f32.mrb[46].mxu1 }
0x11db   : > { %v3809_v28 = vmul.f32 0.7978846, %v3801_v13  ;;  %v3803_v26 = vadd.f32 %v3795_v21, %v6544_v32  ;;  %v3781_v53 = vmul.f32 %v6559_v24, %v6559_v24  ;;  %v6567_v1 = vadd.f32 %v3772_v47, %v3637_v59  ;;  %v3774_v30 = vpop.f32.mrb[47].mxu1 }
0x11dc   : > { %v3810_v31 = vmul.f32 0.7978846, %v3802_v48  ;;  %v3804_v29 = vadd.f32 %v3796_v25, %v6548_v10  ;;  %v3782_v33 = vmul.f32 %v6562_v27, %v6562_v27  ;;  %v6572_v60 = vadd.f32 %v3774_v30, %v3641_v63 }
0x11dd   : > { %5658 = vtanh.f32 %v3809_v28  ;;  %v3811_v34 = vmul.f32 0.7978846, %v3803_v26  ;;  %v3789_v35 = vmul.f32 %v3781_v53, %v6559_v24  ;;  %v3783_v36 = vmul.f32 %v6567_v1, %v6567_v1 }
0x11de   : > { %5660 = vtanh.f32 %v3810_v31  ;;  %v3812_v37 = vmul.f32 0.7978846, %v3804_v29  ;;  %v3790_v38 = vmul.f32 %v3782_v33, %v6562_v27  ;;  %v3784_v39 = vmul.f32 %v6572_v60, %v6572_v60 }
0x11df   : > { %5662 = vtanh.f32 %v3811_v34  ;;  %v3797_v40 = vmul.f32 0.044715, %v3789_v35  ;;  %v3791_v41 = vmul.f32 %v3783_v36, %v6567_v1 }
0x11e0   : > { %5664 = vtanh.f32 %v3812_v37  ;;  %v3798_v42 = vmul.f32 0.044715, %v3790_v38  ;;  %v3792_v43 = vmul.f32 %v3784_v39, %v6572_v60  ;;  %v4039_v39 = vsub.s32 5, %v6143_v62 }
0x11e1   : > { %v3805_v44 = vadd.f32 %v3797_v40, %v6559_v24  ;;  %v3799_v45 = vmul.f32 0.044715, %v3791_v41  ;;  %v4693_v41 = vld [vmem:[%s6793_s3] ss:$0 sm:$0xff] }
0x11e2   : > { %v3806_v46 = vadd.f32 %v3798_v42, %v6562_v27  ;;  %v3800_v52 = vmul.f32 0.044715, %v3792_v43 }
0x11e3   : > { %v3813_v49 = vmul.f32 0.7978846, %v3805_v44  ;;  %v3807_v50 = vadd.f32 %v3799_v45, %v6567_v1 }
0x11e4   : > { %v3814_v51 = vmul.f32 0.7978846, %v3806_v46  ;;  %v3808_v59 = vadd.f32 %v3800_v52, %v6572_v60 }
0x11e5   : > { %5666 = vtanh.f32 %v3813_v49  ;;  %v3815_v63 = vmul.f32 0.7978846, %v3807_v50 }
0x11e6   : > { %5668 = vtanh.f32 %v3814_v51  ;;  %v3816_v0 = vmul.f32 0.7978846, %v3808_v59 }
0x11e7   : > { %v5659_v5 = vpop.eup %5658  ;;  %5670 = vtanh.f32 %v3815_v63 }
0x11e8   : > { %v5661_v7 = vpop.eup %5660  ;;  %v3825_v8 = vadd.f32 1.0, %v5659_v5  ;;  %5672 = vtanh.f32 %v3816_v0 }
0x11e9   : > { %v5663_v9 = vpop.eup %5662  ;;  %v3826_v58 = vadd.f32 1.0, %v5661_v7 }
0x11ea   : > { %v5665_v54 = vpop.eup %5664  ;;  %v3833_v57 = vmul.f32 0.5, %v3825_v8  ;;  %v3827_v12 = vadd.f32 1.0, %v5663_v9 }
0x11eb   : > { %v3828_v55 = vadd.f32 1.0, %v5665_v54  ;;  %v3834_v15 = vmul.f32 0.5, %v3826_v58 }
0x11ec   : > { %v3835_v11 = vmul.f32 0.5, %v3827_v12  ;;  %v3841_v17 = vmul.f32 %v3833_v57, %v6538_v4 }
0x11ed   : > { %v3836_v16 = vmul.f32 0.5, %v3828_v55  ;;  %v3842_v21 = vmul.f32 %v3834_v15, %v6540_v3 }
0x11ee   : > { %v3843_v18 = vmul.f32 %v3835_v11, %v6544_v32 }
0x11ef   : > { %v5667_v13 = vpop.eup %5666  ;;  %v3844_v19 = vmul.f32 %v3836_v16, %v6548_v10 }
0x11f0   : > { %v5669_v48 = vpop.eup %5668  ;;  %v3849_v25 = vpack.c.bf16 %v3843_v18, %v3841_v17  ;;  %v3829_v47 = vadd.f32 1.0, %v5667_v13 }
0x11f1   : > { %v5671_v28 = vpop.eup %5670  ;;  %v3850_v26 = vpack.c.bf16 %v3844_v19, %v3842_v21  ;;  %v3830_v53 = vadd.f32 1.0, %v5669_v48 }
0x11f2   : > { %v5673_v30 = vpop.eup %5672  ;;  %v3831_v31 = vadd.f32 1.0, %v5671_v28  ;;  %v3837_v29 = vmul.f32 0.5, %v3829_v47  ;;  %v5679_v47 = vld [vmem:[%s6732_s23 + $0x8] sm:$0xff] (!%p4710_p5)   ;;  %v5680_v28 = vld [vmem:[%s6732_s23 + $0x10] sm:$0xff] (!%p4710_p5)  }
0x11f3   : > { %4020 = vmatprep.mubr.bf16.mxu0 %v3850_v26  ;;  %v3832_v33 = vadd.f32 1.0, %v5673_v30  ;;  %v3838_v4 = vmul.f32 0.5, %v3830_v53  ;;  %v5681_v26 = vld [vmem:[%s6732_s23 + $0x18] sm:$0xff] (!%p4710_p5)   ;;  %v5682_v53 = vld [vmem:[%s6732_s23 + $0x20] sm:$0xff] (!%p4710_p5)   ;;  %v5683_v30 = vld [vmem:[%s6732_s23 + $0x28] sm:$0xff] (!%p4710_p5)  }
0x11f4   : > { %4021 = vmatmul.mubr.bf16.vlgmr.msra.gmra.mrb[36].mxu0 %v3849_v25  ;;  %v3839_v32 = vmul.f32 0.5, %v3831_v31  ;;  %v3845_v3 = vmul.f32 %v3837_v29, %v6559_v24  ;;  %v5678_v25 = vld [vmem:[%s6732_s23] sm:$0xff] (!%p4710_p5)   ;;  %v5684_v31 = vld [vmem:[%s6732_s23 + $0x30] sm:$0xff] (!%p4710_p5)   ;;  %v5685_v29 = vld [vmem:[%s6732_s23 + $0x38] sm:$0xff] (!%p4710_p5)  }
0x11f5   : > { %v3840_v34 = vmul.f32 0.5, %v3832_v33  ;;  %v3846_v35 = vmul.f32 %v3838_v4, %v6562_v27  ;;  %5299 = vmatprep.subr.bf16.mxu0 (!%p4710_p5), %v5678_v25 }
0x11f6   : > { %v3847_v10 = vmul.f32 %v3839_v32, %v6567_v1  ;;  %v4040_v1 = vrot.slane %v6141_v61, %v4039_v39  ;;  %5300 = vmatpush3.bf16.msra.mxu0 (!%p4710_p5), %v5678_v25 }
0x11f7   : > { %v3848_v36 = vmul.f32 %v3840_v34, %v6572_v60  ;;  %5301 = vmatprep.subr.bf16.mxu0 (!%p4710_p5), %v5679_v47 }
0x11f8   : > { %v3851_v37 = vpack.c.bf16 %v3847_v10, %v3845_v3 }
0x11f9   : > { %v3852_v38 = vpack.c.bf16 %v3848_v36, %v3846_v35  ;;  %v4065_v36 = vld [vmem:[%s6731_s22] sm:$0x3] (!%p4710_p5) }
0x11fa   : > { %5302 = vmatpush3.bf16.msra.mxu0 (!%p4710_p5), %v5679_v47 }
0x11fb   : > { %4028 = vmatprep.mubr.bf16.mxu0 %v3852_v38  ;;  %5303 = vmatprep.subr.bf16.mxu0 (!%p4710_p5), %v5680_v28 }
0x11fc   : > { %4029 = vmatmul.mubr.bf16.gmra.mrb[40].mxu0 %v3851_v37 }
0x11fe   : > { %5304 = vmatpush3.bf16.msra.mxu0 (!%p4710_p5), %v5680_v28 }
0x11ff   : > { %5305 = vmatprep.subr.bf16.mxu0 (!%p4710_p5), %v5681_v26 }
0x1202   : > { %5306 = vmatpush3.bf16.msra.mxu0 (!%p4710_p5), %v5681_v26 }
0x1203   : > { %5307 = vmatprep.subr.bf16.mxu0 (!%p4710_p5), %v5682_v53 }
0x1206   : > { %5308 = vmatpush3.bf16.msra.mxu0 (!%p4710_p5), %v5682_v53 }
0x1207   : > { %5309 = vmatprep.subr.bf16.mxu0 (!%p4710_p5), %v5683_v30 }
0x120a   : > { %5310 = vmatpush3.bf16.msra.mxu0 (!%p4710_p5), %v5683_v30 }
0x120b   : > { %5311 = vmatprep.subr.bf16.mxu0 (!%p4710_p5), %v5684_v31 }
0x120e   : > { %5312 = vmatpush3.bf16.msra.mxu0 (!%p4710_p5), %v5684_v31 }
0x120f   : > { %5313 = vmatprep.subr.bf16.mxu0 (!%p4710_p5), %v5685_v29 }
0x1212   : > { %5314 = vmatpush3.bf16.msra.mxu0 (!%p4710_p5), %v5685_v29 }
0x12c7   : > { %v4937_v40 = vpop.f32.mrb[36].mxu0 }
0x12c8   : > { %v4938_v42 = vpop.f32.mrb[37].mxu0 }
0x12c9   : > { %v4939_v24 = vadd.f32 %v4938_v42, %v4937_v40  ;;  %v4940_v43 = vpop.f32.mrb[38].mxu0  ;;  %v4066_v40 = vadd.f32 (!%p4710_p5), %v6137_v56, %v4065_v36 }
0x12ca   : > { %v4941_v27 = vpop.f32.mrb[39].mxu0 }
0x12cb   : > { %v4023_v44 = vadd.f32 %v4939_v24, %v4693_v41  ;;  %v4942_v60 = vadd.f32 %v4941_v27, %v4940_v43  ;;  %v4111_v24 = vadd.f32 (!%p4710_p5), 1.0, %v4066_v40 }
0x12cd   : > { %v4041_v45 = vmul.f32 %v4040_v1, %v4023_v44  ;;  %v4026_v46 = vadd.f32 %v4942_v60, %v4693_v41  ;;  %v4115_v27 = vrot.slane (!%p4710_p5), %v4111_v24, %v6149_v2 }
0x12cf   : > { %v4045_v52 = vadd.f32 %v4041_v45, %v6475_v20  ;;  %v4042_v49 = vmul.f32 %v4040_v1, %v4026_v46  ;;  %v4943_v62 = vpop.f32.mrb[40].mxu0 }
0x12d0   : > { %v4944_v50 = vpop.f32.mrb[41].mxu0 }
0x12d1   : > { %4049 = vst [vmem:[#allocation2] sm:$0xff] %v4045_v52  ;;  %v4046_v51 = vadd.f32 %v4042_v49, %v6479_v22  ;;  %v4945_v59 = vadd.f32 %v4944_v50, %v4943_v62  ;;  %v4946_v63 = vpop.f32.mrb[42].mxu0  ;;  %4067 = vadd.xlane.f32.xlu0 (!%p4710_p5), %v4045_v52  ;;  %4057 = vst [vmem:[#allocation4] sm:$0xff] (!%p4710_p5), %v4045_v52 }
0x12d2   : > { %v4947_v0 = vpop.f32.mrb[43].mxu0  ;;  %4061 = vst [vmem:[#allocation6] sm:$0xff] (!%p4710_p5), %v4045_v52 }
0x12d3   : > { %4050 = vst [vmem:[#allocation2 + $0x8] sm:$0xff] %v4046_v51  ;;  %v4031_v5 = vadd.f32 %v4945_v59, %v4693_v41  ;;  %v4948_v61 = vadd.f32 %v4947_v0, %v4946_v63  ;;  %4058 = vst [vmem:[#allocation4 + $0x8] sm:$0xff] (!%p4710_p5), %v4046_v51 }
0x12d4   : > { %4062 = vst [vmem:[#allocation6 + $0x8] sm:$0xff] (!%p4710_p5), %v4046_v51 }
0x12d5   : > { %v4043_v7 = vmul.f32 %v4040_v1, %v4031_v5  ;;  %v4034_v8 = vadd.f32 %v4948_v61, %v4693_v41  ;;  %4056 = sbr.rel (%p4710_p5) target bundleno = 5360 (0x14f0), region = 128  ;;  %4069 = vadd.xlane.f32.xlu0 (!%p4710_p5), %v4046_v51 }
0x12d7   : > { %v4047_v9 = vadd.f32 %v4043_v7, %v6483_v14  ;;  %v4044_v58 = vmul.f32 %v4040_v1, %v4034_v8 }
0x12d9   : > { %4051 = vst [vmem:[#allocation2 + $0x10] sm:$0xff] %v4047_v9  ;;  %v4048_v20 = vadd.f32 %v4044_v58, %v6487_v23  ;;  %4071 = vadd.xlane.f32.xlu1 (!%p4710_p5), %v4047_v9  ;;  %4059 = vst [vmem:[#allocation4 + $0x10] sm:$0xff] (!%p4710_p5), %v4047_v9 }
0x12da   : > { %4063 = vst [vmem:[#allocation6 + $0x10] sm:$0xff] (!%p4710_p5), %v4047_v9 }
0x12db   : > { %4052 = vst [vmem:[#allocation2 + $0x18] sm:$0xff] %v4048_v20  ;;  %4060 = vst [vmem:[#allocation4 + $0x18] sm:$0xff] (!%p4710_p5), %v4048_v20 }
0x12dc   : > { %4064 = vst [vmem:[#allocation6 + $0x18] sm:$0xff] %v4048_v20 }
0x12dd   : > { %4073 = vadd.xlane.f32.xlu1 %v4048_v20 }
0x135e   : > { %v4068_v22 = vpop.xlane.xlu0 %4067 }
0x135f   : > { %v4075_v54 = vmul.f32 0.0078125, %v4068_v22 }
0x1361   : > { %v4079_v57 = vsub.f32 %v4045_v52, %v4075_v54  ;;  %v4123_v52 = vrot.slane %v4066_v40, %v6155_v6  ;;  %v4711_v6 = vld [vmem:[%s6733_s24] ss:$0 sm:$0xff] }
0x1362   : > { %v4070_v55 = vpop.xlane.xlu0 %4069 }
0x1363   : > { %v4076_v11 = vmul.f32 0.0078125, %v4070_v55  ;;  %v4083_v16 = vmul.f32 %v4079_v57, %v4079_v57 }
0x1365   : > { %v4080_v18 = vsub.f32 %v4046_v51, %v4076_v11  ;;  %4087 = vadd.xlane.f32.xlu0 %v4083_v16 }
0x1366   : > { %v4072_v14 = vpop.xlane.xlu1 %4071 }
0x1367   : > { %v4077_v23 = vmul.f32 0.0078125, %v4072_v14  ;;  %v4084_v19 = vmul.f32 %v4080_v18, %v4080_v18 }
0x1369   : > { %v6606_v12 = vsub.f32 %v4047_v9, %v4077_v23  ;;  %4089 = vadd.xlane.f32.xlu1 %v4084_v19 }
0x136a   : > { %v4074_v15 = vpop.xlane.xlu1 %4073 }
0x136b   : > { %v4078_v17 = vmul.f32 0.0078125, %v4074_v15  ;;  %v4085_v21 = vmul.f32 %v6606_v12, %v6606_v12 }
0x136d   : > { %v6608_v13 = vsub.f32 %v4048_v20, %v4078_v17  ;;  %4091 = vadd.xlane.f32.xlu0 %v4085_v21 }
0x136f   : > { %v4086_v48 = vmul.f32 %v6608_v13, %v6608_v13 }
0x1371   : > { %4093 = vadd.xlane.f32.xlu1 %v4086_v48 }
0x13f2   : > { %v4088_v33 = vpop.xlane.xlu0 %4087 }
0x13f3   : > { %v4095_v4 = vmul.f32 0.0078125, %v4088_v33 }
0x13f5   : > { %v4099_v32 = vadd.f32 1e-06, %v4095_v4 }
0x13f6   : > { %v4090_v34 = vpop.xlane.xlu1 %4089 }
0x13f7   : > { %5686 = vrsqrt.f32 %v4099_v32  ;;  %v4096_v10 = vmul.f32 0.0078125, %v4090_v34 }
0x13f9   : > { %v4100_v37 = vadd.f32 1e-06, %v4096_v10 }
0x13fa   : > { %v4092_v3 = vpop.xlane.xlu0 %4091 }
0x13fb   : > { %v4097_v35 = vmul.f32 0.0078125, %v4092_v3  ;;  %5688 = vrsqrt.f32 %v4100_v37 }
0x13fd   : > { %v4101_v38 = vadd.f32 1e-06, %v4097_v35 }
0x13fe   : > { %v4094_v39 = vpop.xlane.xlu1 %4093 }
0x13ff   : > { %v4098_v41 = vmul.f32 0.0078125, %v4094_v39  ;;  %5690 = vrsqrt.f32 %v4101_v38 }
0x1401   : > { %v4102_v42 = vadd.f32 1e-06, %v4098_v41  ;;  %v5687_v1 = vpop.eup %5686 }
0x1402   : > { %v4107_v43 = vmul.f32 %v5687_v1, %v4079_v57 }
0x1403   : > { %5692 = vrsqrt.f32 %v4102_v42 }
0x1404   : > { %v4116_v46 = vmul.f32 %v4115_v27, %v4107_v43 }
0x1405   : > { %v5689_v44 = vpop.eup %5688 }
0x1406   : > { %v4108_v45 = vmul.f32 %v5689_v44, %v4080_v18  ;;  %v4124_v50 = vadd.f32 %v4123_v52, %v4116_v46 }
0x1408   : > { %v4117_v62 = vmul.f32 %v4115_v27, %v4108_v45 }
0x1409   : > { %v5691_v60 = vpop.eup %5690 }
0x140a   : > { %v4109_v49 = vmul.f32 %v5691_v60, %v6606_v12  ;;  %v4125_v51 = vadd.f32 %v4123_v52, %v4117_v62 }
0x140c   : > { %v4118_v63 = vmul.f32 %v4115_v27, %v4109_v49  ;;  %v4128_v0 = vpack.c.bf16 %v4125_v51, %v4124_v50 }
0x140d   : > { %v5693_v56 = vpop.eup %5692 }
0x140e   : > { %v4110_v59 = vmul.f32 %v5693_v56, %v6608_v13  ;;  %5315 = vmatprep.mubr.bf16.mxu0 %v4128_v0  ;;  %v4126_v61 = vadd.f32 %v4123_v52, %v4118_v63 }
0x1410   : > { %v4119_v5 = vmul.f32 %v4115_v27, %v4110_v59 }
0x1412   : > { %v4127_v2 = vadd.f32 %v4123_v52, %v4119_v5 }
0x1414   : > { %v4129_v7 = vpack.c.bf16 %v4127_v2, %v4126_v61 }
0x1416   : > { %5316 = vmatmul.mubr.bf16.vlgmr.msra.gmra.mrb[0].mxu0 %v4129_v7 }
0x14e9   : > { %v5317_v8 = vpop.f32.mrb[0].mxu0 }
0x14ea   : > { %v4244_v9 = vadd.f32 %v5317_v8, %v4711_v6  ;;  %v4235_v58 = vpop.f32.mrb[1].mxu0 }
0x14eb   : > { %v4236_v20 = vadd.f32 %v4711_v6, %v4235_v58  ;;  %v5318_v22 = vpop.f32.mrb[2].mxu0 }
0x14ec   : > { %4252 = vst [vmem:[%s6794_s7 + $0x10] sm:$0xff] %v4244_v9  ;;  %v4247_v14 = vadd.f32 %v5318_v22, %v4711_v6  ;;  %v4238_v54 = vpop.f32.mrb[3].mxu0 }
0x14ed   : > { %4250 = vst [vmem:[%s6795_s25] sm:$0xff] %v4236_v20  ;;  %v4239_v23 = vadd.f32 %v4711_v6, %v4238_v54 }
0x14ee   : > { %4253 = vst [vmem:[%s6795_s25 + $0x18] sm:$0xff] %v4247_v14 }
0x14ef   : > { %4251 = vst [vmem:[%s6795_s25 + $0x8] sm:$0xff] %v4239_v23 }
0x14f0 PF: > { %p5405_p6 = scmp.eq.s32.totalorder %s5918_s4, 1  ;;  %s5768_s1 = smov [#allocation4]  }
0x14f1   : > { %s4260_s26 = sshll.u32 %s5768_s1, 4  ;;  %s4261_s26 = int_to_ptr.vmem [resolvable:$true] %s4260_s26 }
0x14f2   : > { %s5694_s28 = scalar_lea.vmem %s4261_s26, 512  ;;  %p5701_p10 = scmp.lt.s32.totalorder %s4261_s26, %s4261_s26 }
0x14f3   : > { %p5695_p7 = scmp.ne.s32.totalorder %s4261_s26, %s5694_s28  ;;  %p5702_p11 = scmp.lt.s32.totalorder %s5694_s28, %s5694_s28 }
0x14f5   : > { %p5696_p8 = pnand %p5695_p7, %p5405_p6  ;;  %p5703_p12 = por %p5702_p11, %p5701_p10 }
0x14f7   : > { %p5697_p9 = pneg %p5696_p8 }
0x14f9   : > { %p5704_p13 = pnand %p5703_p12, %p5697_p9 }
0x14fb   : > { %5707 = shalt.err (!%p5704_p13)
}
0x14fc   : > { %s6796_s3 = sld [smem:[#allocation30_spill]] }
0x1502   : > { %s5708_s8 = scalar_lea.hbm %s6796_s3, 512 }
0x1503   : > { %p5709_p0 = scmp.ne.s32.totalorder %s6796_s3, %s5708_s8  ;;  %p5714_p3 = scmp.lt.u32.totalorder %s5708_s8, %s6796_s3 }
0x1505   : > { %p5710_p1 = pnand %p5709_p0, %p5405_p6 }
0x1507   : > { %p5711_p2 = pneg %p5710_p1 }
0x1509   : > { %p5716_p4 = pnand %p5714_p3, %p5711_p2 }
0x150b   : > { %5719 = shalt.err (!%p5716_p4)
}
0x150c   : > { %s5769_s27 = smov 128   ;;  %s5770_s0 = smov 8  }
0x150d   : > { %5398 = dma.vmem_to_hbm [thread:$0]  (%p5405_p6), %s4261_s26, 512, %s6796_s3, [#allocation5], %s5769_s27, %s5769_s27, %s5770_s0  }
0x150e   : > { %s5771_s12 = smov [#allocation6]  }
0x150f   : > { %s4273_s11 = sshll.u32 %s5771_s12, 4  ;;  %s4274_s11 = int_to_ptr.vmem [resolvable:$true] %s4273_s11 }
0x1510   : > { %s5720_s1 = scalar_lea.vmem %s4274_s11, 512  ;;  %p5727_p9 = scmp.lt.s32.totalorder %s4274_s11, %s4274_s11 }
0x1511   : > { %p5721_p5 = scmp.ne.s32.totalorder %s4274_s11, %s5720_s1  ;;  %p5728_p10 = scmp.lt.s32.totalorder %s5720_s1, %s5720_s1 }
0x1513   : > { %p5722_p7 = pnand %p5721_p5, %p5405_p6  ;;  %p5729_p11 = por %p5728_p10, %p5727_p9 }
0x1515   : > { %p5723_p8 = pneg %p5722_p7 }
0x1517   : > { %p5730_p12 = pnand %p5729_p11, %p5723_p8 }
0x1519   : > { %5733 = shalt.err (!%p5730_p12)
}
0x151a   : > { %s6797_s14 = sld [smem:[#allocation31_spill]] }
0x1520   : > { %s5734_s8 = scalar_lea.hbm %s6797_s14, 512 }
0x1521   : > { %p5735_p13 = scmp.ne.s32.totalorder %s6797_s14, %s5734_s8  ;;  %p5740_p2 = scmp.lt.u32.totalorder %s5734_s8, %s6797_s14 }
0x1523   : > { %p5736_p0 = pnand %p5735_p13, %p5405_p6 }
0x1525   : > { %p5737_p1 = pneg %p5736_p0 }
0x1527   : > { %p5742_p3 = pnand %p5740_p2, %p5737_p1 }
0x1529   : > { %5745 = shalt.err (!%p5742_p3)
}
0x152a   : > { %5400 = dma.vmem_to_hbm [thread:$0]  (%p5405_p6), %s4274_s11, 512, %s6797_s14, [#allocation7], %s5769_s27, %s5769_s27, %s5770_s0  }
0x152b   : > { %5751 = dma.done.wait (%p5405_p6), [#allocation5], 512  }
0x152c   : > { %5753 = vsyncadd (%p5405_p6), [#allocation5], 4294966784 }
0x152d   : > { %5755 = dma.done.wait (%p5405_p6), [#allocation7], 512  }
0x152e   : > { %5757 = vsyncadd (%p5405_p6), [#allocation7], 4294966784 }
0x152f PF: > { %s6798_s9 = sld [smem:[#allocation10_spill]] }
0x1535   : > { %s40_s7 = sadd.s32 1, %s6798_s9  }
0x1536   : > { %p37_p4 = scmp.ge.s32.totalorder %s40_s7, 4  }
0x1538   :  { %39 = sbr.rel (!%p37_p4) target bundleno = 25 (0x19), region = 204 }
0x153f   :  { %4299 = vsyncpa [#allocation5], 1 }
0x1540   :  { %4301 = vsyncpa [#allocation5 + $0x1], 1 }
0x1541   :  { %4302 = vsyncpa [#allocation7], 1 }

</bundles_post_ra>
